<compile_context>
chip_gen: v7x
topology: tpu7x:2x2x1
jax: 0.10.0
libtpu: 0.0.40
codegen_flags: <defaults>
</compile_context>

<pallas_src>
import numpy as np
import jax
import jax.numpy as jnp
from jax.experimental import pallas as pl
from jax.experimental.pallas import tpu as pltpu


def _dot_t(a, b):
    """Contract over axis 0: a[K, M] x b[K, C] -> [M, C] (MXU, f32 accumulate)."""
    return jax.lax.dot_general(a, b, (((0,), (0,)), ((), ())),
                               preferred_element_type=jnp.float32)


def _sage_edge_gate_kernel(
    row_ref, col_ref, x_ref, ea_ref,
    wl_ref, bl_ref, wr_ref,
    wee_ref, bee_ref, wte_ref, bte_ref, wta_ref, bta_ref,
    wg_ref, bg_ref,
    gamma_ref, beta_ref,
    o_ref,
    agg_sc, deg_sc, out_sc, scat_sc,
):
    phase = pl.program_id(0)          # 0: SAGE aggregation, 1: gate/scatter/BN
    tile = pl.program_id(1)
    n_tiles = pl.num_programs(1)

    N = x_ref.shape[0]
    TE = col_ref.shape[1]
    Cin = x_ref.shape[1]

    # One-hot "col == node" mask, transposed layout [N, TE]: nodes on sublanes,
    # edges of this tile on lanes.  Exact 0/1 values => bf16 is bit-accurate.
    col = col_ref[...]                                             # [1, TE] int32
    node_ids = jax.lax.broadcasted_iota(jnp.int32, (N, TE), 0)
    col_oh = node_ids == col                                       # [N, TE] bool
    col_oh_bf = col_oh.astype(jnp.bfloat16)

    @pl.when(jnp.logical_and(phase == 0, tile == 0))
    def _init():
        agg_sc[...] = jnp.zeros_like(agg_sc)
        deg_sc[...] = jnp.zeros_like(deg_sc)
        scat_sc[...] = jnp.zeros_like(scat_sc)

    # ------------- phase 0: SAGE mean aggregation over edge tiles -------------
    @pl.when(phase == 0)
    def _phase0():
        row = row_ref[...]                                          # [1, TE]
        row_oh_bf = (node_ids == row).astype(jnp.bfloat16)          # [N, TE]
        x_bf = x_ref[...]                                           # [N, Cin] bf16

        # gather x[row] (contract over N), then scatter-add into target nodes.
        x_src = _dot_t(row_oh_bf, x_bf)                             # [TE, Cin] f32
        agg_sc[...] += jnp.dot(col_oh_bf, x_src.astype(jnp.bfloat16),
                               preferred_element_type=jnp.float32)  # [N, Cin]
        # in-degree on the MXU (ones matmul), replicated across Cin lanes so no
        # width-1 matmul / slicing is needed.
        deg_sc[...] += jnp.dot(col_oh_bf, jnp.ones((TE, Cin), jnp.bfloat16),
                               preferred_element_type=jnp.float32)  # [N, Cin]

        @pl.when(tile == n_tiles - 1)
        def _finish_sage():
            # normalize AFTER aggregation (N*Cin divides, EUP reciprocal).
            inv_deg = pl.reciprocal(jnp.maximum(deg_sc[...], 1.0), approx=True)
            mean = agg_sc[...] * inv_deg                            # [N, Cin]
            out_sc[...] = (
                jnp.dot(mean.astype(jnp.bfloat16), wl_ref[...],
                        preferred_element_type=jnp.float32) + bl_ref[...]
                + jnp.dot(x_bf, wr_ref[...],
                          preferred_element_type=jnp.float32))      # [N, Cout]

    # ---------- phase 1: edge transforms, gate, scatter, BN, ReLU -------------
    @pl.when(phase == 1)
    def _phase1():
        ea = ea_ref[...]                                            # [TE, Da] bf16
        e_emb = jnp.maximum(
            jnp.dot(ea, wee_ref[...], preferred_element_type=jnp.float32)
            + bee_ref[...], 0.0)                                    # [TE, Demb]
        t_attr = (jnp.dot(ea, wta_ref[...], preferred_element_type=jnp.float32)
                  + bta_ref[...])                                   # [TE, Cout]
        t = (jnp.dot(e_emb.astype(jnp.bfloat16), wte_ref[...],
                     preferred_element_type=jnp.float32)
             + bte_ref[...] + t_attr)                               # [TE, Cout]

        # gather out[col] from the resident SAGE output.
        out_col = _dot_t(col_oh_bf, out_sc[...].astype(jnp.bfloat16))  # [TE, Cout]

        # fused gate: cat([out[col], t, t_attr]) @ W_g  (single K=3*Cout matmul)
        combined = jnp.concatenate([out_col, t, t_attr], axis=-1)   # [TE, 3*Cout]
        logits = (jnp.dot(combined.astype(jnp.bfloat16), wg_ref[...],
                          preferred_element_type=jnp.float32) + bg_ref[...])
        contrib = jax.nn.sigmoid(logits) * t                        # [TE, Cout] f32

        # torch .scatter_ overwrite semantics: for duplicate targets the last
        # edge wins.  Tiles run in edge order and overwrite on hit, so the
        # tile-local last edge composes to the global last edge.
        edge_ids = jax.lax.broadcasted_iota(jnp.int32, (N, TE), 1)
        last_eid = jnp.max(jnp.where(col_oh, edge_ids, -1), axis=1, keepdims=True)
        w_last = jnp.logical_and(col_oh, edge_ids == last_eid).astype(jnp.bfloat16)
        scat_tile = jnp.dot(w_last, contrib.astype(jnp.bfloat16),
                            preferred_element_type=jnp.float32)     # [N, Cout]
        hit = last_eid >= 0                                         # [N, 1]
        scat_sc[...] = jnp.where(hit, scat_tile, scat_sc[...])

        @pl.when(tile == n_tiles - 1)
        def _finalize():
            out = out_sc[...] + scat_sc[...]
            # BatchNorm1d (training mode: biased batch stats, eps=1e-5).
            mu = jnp.mean(out, axis=0, keepdims=True)
            var = jnp.mean((out - mu) ** 2, axis=0, keepdims=True)
            y = ((out - mu) * jax.lax.rsqrt(var + 1e-5) * gamma_ref[...]
                 + beta_ref[...])
            # residual = Identity applied to post-norm out => out = y + y; ReLU.
            o_ref[...] = jnp.maximum(2.0 * y, 0.0)


def sage_conv_edge_gnn(x, edge_index, edge_attr, params, *, edge_tile=128):
    N, Cin = x.shape
    E = edge_index.shape[1]
    Da = edge_attr.shape[1]
    Cout = params["W_l"].shape[1]
    Demb = params["W_ee"].shape[1]

    # pad edges to a multiple of the tile; padded edges use col = -1 so they
    # never match any node (and therefore contribute nothing).
    n_tiles = max(1, -(-E // edge_tile))
    E_pad = n_tiles * edge_tile
    row = edge_index[0].astype(jnp.int32)
    col = edge_index[1].astype(jnp.int32)
    if E_pad != E:
        pad = E_pad - E
        row = jnp.concatenate([row, jnp.zeros((pad,), jnp.int32)])
        col = jnp.concatenate([col, jnp.full((pad,), -1, jnp.int32)])
        edge_attr = jnp.concatenate(
            [edge_attr, jnp.zeros((pad, Da), edge_attr.dtype)], axis=0)
    row = row.reshape(1, E_pad)     # lane-dense [1, E] index layout
    col = col.reshape(1, E_pad)

    bf = lambda a: a.astype(jnp.bfloat16)
    inputs = [
        row, col, bf(x), bf(edge_attr),
        bf(params["W_l"]), params["b_l"], bf(params["W_r"]),
        bf(params["W_ee"]), params["b_ee"],
        bf(params["W_te"]), params["b_te"],
        bf(params["W_ta"]), params["b_ta"],
        bf(params["W_g"]), params["b_g"],
        params["gamma"], params["beta"],
    ]

    def full2d(shape):
        return pl.BlockSpec(shape, lambda p, i: (0, 0))

    in_specs = [
        # row: only needed in phase 0 (stay on block 0 during phase 1)
        pl.BlockSpec((1, edge_tile), lambda p, i: (0, i * (1 - p))),
        # col: needed in both phases
        pl.BlockSpec((1, edge_tile), lambda p, i: (0, i)),
        # x: full array, resident
        full2d((N, Cin)),
        # edge_attr: only needed in phase 1 (stay on block 0 during phase 0)
        pl.BlockSpec((edge_tile, Da), lambda p, i: (i * p, 0)),
    ] + [full2d(a.shape) for a in inputs[4:]]

    out_specs = pl.BlockSpec((N, Cout), lambda p, i: (0, 0))

    # advisory cost estimate for the XLA scheduler
    mask_flops = 2 * E_pad * N * (3 * Cin + 2 * Cout)
    dense_flops = (2 * E_pad * (Da * Demb + Da * Cout + Demb * Cout
                                + 3 * Cout * Cout)
                   + 4 * N * Cin * Cout)
    cost = pl.CostEstimate(
        flops=int(mask_flops + dense_flops),
        transcendentals=int(E_pad * Cout + N * Cin + Cout),
        bytes_accessed=int(sum(int(np.prod(a.shape)) * a.dtype.itemsize
                               for a in inputs) + N * Cout * 4),
    )

    return pl.pallas_call(
        _sage_edge_gate_kernel,
        out_shape=jax.ShapeDtypeStruct((N, Cout), jnp.float32),
        grid=(2, n_tiles),
        in_specs=in_specs,
        out_specs=out_specs,
        scratch_shapes=[
            pltpu.VMEM((N, Cin), jnp.float32),    # sum of neighbor features
            pltpu.VMEM((N, Cin), jnp.float32),    # in-degree (lane-replicated)
            pltpu.VMEM((N, Cout), jnp.float32),   # SAGE output
            pltpu.VMEM((N, Cout), jnp.float32),   # scatter (last-edge-wins)
        ],
        compiler_params=pltpu.CompilerParams(
            dimension_semantics=("arbitrary", "arbitrary"),
            vmem_limit_bytes=32 * 1024 * 1024),
        cost_estimate=cost,
    )(*inputs)


def init_params(key, in_channels, out_channels, edge_attr_dim, edge_embedding_dim=16):
    ks = jax.random.split(key, 12)

    def rnd_bf16(a):  # pre-round weights so in-kernel bf16 casts are exact
        return a.astype(jnp.bfloat16).astype(jnp.float32)

    def lin_w(k, fan_in, fan_out):
        s = 1.0 / np.sqrt(fan_in)
        return rnd_bf16(jax.random.uniform(k, (fan_in, fan_out), jnp.float32, -s, s))

    def lin_b(k, fan_in, fan_out):
        s = 1.0 / np.sqrt(fan_in)
        return jax.random.uniform(k, (1, fan_out), jnp.float32, -s, s)

    return {
        # SAGEConv: lin_l (bias) on aggregated neighbors, lin_r (no bias) on self
        "W_l": lin_w(ks[0], in_channels, out_channels),
        "b_l": lin_b(ks[1], in_channels, out_channels),
        "W_r": lin_w(ks[2], in_channels, out_channels),
        # edge_embedding: Linear(edge_attr_dim -> edge_embedding_dim)
        "W_ee": lin_w(ks[3], edge_attr_dim, edge_embedding_dim),
        "b_ee": lin_b(ks[4], edge_attr_dim, edge_embedding_dim),
        # edge_transform_emb: Linear(edge_embedding_dim -> out_channels)
        "W_te": lin_w(ks[5], edge_embedding_dim, out_channels),
        "b_te": lin_b(ks[6], edge_embedding_dim, out_channels),
        # edge_transform_attr: Linear(edge_attr_dim -> out_channels)
        "W_ta": lin_w(ks[7], edge_attr_dim, out_channels),
        "b_ta": lin_b(ks[8], edge_attr_dim, out_channels),
        # gate: Linear(3*out_channels -> out_channels), full weight, PyTorch fan_in
        "W_g": lin_w(ks[9], 3 * out_channels, out_channels),
        "b_g": lin_b(ks[10], 3 * out_channels, out_channels),
        # BatchNorm1d affine params (PyTorch default init)
        "gamma": jnp.ones((1, out_channels), jnp.float32),
        "beta": jnp.zeros((1, out_channels), jnp.float32),
    }


def ref_forward(x, edge_index, edge_attr, params):
    """Pure f32 numpy reference mirroring the PyTorch forward (training-mode BN)."""
    p = {k: np.asarray(v, np.float32) for k, v in params.items()}
    x = np.asarray(x, np.float32)
    ea = np.asarray(edge_attr, np.float32)
    row = np.asarray(edge_index[0])
    col = np.asarray(edge_index[1])
    N = x.shape[0]

    # SAGEConv with mean aggregation
    agg = np.zeros((N, x.shape[1]), np.float32)
    deg = np.zeros((N,), np.float32)
    for e in range(row.shape[0]):
        agg[col[e]] += x[row[e]]
        deg[col[e]] += 1.0
    mean = agg / np.maximum(deg, 1.0)[:, None]
    out = mean @ p["W_l"] + p["b_l"] + x @ p["W_r"]

    e_emb = np.maximum(ea @ p["W_ee"] + p["b_ee"], 0.0)
    t_attr = ea @ p["W_ta"] + p["b_ta"]
    t = e_emb @ p["W_te"] + p["b_te"] + t_attr

    combined = np.concatenate([out[col], t, t_attr], axis=-1)
    gate = 1.0 / (1.0 + np.exp(-(combined @ p["W_g"] + p["b_g"])))
    contrib = gate * t

    scat = np.zeros_like(out)
    for e in range(row.shape[0]):
        scat[col[e]] = contrib[e]   # overwrite (torch scatter_): last edge wins
    out = out + scat

    mu = out.mean(axis=0, keepdims=True)
    var = ((out - mu) ** 2).mean(axis=0, keepdims=True)
    y = (out - mu) / np.sqrt(var + 1e-5) * p["gamma"] + p["beta"]
    return np.maximum(2.0 * y, 0.0)


if __name__ == "__main__":
    N, E = 128, 256          # 2 edge tiles of 128 -> exercises the tiled grid
    C_IN, C_OUT, D_EDGE, D_EMB = 16, 32, 8, 16

    key = jax.random.PRNGKey(0)
    kx, ke, kr, kc, kp = jax.random.split(key, 5)
    # round data inputs to bf16-representable values so the in-kernel bf16
    # casts of x / edge_attr / weights are exact; remaining error comes only
    # from intermediate bf16 matmul-operand rounding.
    x = jax.random.normal(kx, (N, C_IN), jnp.float32)
    x = x.astype(jnp.bfloat16).astype(jnp.float32)
    edge_attr = jax.random.normal(ke, (E, D_EDGE), jnp.float32)
    edge_attr = edge_attr.astype(jnp.bfloat16).astype(jnp.float32)
    row = jax.random.randint(kr, (E,), 0, N, jnp.int32)
    col = jax.random.randint(kc, (E,), 0, N, jnp.int32)
    edge_index = jnp.stack([row, col], axis=0)

    params = init_params(kp, C_IN, C_OUT, D_EDGE, D_EMB)

    out = sage_conv_edge_gnn(x, edge_index, edge_attr, params, edge_tile=128)
    out = jax.block_until_ready(out)

    ref = ref_forward(x, edge_index, edge_attr, params)
    # kernel runs matmuls in bf16 (f32 accumulate) -> mixed-precision tolerance
    np.testing.assert_allclose(np.asarray(out), ref, rtol=3e-2, atol=5e-2)
    print("KERNEL_OK")
</pallas_src>

<mosaic_0001>
module attributes {stable_mosaic.version = 11 : i64} {
  func.func @_sage_edge_gate_kernel(%arg0: i32, %arg1: i32, %arg2: memref<1x128xi32, #tpu.memory_space<vmem>>, %arg3: memref<1x128xi32, #tpu.memory_space<vmem>>, %arg4: memref<128x16xbf16, #tpu.memory_space<vmem>>, %arg5: memref<128x8xbf16, #tpu.memory_space<vmem>>, %arg6: memref<16x32xbf16, #tpu.memory_space<vmem>>, %arg7: memref<1x32xf32, #tpu.memory_space<vmem>>, %arg8: memref<16x32xbf16, #tpu.memory_space<vmem>>, %arg9: memref<8x16xbf16, #tpu.memory_space<vmem>>, %arg10: memref<1x16xf32, #tpu.memory_space<vmem>>, %arg11: memref<16x32xbf16, #tpu.memory_space<vmem>>, %arg12: memref<1x32xf32, #tpu.memory_space<vmem>>, %arg13: memref<8x32xbf16, #tpu.memory_space<vmem>>, %arg14: memref<1x32xf32, #tpu.memory_space<vmem>>, %arg15: memref<96x32xbf16, #tpu.memory_space<vmem>>, %arg16: memref<1x32xf32, #tpu.memory_space<vmem>>, %arg17: memref<1x32xf32, #tpu.memory_space<vmem>>, %arg18: memref<1x32xf32, #tpu.memory_space<vmem>>, %arg19: memref<128x32xf32, #tpu.memory_space<vmem>>, %arg20: memref<128x16xf32, #tpu.memory_space<vmem>>, %arg21: memref<128x16xf32, #tpu.memory_space<vmem>>, %arg22: memref<128x32xf32, #tpu.memory_space<vmem>>, %arg23: memref<128x32xf32, #tpu.memory_space<vmem>>) attributes {dimension_semantics = [#tpu.dimension_semantics<arbitrary>, #tpu.dimension_semantics<arbitrary>], iteration_bounds = array<i64: 2, 2>, scalar_prefetch = 0 : i64, scratch_operands = 4 : i64, tpu.core_type = #tpu.core_type<tc>, window_params = [{transform_indices = @transform_0, window_bounds = array<i64: 1, 128>}, {transform_indices = @transform_1, window_bounds = array<i64: 1, 128>}, {pipeline_mode = #tpu.pipeline_mode<synchronous>, transform_indices = @transform_2, window_bounds = array<i64: 128, 16>}, {transform_indices = @transform_3, window_bounds = array<i64: 128, 8>}, {pipeline_mode = #tpu.pipeline_mode<synchronous>, transform_indices = @transform_4, window_bounds = array<i64: 16, 32>}, {pipeline_mode = #tpu.pipeline_mode<synchronous>, transform_indices = @transform_5, window_bounds = array<i64: 1, 32>}, {pipeline_mode = #tpu.pipeline_mode<synchronous>, transform_indices = @transform_6, window_bounds = array<i64: 16, 32>}, {pipeline_mode = #tpu.pipeline_mode<synchronous>, transform_indices = @transform_7, window_bounds = array<i64: 8, 16>}, {pipeline_mode = #tpu.pipeline_mode<synchronous>, transform_indices = @transform_8, window_bounds = array<i64: 1, 16>}, {pipeline_mode = #tpu.pipeline_mode<synchronous>, transform_indices = @transform_9, window_bounds = array<i64: 16, 32>}, {pipeline_mode = #tpu.pipeline_mode<synchronous>, transform_indices = @transform_10, window_bounds = array<i64: 1, 32>}, {pipeline_mode = #tpu.pipeline_mode<synchronous>, transform_indices = @transform_11, window_bounds = array<i64: 8, 32>}, {pipeline_mode = #tpu.pipeline_mode<synchronous>, transform_indices = @transform_12, window_bounds = array<i64: 1, 32>}, {pipeline_mode = #tpu.pipeline_mode<synchronous>, transform_indices = @transform_13, window_bounds = array<i64: 96, 32>}, {pipeline_mode = #tpu.pipeline_mode<synchronous>, transform_indices = @transform_14, window_bounds = array<i64: 1, 32>}, {pipeline_mode = #tpu.pipeline_mode<synchronous>, transform_indices = @transform_15, window_bounds = array<i64: 1, 32>}, {pipeline_mode = #tpu.pipeline_mode<synchronous>, transform_indices = @transform_16, window_bounds = array<i64: 1, 32>}, {pipeline_mode = #tpu.pipeline_mode<synchronous>, transform_indices = @transform_17, window_bounds = array<i64: 128, 32>}]} {
    %c0 = arith.constant 0 : index
    %c0_0 = arith.constant 0 : index
    %0 = vector.load %arg3[%c0, %c0_0] : memref<1x128xi32, #tpu.memory_space<vmem>>, vector<1x128xi32>
    %1 = tpu.iota {dimensions = array<i32: 0>} : vector<128x128xi32>
    %2 = vector.broadcast %0 : vector<1x128xi32> to vector<128x128xi32>
    %3 = arith.cmpi eq, %1, %2 : vector<128x128xi32>
    %4 = arith.extui %3 : vector<128x128xi1> to vector<128x128xi32>
    %5 = arith.sitofp %4 : vector<128x128xi32> to vector<128x128xf32>
    %6 = arith.truncf %5 : vector<128x128xf32> to vector<128x128xbf16>
    %c0_i32 = arith.constant 0 : i32
    %7 = arith.cmpi eq, %arg0, %c0_i32 : i32
    %c0_i32_1 = arith.constant 0 : i32
    %8 = arith.cmpi eq, %arg1, %c0_i32_1 : i32
    %9 = arith.andi %7, %8 : i1
    %10 = arith.extui %9 : i1 to i32
    %c0_i32_2 = arith.constant 0 : i32
    %11 = arith.cmpi ne, %10, %c0_i32_2 : i32
    scf.if %11 {
      %cst = arith.constant 0.000000e+00 : f32
      %18 = vector.broadcast %cst : f32 to vector<128x16xf32>
      %c0_6 = arith.constant 0 : index
      %c0_7 = arith.constant 0 : index
      %19 = vector.load %arg20[%c0_6, %c0_7] : memref<128x16xf32, #tpu.memory_space<vmem>>, vector<128x16xf32>
      tpu.vector_store %arg20[%c0_6, %c0_7], %18 {strides = array<i32>} : memref<128x16xf32, #tpu.memory_space<vmem>>, vector<128x16xf32>,
      %cst_8 = arith.constant 0.000000e+00 : f32
      %20 = vector.broadcast %cst_8 : f32 to vector<128x16xf32>
      %c0_9 = arith.constant 0 : index
      %c0_10 = arith.constant 0 : index
      %21 = vector.load %arg21[%c0_9, %c0_10] : memref<128x16xf32, #tpu.memory_space<vmem>>, vector<128x16xf32>
      tpu.vector_store %arg21[%c0_9, %c0_10], %20 {strides = array<i32>} : memref<128x16xf32, #tpu.memory_space<vmem>>, vector<128x16xf32>,
      %cst_11 = arith.constant 0.000000e+00 : f32
      %22 = vector.broadcast %cst_11 : f32 to vector<128x32xf32>
      %c0_12 = arith.constant 0 : index
      %c0_13 = arith.constant 0 : index
      %23 = vector.load %arg23[%c0_12, %c0_13] : memref<128x32xf32, #tpu.memory_space<vmem>>, vector<128x32xf32>
      tpu.vector_store %arg23[%c0_12, %c0_13], %22 {strides = array<i32>} : memref<128x32xf32, #tpu.memory_space<vmem>>, vector<128x32xf32>,
    } else {
    }
    %c0_i32_3 = arith.constant 0 : i32
    %12 = arith.cmpi eq, %arg0, %c0_i32_3 : i32
    %13 = arith.extui %12 : i1 to i32
    %c0_i32_4 = arith.constant 0 : i32
    %14 = arith.cmpi ne, %13, %c0_i32_4 : i32
    scf.if %14 {
      %c0_6 = arith.constant 0 : index
      %c0_7 = arith.constant 0 : index
      %18 = vector.load %arg2[%c0_6, %c0_7] : memref<1x128xi32, #tpu.memory_space<vmem>>, vector<1x128xi32>
      %19 = vector.broadcast %18 : vector<1x128xi32> to vector<128x128xi32>
      %20 = arith.cmpi eq, %1, %19 : vector<128x128xi32>
      %21 = arith.extui %20 : vector<128x128xi1> to vector<128x128xi32>
      %22 = arith.sitofp %21 : vector<128x128xi32> to vector<128x128xf32>
      %23 = arith.truncf %22 : vector<128x128xf32> to vector<128x128xbf16>
      %c0_8 = arith.constant 0 : index
      %c0_9 = arith.constant 0 : index
      %24 = vector.load %arg4[%c0_8, %c0_9] : memref<128x16xbf16, #tpu.memory_space<vmem>>, vector<128x16xbf16>
      %cst = arith.constant dense<0.000000e+00> : vector<128x16xf32>
      %25 = tpu.matmul %23, %24, %cst {dimension_numbers = #tpu.dot_dimension_numbers<[0], [0], [1], [1], [0, 1, 1, 1], [], []>} : vector<128x128xbf16>, vector<128x16xbf16>, vector<128x16xf32> -> vector<128x16xf32>
      %c0_10 = arith.constant 0 : index
      %c0_11 = arith.constant 0 : index
      %26 = vector.load %arg20[%c0_10, %c0_11] : memref<128x16xf32, #tpu.memory_space<vmem>>, vector<128x16xf32>
      %27 = arith.truncf %25 : vector<128x16xf32> to vector<128x16xbf16>
      %cst_12 = arith.constant dense<0.000000e+00> : vector<128x16xf32>
      %28 = tpu.matmul %6, %27, %cst_12 {dimension_numbers = #tpu.dot_dimension_numbers<[1], [0], [0], [1], [0, 0, 1, 1], [], []>} : vector<128x128xbf16>, vector<128x16xbf16>, vector<128x16xf32> -> vector<128x16xf32>
      %29 = arith.addf %26, %28 : vector<128x16xf32>
      %c0_13 = arith.constant 0 : index
      %c0_14 = arith.constant 0 : index
      %30 = vector.load %arg20[%c0_13, %c0_14] : memref<128x16xf32, #tpu.memory_space<vmem>>, vector<128x16xf32>
      tpu.vector_store %arg20[%c0_13, %c0_14], %29 {strides = array<i32>} : memref<128x16xf32, #tpu.memory_space<vmem>>, vector<128x16xf32>,
      %c0_15 = arith.constant 0 : index
      %c0_16 = arith.constant 0 : index
      %31 = vector.load %arg21[%c0_15, %c0_16] : memref<128x16xf32, #tpu.memory_space<vmem>>, vector<128x16xf32>
      %cst_17 = arith.constant 1.000000e+00 : bf16
      %32 = vector.broadcast %cst_17 : bf16 to vector<128x16xbf16>
      %cst_18 = arith.constant dense<0.000000e+00> : vector<128x16xf32>
      %33 = tpu.matmul %6, %32, %cst_18 {dimension_numbers = #tpu.dot_dimension_numbers<[1], [0], [0], [1], [0, 0, 1, 1], [], []>} : vector<128x128xbf16>, vector<128x16xbf16>, vector<128x16xf32> -> vector<128x16xf32>
      %34 = arith.addf %31, %33 : vector<128x16xf32>
      %c0_19 = arith.constant 0 : index
      %c0_20 = arith.constant 0 : index
      %35 = vector.load %arg21[%c0_19, %c0_20] : memref<128x16xf32, #tpu.memory_space<vmem>>, vector<128x16xf32>
      tpu.vector_store %arg21[%c0_19, %c0_20], %34 {strides = array<i32>} : memref<128x16xf32, #tpu.memory_space<vmem>>, vector<128x16xf32>,
      %c1_i32_21 = arith.constant 1 : i32
      %36 = arith.cmpi eq, %arg1, %c1_i32_21 : i32
      %37 = arith.extui %36 : i1 to i32
      %c0_i32_22 = arith.constant 0 : i32
      %38 = arith.cmpi ne, %37, %c0_i32_22 : i32
      scf.if %38 {
        %c0_23 = arith.constant 0 : index
        %c0_24 = arith.constant 0 : index
        %39 = vector.load %arg21[%c0_23, %c0_24] : memref<128x16xf32, #tpu.memory_space<vmem>>, vector<128x16xf32>
        %cst_25 = arith.constant 1.000000e+00 : f32
        %40 = vector.broadcast %cst_25 : f32 to vector<128x16xf32>
        %41 = arith.maximumf %39, %40 : vector<128x16xf32>
        %42 = tpu.reciprocal %41 {approx = true} : vector<128x16xf32> -> vector<128x16xf32>
        %c0_26 = arith.constant 0 : index
        %c0_27 = arith.constant 0 : index
        %43 = vector.load %arg20[%c0_26, %c0_27] : memref<128x16xf32, #tpu.memory_space<vmem>>, vector<128x16xf32>
        %44 = arith.mulf %43, %42 : vector<128x16xf32>
        %45 = arith.truncf %44 : vector<128x16xf32> to vector<128x16xbf16>
        %c0_28 = arith.constant 0 : index
        %c0_29 = arith.constant 0 : index
        %46 = vector.load %arg6[%c0_28, %c0_29] : memref<16x32xbf16, #tpu.memory_space<vmem>>, vector<16x32xbf16>
        %cst_30 = arith.constant dense<0.000000e+00> : vector<128x32xf32>
        %47 = tpu.matmul %45, %46, %cst_30 {dimension_numbers = #tpu.dot_dimension_numbers<[1], [0], [0], [1], [0, 0, 1, 1], [], []>} : vector<128x16xbf16>, vector<16x32xbf16>, vector<128x32xf32> -> vector<128x32xf32>
        %c0_31 = arith.constant 0 : index
        %c0_32 = arith.constant 0 : index
        %48 = vector.load %arg7[%c0_31, %c0_32] : memref<1x32xf32, #tpu.memory_space<vmem>>, vector<1x32xf32>
        %49 = vector.broadcast %48 : vector<1x32xf32> to vector<128x32xf32>
        %50 = arith.addf %47, %49 : vector<128x32xf32>
        %c0_33 = arith.constant 0 : index
        %c0_34 = arith.constant 0 : index
        %51 = vector.load %arg8[%c0_33, %c0_34] : memref<16x32xbf16, #tpu.memory_space<vmem>>, vector<16x32xbf16>
        %cst_35 = arith.constant dense<0.000000e+00> : vector<128x32xf32>
        %52 = tpu.matmul %24, %51, %cst_35 {dimension_numbers = #tpu.dot_dimension_numbers<[1], [0], [0], [1], [0, 0, 1, 1], [], []>} : vector<128x16xbf16>, vector<16x32xbf16>, vector<128x32xf32> -> vector<128x32xf32>
        %53 = arith.addf %50, %52 : vector<128x32xf32>
        %c0_36 = arith.constant 0 : index
        %c0_37 = arith.constant 0 : index
        %54 = vector.load %arg22[%c0_36, %c0_37] : memref<128x32xf32, #tpu.memory_space<vmem>>, vector<128x32xf32>
        tpu.vector_store %arg22[%c0_36, %c0_37], %53 {strides = array<i32>} : memref<128x32xf32, #tpu.memory_space<vmem>>, vector<128x32xf32>,
      } else {
      }
    } else {
    }
    %c1_i32 = arith.constant 1 : i32
    %15 = arith.cmpi eq, %arg0, %c1_i32 : i32
    %16 = arith.extui %15 : i1 to i32
    %c0_i32_5 = arith.constant 0 : i32
    %17 = arith.cmpi ne, %16, %c0_i32_5 : i32
    scf.if %17 {
      %c0_6 = arith.constant 0 : index
      %c0_7 = arith.constant 0 : index
      %18 = vector.load %arg5[%c0_6, %c0_7] : memref<128x8xbf16, #tpu.memory_space<vmem>>, vector<128x8xbf16>
      %c0_8 = arith.constant 0 : index
      %c0_9 = arith.constant 0 : index
      %19 = vector.load %arg9[%c0_8, %c0_9] : memref<8x16xbf16, #tpu.memory_space<vmem>>, vector<8x16xbf16>
      %cst = arith.constant dense<0.000000e+00> : vector<128x16xf32>
      %20 = tpu.matmul %18, %19, %cst {dimension_numbers = #tpu.dot_dimension_numbers<[1], [0], [0], [1], [0, 0, 1, 1], [], []>} : vector<128x8xbf16>, vector<8x16xbf16>, vector<128x16xf32> -> vector<128x16xf32>
      %c0_10 = arith.constant 0 : index
      %c0_11 = arith.constant 0 : index
      %21 = vector.load %arg10[%c0_10, %c0_11] : memref<1x16xf32, #tpu.memory_space<vmem>>, vector<1x16xf32>
      %22 = vector.broadcast %21 : vector<1x16xf32> to vector<128x16xf32>
      %23 = arith.addf %20, %22 : vector<128x16xf32>
      %cst_12 = arith.constant 0.000000e+00 : f32
      %24 = vector.broadcast %cst_12 : f32 to vector<128x16xf32>
      %25 = arith.maximumf %23, %24 : vector<128x16xf32>
      %c0_13 = arith.constant 0 : index
      %c0_14 = arith.constant 0 : index
      %26 = vector.load %arg13[%c0_13, %c0_14] : memref<8x32xbf16, #tpu.memory_space<vmem>>, vector<8x32xbf16>
      %cst_15 = arith.constant dense<0.000000e+00> : vector<128x32xf32>
      %27 = tpu.matmul %18, %26, %cst_15 {dimension_numbers = #tpu.dot_dimension_numbers<[1], [0], [0], [1], [0, 0, 1, 1], [], []>} : vector<128x8xbf16>, vector<8x32xbf16>, vector<128x32xf32> -> vector<128x32xf32>
      %c0_16 = arith.constant 0 : index
      %c0_17 = arith.constant 0 : index
      %28 = vector.load %arg14[%c0_16, %c0_17] : memref<1x32xf32, #tpu.memory_space<vmem>>, vector<1x32xf32>
      %29 = vector.broadcast %28 : vector<1x32xf32> to vector<128x32xf32>
      %30 = arith.addf %27, %29 : vector<128x32xf32>
      %31 = arith.truncf %25 : vector<128x16xf32> to vector<128x16xbf16>
      %c0_18 = arith.constant 0 : index
      %c0_19 = arith.constant 0 : index
      %32 = vector.load %arg11[%c0_18, %c0_19] : memref<16x32xbf16, #tpu.memory_space<vmem>>, vector<16x32xbf16>
      %cst_20 = arith.constant dense<0.000000e+00> : vector<128x32xf32>
      %33 = tpu.matmul %31, %32, %cst_20 {dimension_numbers = #tpu.dot_dimension_numbers<[1], [0], [0], [1], [0, 0, 1, 1], [], []>} : vector<128x16xbf16>, vector<16x32xbf16>, vector<128x32xf32> -> vector<128x32xf32>
      %c0_21 = arith.constant 0 : index
      %c0_22 = arith.constant 0 : index
      %34 = vector.load %arg12[%c0_21, %c0_22] : memref<1x32xf32, #tpu.memory_space<vmem>>, vector<1x32xf32>
      %35 = vector.broadcast %34 : vector<1x32xf32> to vector<128x32xf32>
      %36 = arith.addf %33, %35 : vector<128x32xf32>
      %37 = arith.addf %36, %30 : vector<128x32xf32>
      %c0_23 = arith.constant 0 : index
      %c0_24 = arith.constant 0 : index
      %38 = vector.load %arg22[%c0_23, %c0_24] : memref<128x32xf32, #tpu.memory_space<vmem>>, vector<128x32xf32>
      %39 = arith.truncf %38 : vector<128x32xf32> to vector<128x32xbf16>
      %cst_25 = arith.constant dense<0.000000e+00> : vector<128x32xf32>
      %40 = tpu.matmul %6, %39, %cst_25 {dimension_numbers = #tpu.dot_dimension_numbers<[0], [0], [1], [1], [0, 1, 1, 1], [], []>} : vector<128x128xbf16>, vector<128x32xbf16>, vector<128x32xf32> -> vector<128x32xf32>
      %41 = tpu.concatenate %40, %37, %30 in 1 : vector<128x32xf32>, vector<128x32xf32>, vector<128x32xf32> -> vector<128x96xf32>
      %42 = arith.truncf %41 : vector<128x96xf32> to vector<128x96xbf16>
      %c0_26 = arith.constant 0 : index
      %c0_27 = arith.constant 0 : index
      %43 = vector.load %arg15[%c0_26, %c0_27] : memref<96x32xbf16, #tpu.memory_space<vmem>>, vector<96x32xbf16>
      %cst_28 = arith.constant dense<0.000000e+00> : vector<128x32xf32>
      %44 = tpu.matmul %42, %43, %cst_28 {dimension_numbers = #tpu.dot_dimension_numbers<[1], [0], [0], [1], [0, 0, 1, 1], [], []>} : vector<128x96xbf16>, vector<96x32xbf16>, vector<128x32xf32> -> vector<128x32xf32>
      %c0_29 = arith.constant 0 : index
      %c0_30 = arith.constant 0 : index
      %45 = vector.load %arg16[%c0_29, %c0_30] : memref<1x32xf32, #tpu.memory_space<vmem>>, vector<1x32xf32>
      %46 = vector.broadcast %45 : vector<1x32xf32> to vector<128x32xf32>
      %47 = arith.addf %44, %46 : vector<128x32xf32>
      %48 = arith.negf %47 : vector<128x32xf32>
      %49 = math.exp %48 : vector<128x32xf32>
      %cst_31 = arith.constant 1.000000e+00 : f32
      %50 = vector.broadcast %cst_31 : f32 to vector<128x32xf32>
      %51 = arith.addf %50, %49 : vector<128x32xf32>
      %52 = arith.divf %50, %51 : vector<128x32xf32>
      %53 = arith.mulf %52, %37 : vector<128x32xf32>
      %54 = tpu.iota {dimensions = array<i32: 1>} : vector<128x128xi32>
      %c-1_i32 = arith.constant -1 : i32
      %55 = vector.broadcast %c-1_i32 : i32 to vector<128x128xi32>
      %56 = arith.select %3, %54, %55 : vector<128x128xi1>, vector<128x128xi32>
      %cst_32 = arith.constant dense<-2147483648> : vector<128xi32>
      %57 = vector.multi_reduction <maxsi>, %56, %cst_32 [1] : vector<128x128xi32> to vector<128xi32>
      %58 = vector.shape_cast %57 : vector<128xi32> to vector<128x1xi32>
      %59 = vector.broadcast %58 : vector<128x1xi32> to vector<128x128xi32>
      %60 = arith.cmpi eq, %54, %59 : vector<128x128xi32>
      %61 = arith.andi %3, %60 : vector<128x128xi1>
      %62 = arith.extui %61 : vector<128x128xi1> to vector<128x128xi32>
      %63 = arith.sitofp %62 : vector<128x128xi32> to vector<128x128xf32>
      %64 = arith.truncf %63 : vector<128x128xf32> to vector<128x128xbf16>
      %65 = arith.truncf %53 : vector<128x32xf32> to vector<128x32xbf16>
      %cst_33 = arith.constant dense<0.000000e+00> : vector<128x32xf32>
      %66 = tpu.matmul %64, %65, %cst_33 {dimension_numbers = #tpu.dot_dimension_numbers<[1], [0], [0], [1], [0, 0, 1, 1], [], []>} : vector<128x128xbf16>, vector<128x32xbf16>, vector<128x32xf32> -> vector<128x32xf32>
      %c0_i32_34 = arith.constant 0 : i32
      %67 = vector.broadcast %c0_i32_34 : i32 to vector<128x1xi32>
      %68 = arith.cmpi sge, %58, %67 : vector<128x1xi32>
      %c0_35 = arith.constant 0 : index
      %c0_36 = arith.constant 0 : index
      %69 = vector.load %arg23[%c0_35, %c0_36] : memref<128x32xf32, #tpu.memory_space<vmem>>, vector<128x32xf32>
      %70 = vector.shape_cast %68 : vector<128x1xi1> to vector<128x1xi1>
      %71 = vector.broadcast %70 : vector<128x1xi1> to vector<128x32xi1>
      %72 = arith.select %71, %66, %69 : vector<128x32xi1>, vector<128x32xf32>
      %c0_37 = arith.constant 0 : index
      %c0_38 = arith.constant 0 : index
      %73 = vector.load %arg23[%c0_37, %c0_38] : memref<128x32xf32, #tpu.memory_space<vmem>>, vector<128x32xf32>
      tpu.vector_store %arg23[%c0_37, %c0_38], %72 {strides = array<i32>} : memref<128x32xf32, #tpu.memory_space<vmem>>, vector<128x32xf32>,
      %c1_i32_39 = arith.constant 1 : i32
      %74 = arith.cmpi eq, %arg1, %c1_i32_39 : i32
      %75 = arith.extui %74 : i1 to i32
      %c0_i32_40 = arith.constant 0 : i32
      %76 = arith.cmpi ne, %75, %c0_i32_40 : i32
      scf.if %76 {
        %c0_41 = arith.constant 0 : index
        %c0_42 = arith.constant 0 : index
        %77 = vector.load %arg22[%c0_41, %c0_42] : memref<128x32xf32, #tpu.memory_space<vmem>>, vector<128x32xf32>
        %c0_43 = arith.constant 0 : index
        %c0_44 = arith.constant 0 : index
        %78 = vector.load %arg23[%c0_43, %c0_44] : memref<128x32xf32, #tpu.memory_space<vmem>>, vector<128x32xf32>
        %79 = arith.addf %77, %78 : vector<128x32xf32>
        %cst_45 = arith.constant dense<0.000000e+00> : vector<32xf32>
        %80 = vector.multi_reduction <add>, %79, %cst_45 [0] : vector<128x32xf32> to vector<32xf32>
        %81 = vector.shape_cast %80 : vector<32xf32> to vector<1x32xf32>
        %cst_46 = arith.constant 1.280000e+02 : f32
        %82 = vector.broadcast %cst_46 : f32 to vector<1x32xf32>
        %83 = arith.divf %81, %82 : vector<1x32xf32>
        %84 = vector.broadcast %83 : vector<1x32xf32> to vector<128x32xf32>
        %85 = arith.subf %79, %84 : vector<128x32xf32>
        %86 = arith.mulf %85, %85 : vector<128x32xf32>
        %cst_47 = arith.constant dense<0.000000e+00> : vector<32xf32>
        %87 = vector.multi_reduction <add>, %86, %cst_47 [0] : vector<128x32xf32> to vector<32xf32>
        %88 = vector.shape_cast %87 : vector<32xf32> to vector<1x32xf32>
        %cst_48 = arith.constant 1.280000e+02 : f32
        %89 = vector.broadcast %cst_48 : f32 to vector<1x32xf32>
        %90 = arith.divf %88, %89 : vector<1x32xf32>
        %91 = vector.broadcast %83 : vector<1x32xf32> to vector<128x32xf32>
        %92 = arith.subf %79, %91 : vector<128x32xf32>
        %cst_49 = arith.constant 9.99999974E-6 : f32
        %93 = vector.broadcast %cst_49 : f32 to vector<1x32xf32>
        %94 = arith.addf %90, %93 : vector<1x32xf32>
        %95 = math.rsqrt %94 : vector<1x32xf32>
        %96 = vector.broadcast %95 : vector<1x32xf32> to vector<128x32xf32>
        %97 = arith.mulf %92, %96 : vector<128x32xf32>
        %c0_50 = arith.constant 0 : index
        %c0_51 = arith.constant 0 : index
        %98 = vector.load %arg17[%c0_50, %c0_51] : memref<1x32xf32, #tpu.memory_space<vmem>>, vector<1x32xf32>
        %99 = vector.broadcast %98 : vector<1x32xf32> to vector<128x32xf32>
        %100 = arith.mulf %97, %99 : vector<128x32xf32>
        %c0_52 = arith.constant 0 : index
        %c0_53 = arith.constant 0 : index
        %101 = vector.load %arg18[%c0_52, %c0_53] : memref<1x32xf32, #tpu.memory_space<vmem>>, vector<1x32xf32>
        %102 = vector.broadcast %101 : vector<1x32xf32> to vector<128x32xf32>
        %103 = arith.addf %100, %102 : vector<128x32xf32>
        %cst_54 = arith.constant 2.000000e+00 : f32
        %104 = vector.broadcast %cst_54 : f32 to vector<128x32xf32>
        %105 = arith.mulf %104, %103 : vector<128x32xf32>
        %cst_55 = arith.constant 0.000000e+00 : f32
        %106 = vector.broadcast %cst_55 : f32 to vector<128x32xf32>
        %107 = arith.maximumf %105, %106 : vector<128x32xf32>
        %c0_56 = arith.constant 0 : index
        %c0_57 = arith.constant 0 : index
        %108 = vector.load %arg19[%c0_56, %c0_57] : memref<128x32xf32, #tpu.memory_space<vmem>>, vector<128x32xf32>
        tpu.vector_store %arg19[%c0_56, %c0_57], %107 {strides = array<i32>} : memref<128x32xf32, #tpu.memory_space<vmem>>, vector<128x32xf32>,
      } else {
      }
    } else {
    }
    return
  }
  func.func @transform_0(%arg0: i32, %arg1: i32) -> (i32, i32) {
    %c1_i32 = arith.constant 1 : i32
    %0 = arith.subi %c1_i32, %arg0 : i32
    %1 = arith.muli %arg1, %0 : i32
    %c0_i32 = arith.constant 0 : i32
    %c0_i32_0 = arith.constant 0 : i32
    return %c0_i32, %1 : i32, i32
  }
  func.func @transform_1(%arg0: i32, %arg1: i32) -> (i32, i32) {
    %c0_i32 = arith.constant 0 : i32
    %c0_i32_0 = arith.constant 0 : i32
    return %c0_i32, %arg1 : i32, i32
  }
  func.func @transform_2(%arg0: i32, %arg1: i32) -> (i32, i32) {
    %c0_i32 = arith.constant 0 : i32
    %c0_i32_0 = arith.constant 0 : i32
    %c0_i32_1 = arith.constant 0 : i32
    return %c0_i32, %c0_i32_0 : i32, i32
  }
  func.func @transform_3(%arg0: i32, %arg1: i32) -> (i32, i32) {
    %0 = arith.muli %arg1, %arg0 : i32
    %c0_i32 = arith.constant 0 : i32
    %c0_i32_0 = arith.constant 0 : i32
    return %0, %c0_i32 : i32, i32
  }
  func.func @transform_4(%arg0: i32, %arg1: i32) -> (i32, i32) {
    %c0_i32 = arith.constant 0 : i32
    %c0_i32_0 = arith.constant 0 : i32
    %c0_i32_1 = arith.constant 0 : i32
    return %c0_i32, %c0_i32_0 : i32, i32
  }
  func.func @transform_5(%arg0: i32, %arg1: i32) -> (i32, i32) {
    %c0_i32 = arith.constant 0 : i32
    %c0_i32_0 = arith.constant 0 : i32
    %c0_i32_1 = arith.constant 0 : i32
    return %c0_i32, %c0_i32_0 : i32, i32
  }
  func.func @transform_6(%arg0: i32, %arg1: i32) -> (i32, i32) {
    %c0_i32 = arith.constant 0 : i32
    %c0_i32_0 = arith.constant 0 : i32
    %c0_i32_1 = arith.constant 0 : i32
    return %c0_i32, %c0_i32_0 : i32, i32
  }
  func.func @transform_7(%arg0: i32, %arg1: i32) -> (i32, i32) {
    %c0_i32 = arith.constant 0 : i32
    %c0_i32_0 = arith.constant 0 : i32
    %c0_i32_1 = arith.constant 0 : i32
    return %c0_i32, %c0_i32_0 : i32, i32
  }
  func.func @transform_8(%arg0: i32, %arg1: i32) -> (i32, i32) {
    %c0_i32 = arith.constant 0 : i32
    %c0_i32_0 = arith.constant 0 : i32
    %c0_i32_1 = arith.constant 0 : i32
    return %c0_i32, %c0_i32_0 : i32, i32
  }
  func.func @transform_9(%arg0: i32, %arg1: i32) -> (i32, i32) {
    %c0_i32 = arith.constant 0 : i32
    %c0_i32_0 = arith.constant 0 : i32
    %c0_i32_1 = arith.constant 0 : i32
    return %c0_i32, %c0_i32_0 : i32, i32
  }
  func.func @transform_10(%arg0: i32, %arg1: i32) -> (i32, i32) {
    %c0_i32 = arith.constant 0 : i32
    %c0_i32_0 = arith.constant 0 : i32
    %c0_i32_1 = arith.constant 0 : i32
    return %c0_i32, %c0_i32_0 : i32, i32
  }
  func.func @transform_11(%arg0: i32, %arg1: i32) -> (i32, i32) {
    %c0_i32 = arith.constant 0 : i32
    %c0_i32_0 = arith.constant 0 : i32
    %c0_i32_1 = arith.constant 0 : i32
    return %c0_i32, %c0_i32_0 : i32, i32
  }
  func.func @transform_12(%arg0: i32, %arg1: i32) -> (i32, i32) {
    %c0_i32 = arith.constant 0 : i32
    %c0_i32_0 = arith.constant 0 : i32
    %c0_i32_1 = arith.constant 0 : i32
    return %c0_i32, %c0_i32_0 : i32, i32
  }
  func.func @transform_13(%arg0: i32, %arg1: i32) -> (i32, i32) {
    %c0_i32 = arith.constant 0 : i32
    %c0_i32_0 = arith.constant 0 : i32
    %c0_i32_1 = arith.constant 0 : i32
    return %c0_i32, %c0_i32_0 : i32, i32
  }
  func.func @transform_14(%arg0: i32, %arg1: i32) -> (i32, i32) {
    %c0_i32 = arith.constant 0 : i32
    %c0_i32_0 = arith.constant 0 : i32
    %c0_i32_1 = arith.constant 0 : i32
    return %c0_i32, %c0_i32_0 : i32, i32
  }
  func.func @transform_15(%arg0: i32, %arg1: i32) -> (i32, i32) {
    %c0_i32 = arith.constant 0 : i32
    %c0_i32_0 = arith.constant 0 : i32
    %c0_i32_1 = arith.constant 0 : i32
    return %c0_i32, %c0_i32_0 : i32, i32
  }
  func.func @transform_16(%arg0: i32, %arg1: i32) -> (i32, i32) {
    %c0_i32 = arith.constant 0 : i32
    %c0_i32_0 = arith.constant 0 : i32
    %c0_i32_1 = arith.constant 0 : i32
    return %c0_i32, %c0_i32_0 : i32, i32
  }
  func.func @transform_17(%arg0: i32, %arg1: i32) -> (i32, i32) {
    %c0_i32 = arith.constant 0 : i32
    %c0_i32_0 = arith.constant 0 : i32
    %c0_i32_1 = arith.constant 0 : i32
    return %c0_i32, %c0_i32_0 : i32, i32
  }
}

</mosaic_0001>

<bundles_post_ra>
// kernel: tpu_custom_call.1
= control target key start
LH: loop header
LB: loop body
LE: loop exit
PB: predicated region body
PF: predicated region fallthrough
CT: control target
= control target key end

     0   :  { %s4645_s24 = smov 0   ;;  %s4647_s25 = smov 0   ;;  %s6530_s0 = inlined_call_operand.vmem [shape: s32[1,256], index: 0, kind: input, shape index: {}]   ;;  %s6531_s1 = inlined_call_operand.vmem [shape: s32[1,256], index: 1, kind: input, shape index: {}]   ;;  %s6532_s2 = inlined_call_operand.vmem [shape: bf16[128,16], index: 2, kind: input, shape index: {}]   ;;  %s6533_s3 = inlined_call_operand.vmem [shape: bf16[256,8], index: 3, kind: input, shape index: {}]   ;;  %s6534_s4 = inlined_call_operand.vmem [shape: bf16[16,32], index: 4, kind: input, shape index: {}]   ;;  %s6535_s5 = inlined_call_operand.vmem [shape: f32[1,32], index: 5, kind: input, shape index: {}]   ;;  %s6536_s6 = inlined_call_operand.vmem [shape: bf16[16,32], index: 6, kind: input, shape index: {}]   ;;  %s6537_s7 = inlined_call_operand.vmem [shape: bf16[8,16], index: 7, kind: input, shape index: {}]   ;;  %s6538_s8 = inlined_call_operand.vmem [shape: f32[1,16], index: 8, kind: input, shape index: {}]   ;;  %s6539_s9 = inlined_call_operand.vmem [shape: bf16[16,32], index: 9, kind: input, shape index: {}]   ;;  %s6540_s10 = inlined_call_operand.vmem [shape: f32[1,32], index: 10, kind: input, shape index: {}]   ;;  %s6541_s11 = inlined_call_operand.vmem [shape: bf16[8,32], index: 11, kind: input, shape index: {}]   ;;  %s6542_s12 = inlined_call_operand.vmem [shape: f32[1,32], index: 12, kind: input, shape index: {}]   ;;  %s6543_s13 = inlined_call_operand.vmem [shape: bf16[96,32], index: 13, kind: input, shape index: {}]   ;;  %s6544_s14 = inlined_call_operand.vmem [shape: f32[1,32], index: 14, kind: input, shape index: {}]   ;;  %s6545_s15 = inlined_call_operand.vmem [shape: f32[1,32], index: 15, kind: input, shape index: {}]   ;;  %s6546_s16 = inlined_call_operand.vmem [shape: f32[1,32], index: 16, kind: input, shape index: {}]   ;;  %s6547_s17 = inlined_call_operand.vmem [shape: f32[128,32], index: 17, kind: output, shape index: {}]  }
   0x1   :  { %6598 = sst [smem:[#allocation43_spill]] %s6530_s0  ;;  %s4649_s26 = smov 0  }
   0x2   :  { %6599 = sst [smem:[#allocation44_spill]] %s6531_s1  ;;  %s4651_s27 = smov 0  }
   0x3   :  { %s4653_s28 = smov 0  }
   0x4 LB: > { %s36_s29 = sadd.s32 1, %s4537_s26  ;;  %s39_s0 = sadd.s32 1, %s4541_s27  ;;  %s4545_s28 = sphi %s4653_s28, %s27_s28   ;;  %s4541_s27 = sphi %s4651_s27, %s6815_s27   ;;  %s4537_s26 = sphi %s4649_s26, %s6814_s26   ;;  %s4533_s25 = sphi %s4647_s25, %s6813_s25   ;;  %s4529_s24 = sphi %s4645_s24, %s6812_s24  }
   0x5   : > { %p37_p0 = scmp.ge.s32.totalorder %s36_s29, 2  ;;  %p3586_p1 = scmp.ge.s32.totalorder %s4545_s28, 1 }
   0x6   : > { %p523_p2 = scmp.lt.s32.totalorder %s4545_s28, 5 }
   0x7   : > { %s6817_s29 = smov (%p37_p0, %s36_s29), 0  ;;  %s6819_s0 = smov (!%p37_p0, %s39_s0), %s4541_s27 }
   0x8   : > { %p524_p3 = pnand %p3586_p1, %p523_p2  ;;  %p41_p4 = scmp.ge.s32.totalorder %s6819_s0, 2 }
   0xa   : > { %s6821_s0 = smov (%p41_p4, %s6819_s0), 0  ;;  %527 = sbr.rel (%p524_p3) target bundleno = 2170 (0x87a), region = 88 }
  0x11   : > { %s579_s30 = ssub.s32 1, %s4533_s25  ;;  %p586_p5 = scmp.lt.s32.totalorder %s4529_s24, 1  ;;  %v6554_v0 = vlaneseq  ;;  %v4547_v18 = vmov 0.0  }
  0x12   : > { %s580_s18 = smul.u32 %s4529_s24, %s579_s30  ;;  %p677_p6 = scmp.eq.s32.totalorder %s4533_s25, 0 }
  0x13   : > { %s587_s19 = scalar_select %p586_p5, %s4529_s24, 1  ;;  %v4685_v1 = vshrl.u32 %v6554_v0, 7 }
  0x14   : > { %p581_p7 = scmp.lt.s32.totalorder %s580_s18, 1  ;;  %s589_s1 = smul.u32 %s4529_s24, %s4533_s25 }
  0x15   : > { %6600 = vst [vmem:[#allocation6_spill] sm:$0xff] %v4685_v1  ;;  %s6601_s22 = sld [smem:[#allocation44_spill]]  ;;  %v4693_v2 = vadd.s32 8, %v4685_v1  ;;  %v4696_v3 = vadd.s32 16, %v4685_v1  ;;  %v4699_v4 = vadd.s32 24, %v4685_v1  ;;  %v4702_v5 = vadd.s32 32, %v4685_v1 }
  0x16   : > { %p678_p8 = scmp.eq.s32.totalorder %s4529_s24, 0  ;;  %s6823_s18 = smov (!%p581_p7, %s580_s18), 1  ;;  %v4710_v7 = vadd.s32 40, %v4685_v1  ;;  %v4713_v8 = vadd.s32 48, %v4685_v1  ;;  %v4716_v9 = vadd.s32 56, %v4685_v1  ;;  %v4719_v10 = vadd.s32 64, %v4685_v1 }
  0x17   : > { %6602 = vst [vmem:[#allocation7_spill] sm:$0xff] %v4693_v2  ;;  %6603 = vst [vmem:[#allocation8_spill] sm:$0xff] %v4696_v3  ;;  %s3587_s30 = sshll.u32 %s589_s1, 4  ;;  %v4722_v11 = vadd.s32 72, %v4685_v1  ;;  %v4725_v12 = vadd.s32 80, %v4685_v1  ;;  %v4728_v13 = vadd.s32 88, %v4685_v1 }
  0x18   : > { %6604 = vst [vmem:[#allocation9_spill] sm:$0xff] %v4699_v4  ;;  %6605 = vst [vmem:[#allocation10_spill] sm:$0xff] %v4702_v5  ;;  %p4732_p9 = pnand %p678_p8, %p677_p6  ;;  %s6615_s1 = sld [smem:[#allocation43_spill]]  ;;  %v4741_v14 = vadd.s32 96, %v4685_v1  ;;  %v4744_v15 = vadd.s32 104, %v4685_v1  ;;  %v4747_v16 = vadd.s32 112, %v4685_v1 }
  0x19   : > { %6607 = vst [vmem:[#allocation12_spill] sm:$0xff] %v4710_v7  ;;  %6608 = vst [vmem:[#allocation13_spill] sm:$0xff] %v4713_v8  ;;  %p591_p10 = scmp.lt.s32.totalorder %s3587_s30, 31  ;;  %v4750_v17 = vadd.s32 120, %v4685_v1  ;;  %v4548_v43 = vmov (!%p4732_p9), 0.0  }
  0x1a   : > { %6609 = vst [vmem:[#allocation14_spill] sm:$0xff] %v4716_v9  ;;  %6610 = vst [vmem:[#allocation15_spill] sm:$0xff] %v4719_v10 }
  0x1b   : > { %s588_s23 = scalar_lea.vmem %s6601_s22, %s587_s19  ;;  %6611 = vst [vmem:[#allocation16_spill] sm:$0xff] %v4722_v11  ;;  %6612 = vst [vmem:[#allocation17_spill] sm:$0xff] %v4725_v12  ;;  %s6825_s30 = smov (!%p591_p10, %s3587_s30), 31 }
  0x1c   : > { %v4707_v6 = vld [vmem:[%s588_s23] ss:$0 sm:$0xff]  ;;  %6613 = vst [vmem:[#allocation18_spill] sm:$0xff] %v4728_v13  ;;  %6616 = vst [vmem:[#allocation19_spill] sm:$0xff] %v4741_v14  ;;  %s3588_s23 = sshll.u32 %s6825_s30, 2 }
  0x1d   : > { %6606 = vst [vmem:[#allocation11_spill] sm:$0xff] %v4707_v6  ;;  %6617 = vst [vmem:[#allocation20_spill] sm:$0xff] %v4744_v15  ;;  %vm621_vm0 = vcmp.eq.s32.totalorder %v4685_v1, %v4707_v6  ;;  %vm622_vm1 = vcmp.eq.s32.totalorder %v4693_v2, %v4707_v6  ;;  %vm623_vm2 = vcmp.eq.s32.totalorder %v4696_v3, %v4707_v6 }
  0x1e   : > { %s583_s22 = scalar_lea.vmem %s6615_s1, %s6823_s18  ;;  %6618 = vst [vmem:[#allocation21_spill] sm:$0xff] %v4747_v16  ;;  %6619 = vst [vmem:[#allocation22_spill] sm:$0xff] %v4750_v17  ;;  %vm624_vm3 = vcmp.eq.s32.totalorder %v4699_v4, %v4707_v6  ;;  %vm625_vm4 = vcmp.eq.s32.totalorder %v4702_v5, %v4707_v6  ;;  %vm626_vm5 = vcmp.eq.s32.totalorder %v4710_v7, %v4707_v6  ;;  %s4787_s1 = scalar_lea.vmem %s6533_s3, %s3588_s23  ;;  %v4792_v19 = vsel %vm621_vm0, 1.0, %v4547_v18 }
  0x1f   : > { %vm627_vm6 = vcmp.eq.s32.totalorder %v4713_v8, %v4707_v6  ;;  %vm628_vm7 = vcmp.eq.s32.totalorder %v4716_v9, %v4707_v6  ;;  %vm6556_vm8 = vcmp.eq.s32.totalorder %v4719_v10, %v4707_v6  ;;  %vm6555_vm9 = vcmp.eq.s32.totalorder %v4722_v11, %v4707_v6  ;;  %682 = sbr.rel (%p4732_p9) target bundleno = 62 (0x3e), region = 92 }
  0x20   : > { %vm6553_vm10 = vcmp.eq.s32.totalorder %v4725_v12, %v4707_v6  ;;  %vm6552_vm11 = vcmp.eq.s32.totalorder %v4728_v13, %v4707_v6  ;;  %vm6551_vm12 = vcmp.eq.s32.totalorder %v4741_v14, %v4707_v6  ;;  %vm6550_vm13 = vcmp.eq.s32.totalorder %v4744_v15, %v4707_v6 }
  0x21   : > { %vm6549_vm14 = vcmp.eq.s32.totalorder %v4747_v16, %v4707_v6  ;;  %vm6548_vm15 = vcmp.eq.s32.totalorder %v4750_v17, %v4707_v6  ;;  %v4797_v20 = vsel %vm622_vm1, 1.0, %v4547_v18  ;;  %v4802_v21 = vsel %vm623_vm2, 1.0, %v4547_v18 }
  0x22   : > { %v4807_v22 = vsel %vm624_vm3, 1.0, %v4547_v18  ;;  %v4812_v23 = vsel %vm625_vm4, 1.0, %v4547_v18  ;;  %v4817_v24 = vsel %vm626_vm5, 1.0, %v4547_v18  ;;  %v4822_v25 = vsel %vm627_vm6, 1.0, %v4547_v18 }
  0x23   : > { %v4827_v26 = vsel %vm628_vm7, 1.0, %v4547_v18  ;;  %v4832_v27 = vsel %vm6556_vm8, 1.0, %v4547_v18  ;;  %v4837_v28 = vsel %vm6555_vm9, 1.0, %v4547_v18  ;;  %v4842_v29 = vsel %vm6553_vm10, 1.0, %v4547_v18 }
  0x24   : > { %v4847_v30 = vsel %vm6552_vm11, 1.0, %v4547_v18  ;;  %v4852_v31 = vsel %vm6551_vm12, 1.0, %v4547_v18  ;;  %v4857_v32 = vsel %vm6550_vm13, 1.0, %v4547_v18  ;;  %v4862_v33 = vsel %vm6549_vm14, 1.0, %v4547_v18 }
  0x25   : > { %v4867_v34 = vsel %vm6548_vm15, 1.0, %v4547_v18  ;;  %v669_v35 = vpack.c.bf16 %v4797_v20, %v4792_v19  ;;  %v670_v36 = vpack.c.bf16 %v4807_v22, %v4802_v21  ;;  %vm683_vm15 = vcmask (!%p4732_p9), 130048  }
  0x26   : > { %vm716_vm14 = vcmask 261120   ;;  %684 = vst.msk [vmem:[#allocation2] sm:$0xff] %vm683_vm15, %v4548_v43  ;;  %685 = vst.msk [vmem:[#allocation2 + $0x8] sm:$0xff] %vm683_vm15, %v4548_v43 }
  0x27   : > { %686 = vst.msk [vmem:[#allocation2 + $0x10] sm:$0xff] %vm683_vm15, %v4548_v43  ;;  %687 = vst.msk [vmem:[#allocation2 + $0x18] sm:$0xff] %vm683_vm15, %v4548_v43 }
  0x28   : > { %688 = vst.msk [vmem:[#allocation2 + $0x20] sm:$0xff] %vm683_vm15, %v4548_v43  ;;  %689 = vst.msk [vmem:[#allocation2 + $0x28] sm:$0xff] %vm683_vm15, %v4548_v43 }
  0x29   : > { %690 = vst.msk [vmem:[#allocation2 + $0x30] sm:$0xff] %vm683_vm15, %v4548_v43  ;;  %691 = vst.msk [vmem:[#allocation2 + $0x38] sm:$0xff] %vm683_vm15, %v4548_v43 }
  0x2a   : > { %692 = vst.msk [vmem:[#allocation2 + $0x40] sm:$0xff] %vm683_vm15, %v4548_v43  ;;  %693 = vst.msk [vmem:[#allocation2 + $0x48] sm:$0xff] %vm683_vm15, %v4548_v43 }
  0x2b   : > { %694 = vst.msk [vmem:[#allocation2 + $0x50] sm:$0xff] %vm683_vm15, %v4548_v43  ;;  %695 = vst.msk [vmem:[#allocation2 + $0x58] sm:$0xff] %vm683_vm15, %v4548_v43 }
  0x2c   : > { %696 = vst.msk [vmem:[#allocation2 + $0x60] sm:$0xff] %vm683_vm15, %v4548_v43  ;;  %697 = vst.msk [vmem:[#allocation2 + $0x68] sm:$0xff] %vm683_vm15, %v4548_v43 }
  0x2d   : > { %698 = vst.msk [vmem:[#allocation2 + $0x70] sm:$0xff] %vm683_vm15, %v4548_v43  ;;  %699 = vst.msk [vmem:[#allocation2 + $0x78] sm:$0xff] %vm683_vm15, %v4548_v43 }
  0x2e   : > { %700 = vst.msk [vmem:[#allocation3] sm:$0xff] %vm683_vm15, %v4548_v43  ;;  %701 = vst.msk [vmem:[#allocation3 + $0x8] sm:$0xff] %vm683_vm15, %v4548_v43 }
  0x2f   : > { %702 = vst.msk [vmem:[#allocation3 + $0x10] sm:$0xff] %vm683_vm15, %v4548_v43  ;;  %703 = vst.msk [vmem:[#allocation3 + $0x18] sm:$0xff] %vm683_vm15, %v4548_v43 }
  0x30   : > { %704 = vst.msk [vmem:[#allocation3 + $0x20] sm:$0xff] %vm683_vm15, %v4548_v43  ;;  %705 = vst.msk [vmem:[#allocation3 + $0x28] sm:$0xff] %vm683_vm15, %v4548_v43 }
  0x31   : > { %706 = vst.msk [vmem:[#allocation3 + $0x30] sm:$0xff] %vm683_vm15, %v4548_v43  ;;  %707 = vst.msk [vmem:[#allocation3 + $0x38] sm:$0xff] %vm683_vm15, %v4548_v43 }
  0x32   : > { %708 = vst.msk [vmem:[#allocation3 + $0x40] sm:$0xff] %vm683_vm15, %v4548_v43  ;;  %709 = vst.msk [vmem:[#allocation3 + $0x48] sm:$0xff] %vm683_vm15, %v4548_v43 }
  0x33   : > { %710 = vst.msk [vmem:[#allocation3 + $0x50] sm:$0xff] %vm683_vm15, %v4548_v43  ;;  %711 = vst.msk [vmem:[#allocation3 + $0x58] sm:$0xff] %vm683_vm15, %v4548_v43 }
  0x34   : > { %712 = vst.msk [vmem:[#allocation3 + $0x60] sm:$0xff] %vm683_vm15, %v4548_v43  ;;  %713 = vst.msk [vmem:[#allocation3 + $0x68] sm:$0xff] %vm683_vm15, %v4548_v43 }
  0x35   : > { %714 = vst.msk [vmem:[#allocation3 + $0x70] sm:$0xff] %vm683_vm15, %v4548_v43  ;;  %715 = vst.msk [vmem:[#allocation3 + $0x78] sm:$0xff] %vm683_vm15, %v4548_v43 }
  0x36   : > { %717 = vst.msk [vmem:[#allocation5] sm:$0xff] %vm716_vm14, %v4548_v43  ;;  %718 = vst.msk [vmem:[#allocation5 + $0x8] sm:$0xff] %vm716_vm14, %v4548_v43 }
  0x37   : > { %719 = vst.msk [vmem:[#allocation5 + $0x10] sm:$0xff] %vm716_vm14, %v4548_v43  ;;  %720 = vst.msk [vmem:[#allocation5 + $0x18] sm:$0xff] %vm716_vm14, %v4548_v43 }
  0x38   : > { %721 = vst.msk [vmem:[#allocation5 + $0x20] sm:$0xff] %vm716_vm14, %v4548_v43  ;;  %722 = vst.msk [vmem:[#allocation5 + $0x28] sm:$0xff] %vm716_vm14, %v4548_v43 }
  0x39   : > { %723 = vst.msk [vmem:[#allocation5 + $0x30] sm:$0xff] %vm716_vm14, %v4548_v43  ;;  %724 = vst.msk [vmem:[#allocation5 + $0x38] sm:$0xff] %vm716_vm14, %v4548_v43 }
  0x3a   : > { %725 = vst.msk [vmem:[#allocation5 + $0x40] sm:$0xff] %vm716_vm14, %v4548_v43  ;;  %726 = vst.msk [vmem:[#allocation5 + $0x48] sm:$0xff] %vm716_vm14, %v4548_v43 }
  0x3b   : > { %727 = vst.msk [vmem:[#allocation5 + $0x50] sm:$0xff] %vm716_vm14, %v4548_v43  ;;  %728 = vst.msk [vmem:[#allocation5 + $0x58] sm:$0xff] %vm716_vm14, %v4548_v43 }
  0x3c   : > { %729 = vst.msk [vmem:[#allocation5 + $0x60] sm:$0xff] %vm716_vm14, %v4548_v43  ;;  %730 = vst.msk [vmem:[#allocation5 + $0x68] sm:$0xff] %vm716_vm14, %v4548_v43 }
  0x3d   : > { %731 = vst.msk [vmem:[#allocation5 + $0x70] sm:$0xff] %vm716_vm14, %v4548_v43  ;;  %732 = vst.msk [vmem:[#allocation5 + $0x78] sm:$0xff] %vm716_vm14, %v4548_v43 }
  0x3e PF: > { %p3606_p11 = scmp.ne.s32.totalorder %s4533_s25, 0 }
  0x3f   : > { %v4941_v44 = vld [vmem:[%s583_s22] ss:$0 sm:$0xff] (!%p3606_p11)  ;;  %v4549_v46 = vmov (!%p3606_p11), 0.0   ;;  %v4960_v51 = vld [vmem:[%s6532_s2 + $0x8] sm:$0xff] (!%p3606_p11)   ;;  %v4971_v53 = vld [vmem:[%s6532_s2 + $0x10] sm:$0xff] (!%p3606_p11)   ;;  %p3664_p12 = scmp.ne.s32.totalorder (!%p3606_p11), %s4529_s24, 1 }
  0x40   : > { %735 = sbr.rel (%p3606_p11) target bundleno = 937 (0x3a9), region = 96  ;;  %v4946_v45 = vld [vmem:[%s6532_s2] sm:$0xff] (!%p3606_p11)   ;;  %vm741_vm15 = vcmp.eq.s32.totalorder (!%p3606_p11), %v4685_v1, %v4941_v44  ;;  %vm742_vm14 = vcmp.eq.s32.totalorder (!%p3606_p11), %v4693_v2, %v4941_v44  ;;  %vm743_vm13 = vcmp.eq.s32.totalorder (!%p3606_p11), %v4696_v3, %v4941_v44  ;;  %vm744_vm12 = vcmp.eq.s32.totalorder (!%p3606_p11), %v4699_v4, %v4941_v44  ;;  %v4982_v57 = vld [vmem:[%s6532_s2 + $0x18] sm:$0xff] (!%p3606_p11)   ;;  %v5004_v43 = vld [vmem:[%s6532_s2 + $0x28] sm:$0xff] (!%p3606_p11)  }
  0x41   : > { %v3608_v47 = vsel (!%p3606_p11), %vm741_vm15, 1.0, %v4549_v46  ;;  %v3609_v48 = vsel (!%p3606_p11), %vm742_vm14, 1.0, %v4549_v46  ;;  %v3610_v49 = vsel (!%p3606_p11), %vm743_vm13, 1.0, %v4549_v46  ;;  %v3611_v50 = vsel (!%p3606_p11), %vm744_vm12, 1.0, %v4549_v46  ;;  %3928 = vmatprep.subr.bf16.mxu0 (!%p3606_p11), %v4946_v45  ;;  %v4993_v61 = vld [vmem:[%s6532_s2 + $0x20] sm:$0xff] (!%p3606_p11)  }
  0x42   : > { %v789_v52 = vpack.c.bf16 (!%p3606_p11), %v3609_v48, %v3608_v47  ;;  %vm745_vm11 = vcmp.eq.s32.totalorder (!%p3606_p11), %v4702_v5, %v4941_v44  ;;  %vm746_vm10 = vcmp.eq.s32.totalorder (!%p3606_p11), %v4710_v7, %v4941_v44  ;;  %3929 = vmatpush3.bf16.msra.mxu0 (!%p3606_p11), %v4946_v45  ;;  %v790_v54 = vpack.c.bf16 (!%p3606_p11), %v3611_v50, %v3610_v49  ;;  %v5015_v50 = vld [vmem:[%s6532_s2 + $0x30] sm:$0xff] (!%p3606_p11)  }
  0x43   : > { %3930 = vmatprep.subr.bf16.mxu0 (!%p3606_p11), %v4960_v51  ;;  %v3612_v55 = vsel (!%p3606_p11), %vm745_vm11, 1.0, %v4549_v46  ;;  %v3613_v56 = vsel (!%p3606_p11), %vm746_vm10, 1.0, %v4549_v46  ;;  %vm747_vm12 = vcmp.eq.s32.totalorder (!%p3606_p11), %v4713_v8, %v4941_v44  ;;  %vm748_vm13 = vcmp.eq.s32.totalorder (!%p3606_p11), %v4716_v9, %v4941_v44 }
  0x44   : > { %813 = vxpose.xlu0.c.b16.start [1/8] (!%p3606_p11), %v789_v52, 128  ;;  %v791_v58 = vpack.c.bf16 (!%p3606_p11), %v3613_v56, %v3612_v55  ;;  %v3614_v59 = vsel (!%p3606_p11), %vm747_vm12, 1.0, %v4549_v46  ;;  %v3615_v60 = vsel (!%p3606_p11), %vm748_vm13, 1.0, %v4549_v46  ;;  %vm749_vm10 = vcmp.eq.s32.totalorder (!%p3606_p11), %v4719_v10, %v4941_v44  ;;  %v5026_v56 = vld [vmem:[%s6532_s2 + $0x38] sm:$0xff] (!%p3606_p11)  }
  0x45   : > { %vm750_vm11 = vcmp.eq.s32.totalorder (!%p3606_p11), %v4722_v11, %v4941_v44  ;;  %v792_v62 = vpack.c.bf16 (!%p3606_p11), %v3615_v60, %v3614_v59  ;;  %v3616_v63 = vsel (!%p3606_p11), %vm749_vm10, 1.0, %v4549_v46  ;;  %vm751_vm15 = vcmp.eq.s32.totalorder (!%p3606_p11), %v4725_v12, %v4941_v44 }
  0x46   : > { %3931 = vmatpush3.bf16.msra.mxu0 (!%p3606_p11), %v4960_v51  ;;  %v3617_v18 = vsel (!%p3606_p11), %vm750_vm11, 1.0, %v4549_v46  ;;  %vm752_vm14 = vcmp.eq.s32.totalorder (!%p3606_p11), %v4728_v13, %v4941_v44  ;;  %v3618_v48 = vsel (!%p3606_p11), %vm751_vm15, 1.0, %v4549_v46  ;;  %vm753_vm12 = vcmp.eq.s32.totalorder (!%p3606_p11), %v4741_v14, %v4941_v44  ;;  %vm3632_vm15 = vmpackc.low (!%p3606_p11), %vm622_vm1, %vm621_vm0 }
  0x47   : > { %3932 = vmatprep.subr.bf16.mxu0 %v4971_v53  ;;  %v793_v47 = vpack.c.bf16 %v3617_v18, %v3616_v63  ;;  %v3619_v49 = vsel %vm752_vm14, 1.0, %v4549_v46  ;;  %vm754_vm13 = vcmp.eq.s32.totalorder %v4744_v15, %v4941_v44  ;;  %vm755_vm10 = vcmp.eq.s32.totalorder %v4747_v16, %v4941_v44  ;;  %vm5061_vm14 = vmpackc.low %vm624_vm3, %vm623_vm2 }
  0x48   : > { %814 = vxpose.xlu0.c.b16.cont [2/8] %v790_v54, 128  ;;  %v794_v52 = vpack.c.bf16 %v3619_v49, %v3618_v48  ;;  %v3620_v54 = vsel %vm753_vm12, 1.0, %v4549_v46  ;;  %v3621_v55 = vsel %vm754_vm13, 1.0, %v4549_v46  ;;  %vm756_vm11 = vcmp.eq.s32.totalorder %v4750_v17, %v4941_v44  ;;  %vm5071_vm12 = vmpackc.low %vm626_vm5, %vm625_vm4 }
  0x49   : > { %v3622_v59 = vsel %vm755_vm10, 1.0, %v4549_v46  ;;  %v3623_v60 = vsel %vm756_vm11, 1.0, %v4549_v46  ;;  %vm5087_vm13 = vmpackc.low %vm628_vm7, %vm627_vm6  ;;  %vm6629_vm11 = vcmp.eq.s32.totalorder %v4725_v12, %v4707_v6 }
  0x4a   : > { %3933 = vmatpush3.bf16.msra.mxu0 %v4971_v53  ;;  %vm5111_vm10 = vmpackc.low %vm6555_vm9, %vm6556_vm8 }
  0x4b   : > { %3934 = vmatprep.subr.bf16.mxu0 %v4982_v57 }
  0x4c   : > { %815 = vxpose.xlu0.c.b16.cont [3/8] %v791_v58, 128  ;;  %v795_v58 = vpack.c.bf16 %v3621_v55, %v3620_v54  ;;  %v4550_v54 = vmov 1065369472   ;;  %v4551_v55 = vmov 1.0|1.0  }
  0x4d   : > { %3976 = vmatprep.mubr.msk.bf16.mxu1 %vm3632_vm15, %v4551_v55 }
  0x4e   : > { %3935 = vmatpush3.bf16.msra.mxu0 %v4982_v57 }
  0x4f   : > { %3936 = vmatprep.subr.bf16.mxu0 %v4993_v61 }
  0x50   : > { %816 = vxpose.xlu0.c.b16.cont [4/8] %v792_v62, 128  ;;  %v796_v62 = vpack.c.bf16 %v3623_v60, %v3622_v59 }
  0x52   : > { %3937 = vmatpush3.bf16.msra.mxu0 %v4993_v61 }
  0x53   : > { %3938 = vmatprep.subr.bf16.mxu0 %v5004_v43 }
  0x54   : > { %817 = vxpose.xlu0.c.b16.cont [5/8] %v793_v47, 128 }
  0x56   : > { %3939 = vmatpush3.bf16.msra.mxu0 %v5004_v43 }
  0x57   : > { %3940 = vmatprep.subr.bf16.mxu0 %v5015_v50 }
  0x58   : > { %818 = vxpose.xlu0.c.b16.cont [6/8] %v794_v52, 128 }
  0x5a   : > { %3941 = vmatpush3.bf16.msra.mxu0 %v5015_v50 }
  0x5b   : > { %3942 = vmatprep.subr.bf16.mxu0 %v5026_v56 }
  0x5c   : > { %819 = vxpose.xlu0.c.b16.cont [7/8] %v795_v58, 128 }
  0x5e   : > { %3943 = vmatpush3.bf16.msra.mxu0 %v5026_v56 }
  0x5f   : > { %3992 = vmatprep.subr.bf16.mxu0 %v4550_v54 }
  0x60   : > { %820 = vxpose.xlu0.c.b16.end [8/8] %v796_v62, 128 }
  0xaa   : > { %v821_v44 = vpop.trf.xlu0 }
  0xab   : > { %3944 = vmatprep.mubr.bf16.mxu0 %v821_v44 }
  0xae   : > { %v822_v63 = vpop.trf.xlu0 }
  0xaf   : > { %3945 = vmatmul.mubr.bf16.vlgmr.msra.gmra.mrb[0].mxu0 %v822_v63 }
  0xb0   : > { %3993 = vmatpush3.bf16.msra.mxu0 %v4550_v54 }
  0xb1   : > { %3994 = vmatprep.subr.bf16.mxu0 %v4550_v54 }
  0xb2   : > { %v823_v18 = vpop.trf.xlu0 }
  0xb3   : > { %3948 = vmatprep.mubr.bf16.mxu0 %v823_v18 }
  0xb4   : > { %3995 = vmatpush3.bf16.msra.mxu0 %v4550_v54 }
  0xb5   : > { %3996 = vmatprep.subr.bf16.mxu0 %v4550_v54 }
  0xb6   : > { %v824_v47 = vpop.trf.xlu0 }
  0xb7   : > { %3949 = vmatmul.mubr.bf16.gmra.mrb[4].mxu0 %v824_v47 }
  0xb8   : > { %3997 = vmatpush3.bf16.msra.mxu0 %v4550_v54 }
  0xb9   : > { %3998 = vmatprep.subr.bf16.mxu0 %v4550_v54 }
  0xba   : > { %v825_v48 = vpop.trf.xlu0 }
  0xbb   : > { %3952 = vmatprep.mubr.bf16.mxu0 %v825_v48 }
  0xbc   : > { %3999 = vmatpush3.bf16.msra.mxu0 %v4550_v54 }
  0xbd   : > { %4000 = vmatprep.subr.bf16.mxu0 %v4550_v54 }
  0xbe   : > { %v826_v46 = vpop.trf.xlu0 }
  0xbf   : > { %3953 = vmatmul.mubr.bf16.gmra.mrb[8].mxu0 %v826_v46 }
  0xc0   : > { %4001 = vmatpush3.bf16.msra.mxu0 %v4550_v54 }
  0xc1   : > { %4002 = vmatprep.subr.bf16.mxu0 %v4550_v54 }
  0xc2   : > { %v827_v49 = vpop.trf.xlu0 }
  0xc3   : > { %3956 = vmatprep.mubr.bf16.mxu0 %v827_v49 }
  0xc4   : > { %4003 = vmatpush3.bf16.msra.mxu0 %v4550_v54 }
  0xc5   : > { %4004 = vmatprep.subr.bf16.mxu0 %v4550_v54 }
  0xc6   : > { %v828_v52 = vpop.trf.xlu0 }
  0xc7   : > { %3957 = vmatmul.mubr.bf16.gmra.mrb[12].mxu0 %v828_v52 }
  0xc8   : > { %4008 = vmatprep.mubr.msk.bf16.mxu0 %vm3632_vm15, %v4551_v55  ;;  %4005 = vmatpush3.bf16.msra.mxu0 %v4550_v54  ;;  %vm6630_vm15 = vcmp.eq.s32.totalorder %v4728_v13, %v4707_v6 }
  0xc9   : > { %4006 = vmatprep.subr.bf16.mxu0 %v4550_v54 }
  0xcc   : > { %4007 = vmatpush3.bf16.msra.mxu0 %v4550_v54 }
  0xcf   : > { %4009 = vmatmul.mubr.msk.bf16.vlgmr.msra.gmra.mrb[16].mxu0 %vm5061_vm14, %v4551_v55 }
  0xd0   : > { %4012 = vmatprep.mubr.msk.bf16.mxu0 %vm5071_vm12, %v4551_v55 }
  0xd7   : > { %4013 = vmatmul.mubr.msk.bf16.gmra.mrb[20].mxu0 %vm5087_vm13, %v4551_v55 }
 0x182   : > { %v3946_v62 = vpop.f32.mrb[0].mxu0 }
 0x183   : > { %v911_v44 = vpop.f32.mrb[1].mxu0 }
 0x184   : > { %v3947_v63 = vpop.f32.mrb[2].mxu0 }
 0x185   : > { %v991_v18 = vpack.c.bf16 %v3947_v63, %v3946_v62  ;;  %v914_v47 = vpop.f32.mrb[3].mxu0 }
 0x186   : > { %v990_v48 = vpack.c.bf16 %v914_v47, %v911_v44 }
 0x188   : > { %3960 = vmatprep.subr.bf16.mxu1 %v990_v48 }
 0x189   : > { %3961 = vmatpush3.bf16.msra.mxu1 %v990_v48 }
 0x18a   : > { %v3950_v46 = vpop.f32.mrb[4].mxu0  ;;  %3962 = vmatprep.subr.bf16.mxu1 %v991_v18 }
 0x18b   : > { %v927_v49 = vpop.f32.mrb[5].mxu0 }
 0x18c   : > { %v3951_v52 = vpop.f32.mrb[6].mxu0 }
 0x18d   : > { %v993_v0 = vpack.c.bf16 %v3951_v52, %v3950_v46  ;;  %v930_v42 = vpop.f32.mrb[7].mxu0  ;;  %3963 = vmatpush3.bf16.msra.mxu1 %v991_v18 }
 0x18e   : > { %v992_v41 = vpack.c.bf16 %v930_v42, %v927_v49  ;;  %v1129_v49 = vld [vmem:[#allocation3 + $0x8] sm:$0xff] }
 0x190   : > { %3964 = vmatprep.subr.bf16.mxu1 %v992_v41 }
 0x191   : > { %3965 = vmatpush3.bf16.msra.mxu1 %v992_v41  ;;  %v1131_v41 = vld [vmem:[#allocation3 + $0x18] sm:$0xff] }
 0x192   : > { %v3954_v40 = vpop.f32.mrb[8].mxu0  ;;  %3966 = vmatprep.subr.bf16.mxu1 %v993_v0 }
 0x193   : > { %v943_v39 = vpop.f32.mrb[9].mxu0 }
 0x194   : > { %v3955_v38 = vpop.f32.mrb[10].mxu0 }
 0x195   : > { %v995_v37 = vpack.c.bf16 %v3955_v38, %v3954_v40  ;;  %v946_v62 = vpop.f32.mrb[11].mxu0  ;;  %3967 = vmatpush3.bf16.msra.mxu1 %v993_v0  ;;  %v1130_v38 = vld [vmem:[#allocation3 + $0x10] sm:$0xff] }
 0x196   : > { %v994_v44 = vpack.c.bf16 %v946_v62, %v943_v39  ;;  %v1128_v39 = vld [vmem:[#allocation3] sm:$0xff] }
 0x198   : > { %3968 = vmatprep.subr.bf16.mxu1 %v994_v44 }
 0x199   : > { %3969 = vmatpush3.bf16.msra.mxu1 %v994_v44  ;;  %v1134_v44 = vld [vmem:[#allocation3 + $0x30] sm:$0xff] }
 0x19a   : > { %v3958_v63 = vpop.f32.mrb[12].mxu0  ;;  %3970 = vmatprep.subr.bf16.mxu1 %v995_v37 }
 0x19b   : > { %v959_v47 = vpop.f32.mrb[13].mxu0 }
 0x19c   : > { %v3959_v48 = vpop.f32.mrb[14].mxu0 }
 0x19d   : > { %v997_v46 = vpack.c.bf16 %v3959_v48, %v3958_v63  ;;  %v962_v52 = vpop.f32.mrb[15].mxu0  ;;  %3971 = vmatpush3.bf16.msra.mxu1 %v995_v37  ;;  %v1132_v63 = vld [vmem:[#allocation3 + $0x20] sm:$0xff]  ;;  %v1135_v48 = vld [vmem:[#allocation3 + $0x38] sm:$0xff] }
 0x19e   : > { %v996_v42 = vpack.c.bf16 %v962_v52, %v959_v47 }
 0x1a0   : > { %3972 = vmatprep.subr.bf16.mxu1 %v996_v42 }
 0x1a1   : > { %3973 = vmatpush3.bf16.msra.mxu1 %v996_v42 }
 0x1a2   : > { %3974 = vmatprep.subr.bf16.mxu1 %v997_v46  ;;  %v4010_v37 = vpop.f32.mrb[16].mxu0 }
 0x1a3   : > { %v1178_v40 = vpop.f32.mrb[17].mxu0  ;;  %v1243_v58 = vadd.f32 %v4010_v37, %v1130_v38  ;;  %v1133_v37 = vld [vmem:[#allocation3 + $0x28] sm:$0xff] }
 0x1a4   : > { %v1241_v59 = vadd.f32 %v1178_v40, %v1128_v39  ;;  %v4011_v60 = vpop.f32.mrb[18].mxu0  ;;  %v976_v40 = vld [vmem:[#allocation2 + $0x10] sm:$0xff] }
 0x1a5   : > { %3975 = vmatpush3.bf16.msra.mxu1 %v997_v46  ;;  %v1244_v18 = vadd.f32 %v4011_v60, %v1131_v41  ;;  %v1181_v62 = vpop.f32.mrb[19].mxu0  ;;  %v974_v41 = vld [vmem:[#allocation2] sm:$0xff] }
 0x1a6   : > { %4206 = vmatprep.subr.bf16.mxu1 %v4550_v54 }
 0x1a8   : > { %3977 = vmatmul.mubr.msk.bf16.vlgmr.msra.gmra.mrb[0].mxu1 %vm5061_vm14, %v4551_v55  ;;  %vm3642_vm14 = vmpackc.low %vm6630_vm15, %vm6629_vm11  ;;  %vm6633_vm11 = vcmp.eq.s32.totalorder %v4747_v16, %v4707_v6  ;;  %vm6634_vm15 = vcmp.eq.s32.totalorder %v4750_v17, %v4707_v6 }
 0x1a9   : > { %4214 = vmatpush3.bf16.msra.mxu1 %v4550_v54  ;;  %3980 = vmatprep.mubr.msk.bf16.mxu1 %vm5071_vm12, %v4551_v55  ;;  %vm6631_vm12 = vcmp.eq.s32.totalorder %v4741_v14, %v4707_v6  ;;  %vm3646_vm8 = vmpackc.low %vm6634_vm15, %vm6633_vm11 }
 0x1aa   : > { %4207 = vmatprep.subr.bf16.mxu1 %v4550_v54 }
 0x1ad   : > { %4215 = vmatpush3.bf16.msra.mxu1 %v4550_v54 }
 0x1ae   : > { %4208 = vmatprep.subr.bf16.mxu1 %v4550_v54 }
 0x1b0   : > { %3981 = vmatmul.mubr.msk.bf16.gmra.mrb[4].mxu1 %vm5087_vm13, %v4551_v55  ;;  %vm6632_vm13 = vcmp.eq.s32.totalorder %v4744_v15, %v4707_v6 }
 0x1b1   : > { %4216 = vmatpush3.bf16.msra.mxu1 %v4550_v54  ;;  %3984 = vmatprep.mubr.msk.bf16.mxu1 %vm5111_vm10, %v4551_v55  ;;  %vm3644_vm9 = vmpackc.low %vm6632_vm13, %vm6631_vm12  ;;  %vm1111_vm12 = vcmask 130048  }
 0x1b2   : > { %4209 = vmatprep.subr.bf16.mxu1 %v4550_v54  ;;  %1259 = vst.msk [vmem:[#allocation3 + $0x10] sm:$0xff] %vm1111_vm12, %v1243_v58  ;;  %1257 = vst.msk [vmem:[#allocation3] sm:$0xff] %vm1111_vm12, %v1241_v59  ;;  %v977_v59 = vld [vmem:[#allocation2 + $0x18] sm:$0xff]  ;;  %4044 = vmatprep.mubr.msk.bf16.mxu0 (!%p3664_p12), %vm1111_vm12, %v4946_v45 }
 0x1b3   : > { %1260 = vst.msk [vmem:[#allocation3 + $0x18] sm:$0xff] %vm1111_vm12, %v1244_v18 }
 0x1b5   : > { %4217 = vmatpush3.bf16.msra.mxu1 %v4550_v54 }
 0x1b6   : > { %4210 = vmatprep.subr.bf16.mxu1 %v4550_v54 }
 0x1b8   : > { %3985 = vmatmul.mubr.msk.bf16.gmra.mrb[8].mxu1 %vm3642_vm14, %v4551_v55 }
 0x1b9   : > { %4218 = vmatpush3.bf16.msra.mxu1 %v4550_v54  ;;  %3988 = vmatprep.mubr.msk.bf16.mxu1 %vm3644_vm9, %v4551_v55 }
 0x1ba   : > { %4211 = vmatprep.subr.bf16.mxu1 %v4550_v54 }
 0x1bd   : > { %4219 = vmatpush3.bf16.msra.mxu1 %v4550_v54 }
 0x1be   : > { %4212 = vmatprep.subr.bf16.mxu1 %v4550_v54 }
 0x1c0   : > { %3989 = vmatmul.mubr.msk.bf16.gmra.mrb[12].mxu1 %vm3646_vm8, %v4551_v55 }
 0x1c1   : > { %4220 = vmatpush3.bf16.msra.mxu1 %v4550_v54  ;;  %4016 = vmatprep.mubr.msk.bf16.mxu1 %vm5111_vm10, %v4551_v55 }
 0x1c2   : > { %4213 = vmatprep.subr.bf16.mxu1 %v4550_v54 }
 0x1c5   : > { %4221 = vmatpush3.bf16.msra.mxu1 %v4550_v54  ;;  %v1242_v54 = vadd.f32 %v1181_v62, %v1129_v49  ;;  %v975_v49 = vld [vmem:[#allocation2 + $0x8] sm:$0xff] }
 0x1c7   : > { %1258 = vst.msk [vmem:[#allocation3 + $0x8] sm:$0xff] %vm1111_vm12, %v1242_v54 }
 0x1c8   : > { %4017 = vmatmul.mubr.msk.bf16.vlgmr.msra.gmra.mrb[16].mxu1 %vm3642_vm14, %v4551_v55 }
 0x1c9   : > { %4020 = vmatprep.mubr.msk.bf16.mxu1 %vm3644_vm9, %v4551_v55 }
 0x1d0   : > { %4021 = vmatmul.mubr.msk.bf16.gmra.mrb[20].mxu1 %vm3646_vm8, %v4551_v55  ;;  %v4014_v55 = vpop.f32.mrb[20].mxu0  ;;  %vm1646_vm8 = vcmask (!%p3664_p12), 261120  }
 0x1d1   : > { %v1194_v47 = vpop.f32.mrb[21].mxu0  ;;  %v1247_v46 = vadd.f32 %v4014_v55, %v1134_v44 }
 0x1d2   : > { %v1245_v52 = vadd.f32 %v1194_v47, %v1132_v63  ;;  %v4015_v42 = vpop.f32.mrb[22].mxu0  ;;  %v980_v47 = vld [vmem:[#allocation2 + $0x30] sm:$0xff] }
 0x1d3   : > { %v1248_v0 = vadd.f32 %v4015_v42, %v1135_v48  ;;  %v1197_v38 = vpop.f32.mrb[23].mxu0  ;;  %1263 = vst.msk [vmem:[#allocation3 + $0x30] sm:$0xff] %vm1111_vm12, %v1247_v46  ;;  %v978_v48 = vld [vmem:[#allocation2 + $0x20] sm:$0xff] }
 0x1d4   : > { %1261 = vst.msk [vmem:[#allocation3 + $0x20] sm:$0xff] %vm1111_vm12, %v1245_v52  ;;  %v1246_v39 = vadd.f32 %v1197_v38, %v1133_v37  ;;  %v981_v52 = vld [vmem:[#allocation2 + $0x38] sm:$0xff]  ;;  %v979_v37 = vld [vmem:[#allocation2 + $0x28] sm:$0xff] }
 0x1d5   : > { %1264 = vst.msk [vmem:[#allocation3 + $0x38] sm:$0xff] %vm1111_vm12, %v1248_v0 }
 0x1d6   : > { %1262 = vst.msk [vmem:[#allocation3 + $0x28] sm:$0xff] %vm1111_vm12, %v1246_v39 }
 0x27b   : > { %v3978_v58 = vpop.f32.mrb[0].mxu1 }
 0x27c   : > { %v1097_v60 = vadd.f32 %v3978_v58, %v976_v40  ;;  %v1032_v18 = vpop.f32.mrb[1].mxu1 }
 0x27d   : > { %v1095_v62 = vadd.f32 %v1032_v18, %v974_v41  ;;  %v3979_v54 = vpop.f32.mrb[2].mxu1 }
 0x27e   : > { %1114 = vst.msk [vmem:[#allocation2 + $0x10] sm:$0xff] %vm1111_vm12, %v1097_v60  ;;  %v1098_v55 = vadd.f32 %v3979_v54, %v977_v59  ;;  %v1035_v44 = vpop.f32.mrb[3].mxu1  ;;  %v984_v59 = vld [vmem:[#allocation2 + $0x50] sm:$0xff]  ;;  %v982_v60 = vld [vmem:[#allocation2 + $0x40] sm:$0xff] }
 0x27f   : > { %1112 = vst.msk [vmem:[#allocation2] sm:$0xff] %vm1111_vm12, %v1095_v62  ;;  %v1096_v63 = vadd.f32 %v1035_v44, %v975_v49  ;;  %v985_v49 = vld [vmem:[#allocation2 + $0x58] sm:$0xff] }
 0x280   : > { %1115 = vst.msk [vmem:[#allocation2 + $0x18] sm:$0xff] %vm1111_vm12, %v1098_v55  ;;  %v983_v55 = vld [vmem:[#allocation2 + $0x48] sm:$0xff] }
 0x281   : > { %1113 = vst.msk [vmem:[#allocation2 + $0x8] sm:$0xff] %vm1111_vm12, %v1096_v63 }
 0x283   : > { %v3982_v46 = vpop.f32.mrb[4].mxu1 }
 0x284   : > { %v1101_v42 = vadd.f32 %v3982_v46, %v980_v47  ;;  %v1048_v0 = vpop.f32.mrb[5].mxu1 }
 0x285   : > { %v1099_v38 = vadd.f32 %v1048_v0, %v978_v48  ;;  %v3983_v39 = vpop.f32.mrb[6].mxu1 }
 0x286   : > { %1118 = vst.msk [vmem:[#allocation2 + $0x30] sm:$0xff] %vm1111_vm12, %v1101_v42  ;;  %v1102_v40 = vadd.f32 %v3983_v39, %v981_v52  ;;  %v1051_v41 = vpop.f32.mrb[7].mxu1  ;;  %v988_v52 = vld [vmem:[#allocation2 + $0x70] sm:$0xff]  ;;  %v986_v42 = vld [vmem:[#allocation2 + $0x60] sm:$0xff] }
 0x287   : > { %1116 = vst.msk [vmem:[#allocation2 + $0x20] sm:$0xff] %vm1111_vm12, %v1099_v38  ;;  %v1100_v58 = vadd.f32 %v1051_v41, %v979_v37  ;;  %v989_v37 = vld [vmem:[#allocation2 + $0x78] sm:$0xff] }
 0x288   : > { %1119 = vst.msk [vmem:[#allocation2 + $0x38] sm:$0xff] %vm1111_vm12, %v1102_v40  ;;  %v987_v40 = vld [vmem:[#allocation2 + $0x68] sm:$0xff] }
 0x289   : > { %1117 = vst.msk [vmem:[#allocation2 + $0x28] sm:$0xff] %vm1111_vm12, %v1100_v58 }
 0x28b   : > { %v3986_v18 = vpop.f32.mrb[8].mxu1 }
 0x28c   : > { %v1105_v62 = vadd.f32 %v3986_v18, %v984_v59  ;;  %v1064_v54 = vpop.f32.mrb[9].mxu1 }
 0x28d   : > { %v1103_v44 = vadd.f32 %v1064_v54, %v982_v60  ;;  %v3987_v63 = vpop.f32.mrb[10].mxu1 }
 0x28e   : > { %1122 = vst.msk [vmem:[#allocation2 + $0x50] sm:$0xff] %vm1111_vm12, %v1105_v62  ;;  %v1106_v47 = vadd.f32 %v3987_v63, %v985_v49  ;;  %v1067_v48 = vpop.f32.mrb[11].mxu1  ;;  %v1138_v49 = vld [vmem:[#allocation3 + $0x50] sm:$0xff]  ;;  %v1136_v62 = vld [vmem:[#allocation3 + $0x40] sm:$0xff] }
 0x28f   : > { %1120 = vst.msk [vmem:[#allocation2 + $0x40] sm:$0xff] %vm1111_vm12, %v1103_v44  ;;  %v1104_v46 = vadd.f32 %v1067_v48, %v983_v55  ;;  %v1139_v55 = vld [vmem:[#allocation3 + $0x58] sm:$0xff] }
 0x290   : > { %1123 = vst.msk [vmem:[#allocation2 + $0x58] sm:$0xff] %vm1111_vm12, %v1106_v47  ;;  %v1137_v47 = vld [vmem:[#allocation3 + $0x48] sm:$0xff] }
 0x291   : > { %1121 = vst.msk [vmem:[#allocation2 + $0x48] sm:$0xff] %vm1111_vm12, %v1104_v46 }
 0x293   : > { %v3990_v0 = vpop.f32.mrb[12].mxu1 }
 0x294   : > { %v1109_v38 = vadd.f32 %v3990_v0, %v988_v52  ;;  %v1080_v39 = vpop.f32.mrb[13].mxu1 }
 0x295   : > { %v1107_v41 = vadd.f32 %v1080_v39, %v986_v42  ;;  %v3991_v58 = vpop.f32.mrb[14].mxu1 }
 0x296   : > { %1126 = vst.msk [vmem:[#allocation2 + $0x70] sm:$0xff] %vm1111_vm12, %v1109_v38  ;;  %v1110_v59 = vadd.f32 %v3991_v58, %v989_v37  ;;  %v1083_v60 = vpop.f32.mrb[15].mxu1  ;;  %v1142_v37 = vld [vmem:[#allocation3 + $0x70] sm:$0xff]  ;;  %v1140_v38 = vld [vmem:[#allocation3 + $0x60] sm:$0xff] }
 0x297   : > { %1124 = vst.msk [vmem:[#allocation2 + $0x60] sm:$0xff] %vm1111_vm12, %v1107_v41  ;;  %v1108_v18 = vadd.f32 %v1083_v60, %v987_v40  ;;  %v1143_v40 = vld [vmem:[#allocation3 + $0x78] sm:$0xff] }
 0x298   : > { %1127 = vst.msk [vmem:[#allocation2 + $0x78] sm:$0xff] %vm1111_vm12, %v1110_v59  ;;  %v1141_v59 = vld [vmem:[#allocation3 + $0x68] sm:$0xff] }
 0x299   : > { %1125 = vst.msk [vmem:[#allocation2 + $0x68] sm:$0xff] %vm1111_vm12, %v1108_v18 }
 0x29b   : > { %v4018_v54 = vpop.f32.mrb[16].mxu1 }
 0x29c   : > { %v1251_v44 = vadd.f32 %v4018_v54, %v1138_v49  ;;  %v1210_v63 = vpop.f32.mrb[17].mxu1 }
 0x29d   : > { %v1249_v48 = vadd.f32 %v1210_v63, %v1136_v62  ;;  %v4019_v46 = vpop.f32.mrb[18].mxu1  ;;  %v1277_v63 = vld [vmem:[#allocation3] sm:$0xff] (!%p3664_p12) }
 0x29e   : > { %1267 = vst.msk [vmem:[#allocation3 + $0x50] sm:$0xff] %vm1111_vm12, %v1251_v44  ;;  %v1252_v52 = vadd.f32 %v4019_v46, %v1139_v55  ;;  %v1213_v42 = vpop.f32.mrb[19].mxu1  ;;  %v4312_v55 = vld [vmem:[%s6536_s6] sm:$0xff] (!%p3664_p12)  }
 0x29f   : > { %1265 = vst.msk [vmem:[#allocation3 + $0x40] sm:$0xff] %vm1111_vm12, %v1249_v48  ;;  %v1250_v0 = vadd.f32 %v1213_v42, %v1137_v47  ;;  %v4313_v44 = vld [vmem:[%s6534_s4] sm:$0xff] (!%p3664_p12)   ;;  %4042 = vmatprep.subr.bf16.mxu0 (!%p3664_p12), %v4312_v55  ;;  %v1278_v47 = vld [vmem:[#allocation3 + $0x8] sm:$0xff] (!%p3664_p12)  ;;  %v1293_v48 = vmax.f32 (!%p3664_p12), %v1277_v63, 1.0  ;;  %v1280_v42 = vld [vmem:[#allocation3 + $0x18] sm:$0xff] (!%p3664_p12) }
 0x2a0   : > { %1268 = vst.msk [vmem:[#allocation3 + $0x58] sm:$0xff] %vm1111_vm12, %v1252_v52  ;;  %4024 = vmatprep.subr.bf16.mxu1 (!%p3664_p12), %v4313_v44  ;;  %4043 = vmatpush3.bf16.msra.mxu0 (!%p3664_p12), %v4312_v55  ;;  %v1294_v46 = vmax.f32 (!%p3664_p12), %v1278_v47, 1.0  ;;  %v1279_v52 = vld [vmem:[#allocation3 + $0x10] sm:$0xff] (!%p3664_p12) }
 0x2a1   : > { %1266 = vst.msk [vmem:[#allocation3 + $0x48] sm:$0xff] %vm1111_vm12, %v1250_v0  ;;  %4025 = vmatpush3.bf16.msra.mxu1 (!%p3664_p12), %v4313_v44  ;;  %v1295_v0 = vmax.f32 (!%p3664_p12), %v1279_v52, 1.0  ;;  %4314 = vrcp.f32 (!%p3664_p12), %v1293_v48  ;;  %v1325_v48 = vld [vmem:[#allocation2] sm:$0xff] (!%p3664_p12) }
 0x2a2   : > { %4316 = vrcp.f32 (!%p3664_p12), %v1294_v46 }
 0x2a3   : > { %v4022_v39 = vpop.f32.mrb[20].mxu1  ;;  %1276 = sbr.rel (%p3664_p12) target bundleno = 937 (0x3a9), region = 100  ;;  %4045 = vmatmul.mubr.msk.bf16.vlgmr.msra.gmra.mrb[0].mxu0 (!%p3664_p12), %vm1111_vm12, %v4960_v51  ;;  %4318 = vrcp.f32 (!%p3664_p12), %v1295_v0  ;;  %v1327_v0 = vld [vmem:[#allocation2 + $0x10] sm:$0xff] (!%p3664_p12) }
 0x2a4   : > { %v1255_v41 = vadd.f32 %v4022_v39, %v1142_v37  ;;  %v1226_v58 = vpop.f32.mrb[21].mxu1  ;;  %v1296_v37 = vmax.f32 (!%p3664_p12), %v1280_v42, 1.0  ;;  %v1282_v39 = vld [vmem:[#allocation3 + $0x28] sm:$0xff] (!%p3664_p12)  ;;  %4048 = vmatprep.mubr.msk.bf16.mxu0 (!%p3664_p12), %vm1111_vm12, %v4971_v53 }
 0x2a5   : > { %v1253_v60 = vadd.f32 %v1226_v58, %v1140_v38  ;;  %v4023_v18 = vpop.f32.mrb[22].mxu1  ;;  %v1281_v38 = vld [vmem:[#allocation3 + $0x20] sm:$0xff] (!%p3664_p12)  ;;  %v1284_v58 = vld [vmem:[#allocation3 + $0x38] sm:$0xff] (!%p3664_p12)  ;;  %v1326_v53 = vld [vmem:[#allocation2 + $0x8] sm:$0xff] (!%p3664_p12) }
 0x2a6   : > { %1271 = vst.msk [vmem:[#allocation3 + $0x70] sm:$0xff] %vm1111_vm12, %v1255_v41  ;;  %v1256_v49 = vadd.f32 %v4023_v18, %v1143_v40  ;;  %v1229_v62 = vpop.f32.mrb[23].mxu1  ;;  %v1297_v45 = vmax.f32 (!%p3664_p12), %v1281_v38, 1.0  ;;  %v1298_v40 = vmax.f32 (!%p3664_p12), %v1282_v39, 1.0  ;;  %v1283_v41 = vld [vmem:[#allocation3 + $0x30] sm:$0xff] (!%p3664_p12)  ;;  %4320 = vrcp.f32 (!%p3664_p12), %v1296_v37 }
 0x2a7   : > { %1269 = vst.msk [vmem:[#allocation3 + $0x60] sm:$0xff] %vm1111_vm12, %v1253_v60  ;;  %v1254_v54 = vadd.f32 %v1229_v62, %v1141_v59  ;;  %v1299_v59 = vmax.f32 (!%p3664_p12), %v1283_v41, 1.0  ;;  %v1285_v60 = vld [vmem:[#allocation3 + $0x40] sm:$0xff] (!%p3664_p12)  ;;  %v1288_v44 = vld [vmem:[#allocation3 + $0x58] sm:$0xff] (!%p3664_p12) }
 0x2a8   : > { %1272 = vst.msk [vmem:[#allocation3 + $0x78] sm:$0xff] %vm1111_vm12, %v1256_v49  ;;  %v1286_v18 = vld [vmem:[#allocation3 + $0x48] sm:$0xff] (!%p3664_p12)  ;;  %v1300_v49 = vmax.f32 (!%p3664_p12), %v1284_v58, 1.0  ;;  %4322 = vrcp.f32 (!%p3664_p12), %v1297_v45  ;;  %v1301_v62 = vmax.f32 (!%p3664_p12), %v1285_v60, 1.0  ;;  %v1304_v46 = vmax.f32 (!%p3664_p12), %v1288_v44, 1.0  ;;  %v1328_v45 = vld [vmem:[#allocation2 + $0x18] sm:$0xff] (!%p3664_p12) }
 0x2a9   : > { %1270 = vst.msk [vmem:[#allocation3 + $0x68] sm:$0xff] %vm1111_vm12, %v1254_v54  ;;  %v1287_v54 = vld [vmem:[#allocation3 + $0x50] sm:$0xff] (!%p3664_p12)  ;;  %4324 = vrcp.f32 (!%p3664_p12), %v1298_v40  ;;  %v1302_v55 = vmax.f32 (!%p3664_p12), %v1286_v18, 1.0  ;;  %v1329_v58 = vld [vmem:[#allocation2 + $0x20] sm:$0xff] (!%p3664_p12)  ;;  %v1330_v18 = vld [vmem:[#allocation2 + $0x28] sm:$0xff] (!%p3664_p12) }
 0x2aa   : > { %4326 = vrcp.f32 %v1299_v59  ;;  %v1303_v63 = vmax.f32 %v1287_v54, 1.0 }
 0x2ab   : > { %4328 = vrcp.f32 %v1300_v49  ;;  %4049 = vmatmul.mubr.msk.bf16.gmra.mrb[4].mxu0 %vm1111_vm12, %v4982_v57  ;;  %v4315_v42 = vpop.eup %4314 }
 0x2ac   : > { %4330 = vrcp.f32 %v1301_v62  ;;  %4052 = vmatprep.mubr.msk.bf16.mxu0 %vm1111_vm12, %v4993_v61  ;;  %v4317_v38 = vpop.eup %4316  ;;  %v1341_v39 = vmul.f32 %v4315_v42, %v1325_v48 }
 0x2ad   : > { %4332 = vrcp.f32 %v1302_v55  ;;  %v4319_v40 = vpop.eup %4318  ;;  %v1342_v41 = vmul.f32 %v4317_v38, %v1326_v53  ;;  %v1291_v57 = vld [vmem:[#allocation3 + $0x70] sm:$0xff]  ;;  %v1334_v38 = vld [vmem:[#allocation2 + $0x48] sm:$0xff] }
 0x2ae   : > { %v1289_v51 = vld [vmem:[#allocation3 + $0x60] sm:$0xff]  ;;  %4334 = vrcp.f32 %v1303_v63  ;;  %v1343_v60 = vmul.f32 %v4319_v40, %v1327_v0  ;;  %v1307_v42 = vmax.f32 %v1291_v57, 1.0 }
 0x2af   : > { %v1305_v52 = vmax.f32 %v1289_v51, 1.0  ;;  %4336 = vrcp.f32 %v1304_v46  ;;  %v1357_v62 = vpack.c.bf16 %v1342_v41, %v1341_v39  ;;  %v1292_v55 = vld [vmem:[#allocation3 + $0x78] sm:$0xff]  ;;  %v1331_v51 = vld [vmem:[#allocation2 + $0x30] sm:$0xff]  ;;  %v1333_v46 = vld [vmem:[#allocation2 + $0x40] sm:$0xff] }
 0x2b0   : > { %v1290_v47 = vld [vmem:[#allocation3 + $0x68] sm:$0xff]  ;;  %v4321_v59 = vpop.eup %4320 }
 0x2b1   : > { %v1306_v37 = vmax.f32 %v1290_v47, 1.0  ;;  %4338 = vrcp.f32 %v1305_v52  ;;  %v1344_v54 = vmul.f32 %v4321_v59, %v1328_v45  ;;  %v1332_v47 = vld [vmem:[#allocation2 + $0x38] sm:$0xff]  ;;  %4026 = vmatprep.mubr.msk.bf16.mxu1 %vm1111_vm12, %v1357_v62  ;;  %v1308_v52 = vmax.f32 %v1292_v55, 1.0  ;;  %v1335_v62 = vld [vmem:[#allocation2 + $0x50] sm:$0xff] }
 0x2b2   : > { %v4323_v49 = vpop.eup %4322 }
 0x2b3   : > { %4340 = vrcp.f32 %v1306_v37  ;;  %v4325_v61 = vpop.eup %4324  ;;  %v1345_v44 = vmul.f32 %v4323_v49, %v1329_v58  ;;  %v1358_v63 = vpack.c.bf16 %v1344_v54, %v1343_v60  ;;  %4053 = vmatmul.mubr.msk.bf16.gmra.mrb[8].mxu0 %vm1111_vm12, %v5004_v43  ;;  %v1336_v54 = vld [vmem:[#allocation2 + $0x58] sm:$0xff] }
 0x2b4   : > { %v4327_v48 = vpop.eup %4326  ;;  %v1346_v53 = vmul.f32 %v4325_v61, %v1330_v18  ;;  %4056 = vmatprep.mubr.msk.bf16.mxu0 %vm1111_vm12, %v5015_v50  ;;  %4342 = vrcp.f32 %v1307_v42  ;;  %v1337_v61 = vld [vmem:[#allocation2 + $0x60] sm:$0xff] }
 0x2b5   : > { %v4329_v0 = vpop.eup %4328  ;;  %4027 = vmatmul.mubr.msk.bf16.vlgmr.msra.gmra.mrb[0].mxu1 %vm1111_vm12, %v1358_v63  ;;  %v1347_v45 = vmul.f32 %v4327_v48, %v1331_v51  ;;  %4344 = vrcp.f32 %v1308_v52 }
 0x2b6   : > { %v4331_v39 = vpop.eup %4330  ;;  %v1359_v37 = vpack.c.bf16 %v1346_v53, %v1345_v44  ;;  %v1348_v40 = vmul.f32 %v4329_v0, %v1332_v47  ;;  %v1338_v44 = vld [vmem:[#allocation2 + $0x68] sm:$0xff]  ;;  %v1339_v0 = vld [vmem:[#allocation2 + $0x70] sm:$0xff] }
 0x2b7   : > { %v4333_v41 = vpop.eup %4332  ;;  %v1349_v58 = vmul.f32 %v4331_v39, %v1333_v46 }
 0x2b8   : > { %4030 = vmatprep.mubr.msk.bf16.mxu1 %vm1111_vm12, %v1359_v37  ;;  %v1350_v59 = vmul.f32 %v4333_v41, %v1334_v38  ;;  %v4335_v60 = vpop.eup %4334  ;;  %v1360_v43 = vpack.c.bf16 %v1348_v40, %v1347_v45  ;;  %v1340_v38 = vld [vmem:[#allocation2 + $0x78] sm:$0xff] }
 0x2b9   : > { %v4337_v18 = vpop.eup %4336  ;;  %v1351_v50 = vmul.f32 %v4335_v60, %v1335_v62 }
 0x2ba   : > { %v1361_v49 = vpack.c.bf16 %v1350_v59, %v1349_v58  ;;  %v1352_v51 = vmul.f32 %v4337_v18, %v1336_v54 }
 0x2bb   : > { %v4339_v57 = vpop.eup %4338  ;;  %4057 = vmatmul.mubr.msk.bf16.gmra.mrb[12].mxu0 %vm1111_vm12, %v5026_v56 }
 0x2bc   : > { %v1353_v47 = vmul.f32 %v4339_v57, %v1337_v61  ;;  %v1362_v53 = vpack.c.bf16 %v1352_v51, %v1351_v50 }
 0x2bd   : > { %v4341_v55 = vpop.eup %4340  ;;  %4031 = vmatmul.mubr.msk.bf16.gmra.mrb[4].mxu1 %vm1111_vm12, %v1360_v43  ;;  %v5225_v43 = vld [vmem:[%s6535_s5] ss:$0 sm:$0xff] }
 0x2be   : > { %4034 = vmatprep.mubr.msk.bf16.mxu1 %vm1111_vm12, %v1361_v49  ;;  %v1354_v48 = vmul.f32 %v4341_v55, %v1338_v44  ;;  %v4343_v63 = vpop.eup %4342 }
 0x2bf   : > { %v4345_v46 = vpop.eup %4344  ;;  %v1355_v52 = vmul.f32 %v4343_v63, %v1339_v0 }
 0x2c0   : > { %v1363_v42 = vpack.c.bf16 %v1354_v48, %v1353_v47  ;;  %v1356_v39 = vmul.f32 %v4345_v46, %v1340_v38 }
 0x2c2   : > { %v1364_v56 = vpack.c.bf16 %v1356_v39, %v1355_v52 }
 0x2c5   : > { %4035 = vmatmul.mubr.msk.bf16.gmra.mrb[8].mxu1 %vm1111_vm12, %v1362_v53 }
 0x2c6   : > { %4038 = vmatprep.mubr.msk.bf16.mxu1 %vm1111_vm12, %v1363_v42 }
 0x2cd   : > { %4039 = vmatmul.mubr.msk.bf16.gmra.mrb[12].mxu1 %vm1111_vm12, %v1364_v56 }
 0x376   : > { %v4046_v37 = vpop.f32.mrb[0].mxu0 }
 0x377   : > { %v1567_v45 = vpop.f32.mrb[1].mxu0 }
 0x378   : > { %v4047_v40 = vpop.f32.mrb[2].mxu0 }
 0x379   : > { %v1570_v41 = vpop.f32.mrb[3].mxu0 }
 0x37e   : > { %v4050_v58 = vpop.f32.mrb[4].mxu0 }
 0x37f   : > { %v1583_v59 = vpop.f32.mrb[5].mxu0 }
 0x380   : > { %v4051_v60 = vpop.f32.mrb[6].mxu0 }
 0x381   : > { %v1586_v18 = vpop.f32.mrb[7].mxu0 }
 0x386   : > { %v4054_v57 = vpop.f32.mrb[8].mxu0 }
 0x387   : > { %v1599_v62 = vpop.f32.mrb[9].mxu0 }
 0x388   : > { %v4028_v49 = vpop.f32.mrb[0].mxu1  ;;  %v4055_v61 = vpop.f32.mrb[10].mxu0 }
 0x389   : > { %v1447_v54 = vadd.f32 %v4028_v49, %v5225_v43  ;;  %v1438_v55 = vpop.f32.mrb[1].mxu1  ;;  %v1602_v51 = vpop.f32.mrb[11].mxu0 }
 0x38a   : > { %v1439_v44 = vadd.f32 %v5225_v43, %v1438_v55  ;;  %v4029_v50 = vpop.f32.mrb[2].mxu1 }
 0x38b   : > { %v1632_v47 = vadd.f32 %v4046_v37, %v1447_v54  ;;  %v1450_v48 = vadd.f32 %v4029_v50, %v5225_v43  ;;  %v1441_v63 = vpop.f32.mrb[3].mxu1 }
 0x38c   : > { %v1630_v53 = vadd.f32 %v1567_v45, %v1439_v44  ;;  %v1442_v46 = vadd.f32 %v5225_v43, %v1441_v63 }
 0x38d   : > { %1649 = vst.msk [vmem:[#allocation4 + $0x10] sm:$0xff] %vm1646_vm8, %v1632_v47  ;;  %v1633_v42 = vadd.f32 %v4047_v40, %v1450_v48 }
 0x38e   : > { %1647 = vst.msk [vmem:[#allocation4] sm:$0xff] %vm1646_vm8, %v1630_v53  ;;  %v1631_v0 = vadd.f32 %v1570_v41, %v1442_v46  ;;  %v4058_v38 = vpop.f32.mrb[12].mxu0 }
 0x38f   : > { %1650 = vst.msk [vmem:[#allocation4 + $0x18] sm:$0xff] %vm1646_vm8, %v1633_v42  ;;  %v1615_v39 = vpop.f32.mrb[13].mxu0 }
 0x390   : > { %1648 = vst.msk [vmem:[#allocation4 + $0x8] sm:$0xff] %vm1646_vm8, %v1631_v0  ;;  %v4032_v52 = vpop.f32.mrb[4].mxu1  ;;  %v4059_v49 = vpop.f32.mrb[14].mxu0 }
 0x391   : > { %v1463_v56 = vadd.f32 %v4032_v52, %v5225_v43  ;;  %v1454_v37 = vpop.f32.mrb[5].mxu1  ;;  %v1618_v55 = vpop.f32.mrb[15].mxu0 }
 0x392   : > { %v1455_v45 = vadd.f32 %v5225_v43, %v1454_v37  ;;  %v4033_v54 = vpop.f32.mrb[6].mxu1 }
 0x393   : > { %v1636_v44 = vadd.f32 %v4050_v58, %v1463_v56  ;;  %v1466_v40 = vadd.f32 %v4033_v54, %v5225_v43  ;;  %v1457_v50 = vpop.f32.mrb[7].mxu1 }
 0x394   : > { %v1634_v41 = vadd.f32 %v1583_v59, %v1455_v45  ;;  %v1458_v47 = vadd.f32 %v5225_v43, %v1457_v50 }
 0x395   : > { %1653 = vst.msk [vmem:[#allocation4 + $0x30] sm:$0xff] %vm1646_vm8, %v1636_v44  ;;  %v1637_v48 = vadd.f32 %v4051_v60, %v1466_v40 }
 0x396   : > { %1651 = vst.msk [vmem:[#allocation4 + $0x20] sm:$0xff] %vm1646_vm8, %v1634_v41  ;;  %v1635_v63 = vadd.f32 %v1586_v18, %v1458_v47 }
 0x397   : > { %1654 = vst.msk [vmem:[#allocation4 + $0x38] sm:$0xff] %vm1646_vm8, %v1637_v48 }
 0x398   : > { %1652 = vst.msk [vmem:[#allocation4 + $0x28] sm:$0xff] %vm1646_vm8, %v1635_v63  ;;  %v4036_v53 = vpop.f32.mrb[8].mxu1 }
 0x399   : > { %v1479_v46 = vadd.f32 %v4036_v53, %v5225_v43  ;;  %v1470_v58 = vpop.f32.mrb[9].mxu1 }
 0x39a   : > { %v1471_v42 = vadd.f32 %v5225_v43, %v1470_v58  ;;  %v4037_v0 = vpop.f32.mrb[10].mxu1 }
 0x39b   : > { %v1640_v59 = vadd.f32 %v4054_v57, %v1479_v46  ;;  %v1482_v52 = vadd.f32 %v4037_v0, %v5225_v43  ;;  %v1473_v56 = vpop.f32.mrb[11].mxu1 }
 0x39c   : > { %v1638_v37 = vadd.f32 %v1599_v62, %v1471_v42  ;;  %v1474_v60 = vadd.f32 %v5225_v43, %v1473_v56 }
 0x39d   : > { %1657 = vst.msk [vmem:[#allocation4 + $0x50] sm:$0xff] %vm1646_vm8, %v1640_v59  ;;  %v1641_v18 = vadd.f32 %v4055_v61, %v1482_v52 }
 0x39e   : > { %1655 = vst.msk [vmem:[#allocation4 + $0x40] sm:$0xff] %vm1646_vm8, %v1638_v37  ;;  %v1639_v45 = vadd.f32 %v1602_v51, %v1474_v60 }
 0x39f   : > { %1658 = vst.msk [vmem:[#allocation4 + $0x58] sm:$0xff] %vm1646_vm8, %v1641_v18 }
 0x3a0   : > { %1656 = vst.msk [vmem:[#allocation4 + $0x48] sm:$0xff] %vm1646_vm8, %v1639_v45  ;;  %v4040_v54 = vpop.f32.mrb[12].mxu1 }
 0x3a1   : > { %v1495_v44 = vadd.f32 %v4040_v54, %v5225_v43  ;;  %v1486_v57 = vpop.f32.mrb[13].mxu1 }
 0x3a2   : > { %v1487_v40 = vadd.f32 %v5225_v43, %v1486_v57  ;;  %v4041_v50 = vpop.f32.mrb[14].mxu1 }
 0x3a3   : > { %v1644_v62 = vadd.f32 %v4058_v38, %v1495_v44  ;;  %v1498_v41 = vadd.f32 %v4041_v50, %v5225_v43  ;;  %v1489_v47 = vpop.f32.mrb[15].mxu1 }
 0x3a4   : > { %v1642_v48 = vadd.f32 %v1615_v39, %v1487_v40  ;;  %v1490_v61 = vadd.f32 %v5225_v43, %v1489_v47 }
 0x3a5   : > { %1661 = vst.msk [vmem:[#allocation4 + $0x70] sm:$0xff] %vm1646_vm8, %v1644_v62  ;;  %v1645_v51 = vadd.f32 %v4059_v49, %v1498_v41 }
 0x3a6   : > { %1659 = vst.msk [vmem:[#allocation4 + $0x60] sm:$0xff] %vm1646_vm8, %v1642_v48  ;;  %v1643_v63 = vadd.f32 %v1618_v55, %v1490_v61 }
 0x3a7   : > { %1662 = vst.msk [vmem:[#allocation4 + $0x78] sm:$0xff] %vm1646_vm8, %v1645_v51 }
 0x3a8   : > { %1660 = vst.msk [vmem:[#allocation4 + $0x68] sm:$0xff] %vm1646_vm8, %v1643_v63 }
 0x3a9 PF: > { %p3684_p13 = scmp.ne.s32.totalorder %s4533_s25, 1 }
 0x3ab   : > { %1666 = sbr.rel (%p3684_p13) target bundleno = 2170 (0x87a), region = 104 }
 0x3b2   : > { %v1683_v43 = vld [vmem:[%s6537_s7] sm:$0xf]  ;;  %vm1756_vm9 = vcmask 1043456   ;;  %2166 = vxpose.xlu0.c.b16.start [1/8] %v669_v35, 128  ;;  %vm1731_vm10 = vcmask 64512   ;;  %v4427_v49 = vld [vmem:[%s4787_s1 + $0x8] sm:$0xff]   ;;  %v4428_v55 = vld [vmem:[%s4787_s1 + $0x10] sm:$0xff]   ;;  %v6635_v20 = vpack.c.bf16 %v4817_v24, %v4812_v23  ;;  %v6636_v23 = vpack.c.bf16 %v4827_v26, %v4822_v25 }
 0x3b3   : > { %v4426_v38 = vld [vmem:[%s4787_s1] sm:$0xff]   ;;  %4254 = vmatprep.subr.msk.bf16.mxu0 %vm1756_vm9, %v1683_v43  ;;  %v1758_v39 = vsel %vm1756_vm9, %v1683_v43, 0  ;;  %v4429_v19 = vld [vmem:[%s4787_s1 + $0x18] sm:$0xff]   ;;  %v6637_v24 = vpack.c.bf16 %v4837_v28, %v4832_v27  ;;  %v4431_v53 = vld [vmem:[%s4787_s1 + $0x28] sm:$0xff]   ;;  %v6638_v58 = vpack.c.bf16 %v4847_v30, %v4842_v29  ;;  %v6639_v25 = vpack.c.bf16 %v4857_v32, %v4852_v31  ;;  %s4552_s18 = smov 64   ;;  %s4553_s20 = smov 32  }
 0x3b4   : > { %4061 = vmatpush3.bf16.msra.mxu0 %v1758_v39  ;;  %4062 = vmatprep.mubr.msk.bf16.mxu0 %vm1731_vm10, %v4426_v38  ;;  %v4434_v35 = vld [vmem:[%s6539_s9] sm:$0xff]   ;;  %v4432_v46 = vld [vmem:[%s4787_s1 + $0x30] sm:$0xff]   ;;  %v4433_v26 = vld [vmem:[%s4787_s1 + $0x38] sm:$0xff]   ;;  %v6640_v27 = vpack.c.bf16 %v4867_v34, %v4862_v33  ;;  %vm2004_vm14 = vcmask 130048   ;;  %vm6663_vm13 = vcmp.eq.s32.totalorder %v4719_v10, %v4707_v6  ;;  %vm6664_vm11 = vcmp.eq.s32.totalorder %v4722_v11, %v4707_v6  ;;  %p3784_p0 = scmp.ne.s32.totalorder %s4529_s24, 1 }
 0x3b5   : > { %4080 = vmatprep.mubr.msk.bf16.mxu1 %vm1731_vm10, %v4426_v38  ;;  %v1873_v21 = vld [vmem:[%s6541_s11] sm:$0xf]  ;;  %4096 = vmatprep.subr.bf16.mxu0 %v4434_v35  ;;  %v2143_v29 = vld [vmem:[#allocation4 + $0x8] sm:$0xff]  ;;  %v2144_v30 = vld [vmem:[#allocation4 + $0x10] sm:$0xff]  ;;  %vm6665_vm15 = vcmp.eq.s32.totalorder %v4725_v12, %v4707_v6  ;;  %vm6666_vm12 = vcmp.eq.s32.totalorder %v4728_v13, %v4707_v6  ;;  %vm6667_vm8 = vcmp.eq.s32.totalorder %v4741_v14, %v4707_v6 }
 0x3b6   : > { %2167 = vxpose.xlu0.c.b16.cont [2/8] %v670_v36, 128  ;;  %v4430_v22 = vld [vmem:[%s4787_s1 + $0x20] sm:$0xff]   ;;  %4255 = vmatprep.subr.msk.bf16.mxu1 %vm1756_vm9, %v1873_v21  ;;  %v1882_v36 = vsel %vm1756_vm9, %v1873_v21, 0  ;;  %v2145_v31 = vld [vmem:[#allocation4 + $0x18] sm:$0xff]  ;;  %v2147_v52 = vld [vmem:[#allocation4 + $0x28] sm:$0xff]  ;;  %vm6668_vm9 = vcmp.eq.s32.totalorder %v4744_v15, %v4707_v6 }
 0x3b7   : > { %4063 = vmatmul.mubr.msk.bf16.vlgmr.msra.gmra.mrb[0].mxu0 %vm1731_vm10, %v4427_v49  ;;  %4079 = vmatpush3.bf16.msra.mxu1 %v1882_v36  ;;  %v2142_v28 = vld [vmem:[#allocation4] sm:$0xff]  ;;  %v2159_v32 = vpack.c.bf16 %v2145_v31, %v2144_v30  ;;  %v2148_v34 = vld [vmem:[#allocation4 + $0x30] sm:$0xff]  ;;  %v2149_v56 = vld [vmem:[#allocation4 + $0x38] sm:$0xff] }
 0x3b8   : > { %4066 = vmatprep.mubr.msk.bf16.mxu0 %vm1731_vm10, %v4428_v55  ;;  %4097 = vmatpush3.bf16.msra.mxu0 %v4434_v35  ;;  %v2158_v0 = vpack.c.bf16 %v2143_v29, %v2142_v28  ;;  %v2146_v59 = vld [vmem:[#allocation4 + $0x20] sm:$0xff]  ;;  %v2161_v37 = vpack.c.bf16 %v2149_v56, %v2148_v34  ;;  %v2151_v18 = vld [vmem:[#allocation4 + $0x48] sm:$0xff]  ;;  %v2152_v54 = vld [vmem:[#allocation4 + $0x50] sm:$0xff] }
 0x3b9   : > { %v2160_v33 = vpack.c.bf16 %v2147_v52, %v2146_v59  ;;  %v2150_v60 = vld [vmem:[#allocation4 + $0x40] sm:$0xff]  ;;  %v2153_v44 = vld [vmem:[#allocation4 + $0x58] sm:$0xff]  ;;  %v2155_v50 = vld [vmem:[#allocation4 + $0x68] sm:$0xff] }
 0x3ba   : > { %2168 = vxpose.xlu0.c.b16.cont [3/8] %v6635_v20, 128  ;;  %4081 = vmatmul.mubr.msk.bf16.vlgmr.msra.gmra.mrb[0].mxu1 %vm1731_vm10, %v4427_v49  ;;  %v2162_v45 = vpack.c.bf16 %v2151_v18, %v2150_v60  ;;  %v2163_v57 = vpack.c.bf16 %v2153_v44, %v2152_v54  ;;  %v2154_v40 = vld [vmem:[#allocation4 + $0x60] sm:$0xff]  ;;  %v2156_v47 = vld [vmem:[#allocation4 + $0x70] sm:$0xff]  ;;  %v2157_v48 = vld [vmem:[#allocation4 + $0x78] sm:$0xff] }
 0x3bb   : > { %4084 = vmatprep.mubr.msk.bf16.mxu1 %vm1731_vm10, %v4428_v55  ;;  %4114 = vmatprep.subr.bf16.mxu1 %v2158_v0  ;;  %v2164_v41 = vpack.c.bf16 %v2155_v50, %v2154_v40  ;;  %v2165_v61 = vpack.c.bf16 %v2157_v48, %v2156_v47  ;;  %v5324_v55 = vld [vmem:[%s6538_s8] ss:$0 sm:$0xff] }
 0x3bc   : > { %4115 = vmatpush3.bf16.msra.mxu1 %v2158_v0 }
 0x3bd   : > { %4116 = vmatprep.subr.bf16.mxu1 %v2159_v32 }
 0x3be   : > { %2169 = vxpose.xlu0.c.b16.cont [4/8] %v6636_v23, 128 }
 0x3bf   : > { %4067 = vmatmul.mubr.msk.bf16.gmra.mrb[4].mxu0 %vm1731_vm10, %v4429_v19 }
 0x3c0   : > { %4070 = vmatprep.mubr.msk.bf16.mxu0 %vm1731_vm10, %v4430_v22  ;;  %4117 = vmatpush3.bf16.msra.mxu1 %v2159_v32 }
 0x3c1   : > { %4118 = vmatprep.subr.bf16.mxu1 %v2160_v33 }
 0x3c2   : > { %2170 = vxpose.xlu0.c.b16.cont [5/8] %v6637_v24, 128  ;;  %4085 = vmatmul.mubr.msk.bf16.gmra.mrb[4].mxu1 %vm1731_vm10, %v4429_v19 }
 0x3c3   : > { %4088 = vmatprep.mubr.msk.bf16.mxu1 %vm1731_vm10, %v4430_v22 }
 0x3c4   : > { %4119 = vmatpush3.bf16.msra.mxu1 %v2160_v33 }
 0x3c5   : > { %4120 = vmatprep.subr.bf16.mxu1 %v2161_v37 }
 0x3c6   : > { %2171 = vxpose.xlu0.c.b16.cont [6/8] %v6638_v58, 128 }
 0x3c7   : > { %4071 = vmatmul.mubr.msk.bf16.gmra.mrb[8].mxu0 %vm1731_vm10, %v4431_v53 }
 0x3c8   : > { %4074 = vmatprep.mubr.msk.bf16.mxu0 %vm1731_vm10, %v4432_v46  ;;  %4121 = vmatpush3.bf16.msra.mxu1 %v2161_v37 }
 0x3c9   : > { %4122 = vmatprep.subr.bf16.mxu1 %v2162_v45 }
 0x3ca   : > { %2172 = vxpose.xlu0.c.b16.cont [7/8] %v6639_v25, 128  ;;  %4089 = vmatmul.mubr.msk.bf16.gmra.mrb[8].mxu1 %vm1731_vm10, %v4431_v53 }
 0x3cb   : > { %4092 = vmatprep.mubr.msk.bf16.mxu1 %vm1731_vm10, %v4432_v46 }
 0x3cc   : > { %4123 = vmatpush3.bf16.msra.mxu1 %v2162_v45 }
 0x3cd   : > { %4124 = vmatprep.subr.bf16.mxu1 %v2163_v57 }
 0x3ce   : > { %2173 = vxpose.xlu0.c.b16.end [8/8] %v6640_v27, 128  ;;  %v5333_v27 = vld [vmem:[%s6542_s12] ss:$0 sm:$0xff] }
 0x3cf   : > { %4075 = vmatmul.mubr.msk.bf16.gmra.mrb[12].mxu0 %vm1731_vm10, %v4433_v26 }
 0x3d0   : > { %4125 = vmatpush3.bf16.msra.mxu1 %v2163_v57 }
 0x3d1   : > { %4126 = vmatprep.subr.bf16.mxu1 %v2164_v41 }
 0x3d2   : > { %4093 = vmatmul.mubr.msk.bf16.gmra.mrb[12].mxu1 %vm1731_vm10, %v4433_v26  ;;  %vm6669_vm10 = vcmp.eq.s32.totalorder %v4747_v16, %v4707_v6 }
 0x3d4   : > { %4127 = vmatpush3.bf16.msra.mxu1 %v2164_v41 }
 0x3d5   : > { %4128 = vmatprep.subr.bf16.mxu1 %v2165_v61 }
 0x3d8   : > { %4129 = vmatpush3.bf16.msra.mxu1 %v2165_v61 }
 0x418   : > { %v2174_v42 = vpop.trf.xlu0 }
 0x419   : > { %4130 = vmatprep.mubr.bf16.mxu1 %v2174_v42 }
 0x41c   : > { %v2175_v62 = vpop.trf.xlu0 }
 0x41d   : > { %4131 = vmatmul.mubr.bf16.vlgmr.msra.gmra.mrb[16].mxu1 %v2175_v62 }
 0x420   : > { %v2176_v51 = vpop.trf.xlu0 }
 0x421   : > { %4134 = vmatprep.mubr.bf16.mxu1 %v2176_v51 }
 0x424   : > { %v2177_v63 = vpop.trf.xlu0 }
 0x425   : > { %4135 = vmatmul.mubr.bf16.gmra.mrb[20].mxu1 %v2177_v63 }
 0x428   : > { %v2178_v43 = vpop.trf.xlu0 }
 0x429   : > { %4138 = vmatprep.mubr.bf16.mxu1 %v2178_v43 }
 0x42c   : > { %v2179_v38 = vpop.trf.xlu0 }
 0x42d   : > { %4139 = vmatmul.mubr.bf16.gmra.mrb[24].mxu1 %v2179_v38 }
 0x430   : > { %v2180_v39 = vpop.trf.xlu0 }
 0x431   : > { %4142 = vmatprep.mubr.bf16.mxu1 %v2180_v39 }
 0x434   : > { %v2181_v49 = vpop.trf.xlu0 }
 0x435   : > { %4143 = vmatmul.mubr.bf16.gmra.mrb[28].mxu1 %v2181_v49 }
 0x48a   : > { %v4064_v19 = vpop.f32.mrb[0].mxu0 }
 0x48b   : > { %v1803_v20 = vadd.f32 %v4064_v19, %v5324_v55  ;;  %v1794_v35 = vpop.f32.mrb[1].mxu0 }
 0x48c   : > { %v1795_v21 = vadd.f32 %v5324_v55, %v1794_v35  ;;  %v4065_v22 = vpop.f32.mrb[2].mxu0 }
 0x48d   : > { %v1806_v36 = vadd.f32 %v4065_v22, %v5324_v55  ;;  %v1797_v23 = vpop.f32.mrb[3].mxu0  ;;  %v1859_v53 = vmax.f32 %v1803_v20, 0.0  ;;  %v4082_v0 = vpop.f32.mrb[0].mxu1 }
 0x48e   : > { %v1798_v24 = vadd.f32 %v5324_v55, %v1797_v23  ;;  %v1857_v58 = vmax.f32 %v1795_v21, 0.0  ;;  %v5339_v59 = vadd.f32 %v4082_v0, %v5333_v27  ;;  %v1918_v52 = vpop.f32.mrb[1].mxu1 }
 0x48f   : > { %v1860_v46 = vmax.f32 %v1806_v36, 0.0  ;;  %v4083_v56 = vpop.f32.mrb[2].mxu1  ;;  %v5345_v60 = vadd.f32 %v5333_v27, %v1918_v52 }
 0x490   : > { %v1858_v25 = vmax.f32 %v1798_v24, 0.0  ;;  %v5348_v18 = vadd.f32 %v4083_v56, %v5333_v27  ;;  %v1921_v45 = vpop.f32.mrb[3].mxu1 }
 0x491   : > { %v1982_v26 = vpack.c.bf16 %v1860_v46, %v1859_v53  ;;  %v5351_v57 = vadd.f32 %v5333_v27, %v1921_v45 }
 0x492   : > { %v1981_v28 = vpack.c.bf16 %v1858_v25, %v1857_v58  ;;  %v4068_v29 = vpop.f32.mrb[4].mxu0  ;;  %v4346_v62 = vpack.i.bf16 %v5348_v18, %v5339_v59 }
 0x493   : > { %v1819_v30 = vadd.f32 %v4068_v29, %v5324_v55  ;;  %v1810_v42 = vpop.f32.mrb[5].mxu0  ;;  %v4351_v61 = vpack.i.bf16 %v5351_v57, %v5345_v60 }
 0x494   : > { %v1811_v31 = vadd.f32 %v5324_v55, %v1810_v42  ;;  %v4069_v32 = vpop.f32.mrb[6].mxu0  ;;  %4098 = vmatprep.mubr.msk.bf16.mxu0 %vm2004_vm14, %v1981_v28  ;;  %4347 = vrot.lane.b32.xlu1 %v4346_v62, %s4552_s18 }
 0x495   : > { %v1822_v33 = vadd.f32 %v4069_v32, %v5324_v55  ;;  %v1813_v34 = vpop.f32.mrb[7].mxu0  ;;  %4099 = vmatmul.mubr.msk.bf16.vlgmr.msra.gmra.mrb[16].mxu0 %vm2004_vm14, %v1982_v26  ;;  %v1863_v54 = vmax.f32 %v1819_v30, 0.0  ;;  %v4086_v43 = vpop.f32.mrb[4].mxu1 }
 0x496   : > { %v1814_v37 = vadd.f32 %v5324_v55, %v1813_v34  ;;  %v1861_v40 = vmax.f32 %v1811_v31, 0.0  ;;  %v5362_v49 = vadd.f32 %v4086_v43, %v5333_v27  ;;  %v1934_v19 = vpop.f32.mrb[5].mxu1 }
 0x497   : > { %v1864_v44 = vmax.f32 %v1822_v33, 0.0  ;;  %v4087_v21 = vpop.f32.mrb[6].mxu1  ;;  %v5368_v36 = vadd.f32 %v5333_v27, %v1934_v19 }
 0x498   : > { %v1862_v50 = vmax.f32 %v1814_v37, 0.0  ;;  %v5371_v23 = vadd.f32 %v4087_v21, %v5333_v27  ;;  %4352 = vrot.lane.b32.xlu1 %v4351_v61, %s4552_s18  ;;  %v1937_v24 = vpop.f32.mrb[7].mxu1 }
 0x499   : > { %v1984_v41 = vpack.c.bf16 %v1864_v44, %v1863_v54  ;;  %v5375_v58 = vadd.f32 %v5333_v27, %v1937_v24 }
 0x49a   : > { %v1983_v47 = vpack.c.bf16 %v1862_v50, %v1861_v40  ;;  %v4072_v48 = vpop.f32.mrb[8].mxu0  ;;  %v4356_v28 = vpack.i.bf16 %v5371_v23, %v5362_v49 }
 0x49b   : > { %v1835_v51 = vadd.f32 %v4072_v48, %v5324_v55  ;;  %v1826_v63 = vpop.f32.mrb[9].mxu0  ;;  %v4361_v0 = vpack.i.bf16 %v5375_v58, %v5368_v36 }
 0x49c   : > { %v1827_v38 = vadd.f32 %v5324_v55, %v1826_v63  ;;  %v4073_v39 = vpop.f32.mrb[10].mxu0  ;;  %4102 = vmatprep.mubr.msk.bf16.mxu0 %vm2004_vm14, %v1983_v47  ;;  %4357 = vrot.lane.b32.xlu1 %v4356_v28, %s4552_s18  ;;  %v4435_v28 = vld [vmem:[%s6543_s13] sm:$0xff]  }
 0x49d   : > { %v1838_v20 = vadd.f32 %v4073_v39, %v5324_v55  ;;  %v1829_v35 = vpop.f32.mrb[11].mxu0  ;;  %4103 = vmatmul.mubr.msk.bf16.gmra.mrb[20].mxu0 %vm2004_vm14, %v1984_v41  ;;  %v1867_v53 = vmax.f32 %v1835_v51, 0.0  ;;  %v4090_v41 = vpop.f32.mrb[8].mxu1  ;;  %4146 = vmatprep.subr.bf16.mxu0 %v4435_v28 }
 0x49e   : > { %v1830_v22 = vadd.f32 %v5324_v55, %v1829_v35  ;;  %v1865_v25 = vmax.f32 %v1827_v38, 0.0  ;;  %v5392_v47 = vadd.f32 %v4090_v41, %v5333_v27  ;;  %v1950_v48 = vpop.f32.mrb[9].mxu1  ;;  %4147 = vmatpush3.bf16.msra.mxu0 %v4435_v28 }
 0x49f   : > { %v1868_v46 = vmax.f32 %v1838_v20, 0.0  ;;  %v5395_v61 = vadd.f32 %v5333_v27, %v1950_v48  ;;  %v4091_v51 = vpop.f32.mrb[10].mxu1 }
 0x4a0   : > { %v1866_v26 = vmax.f32 %v1830_v22, 0.0  ;;  %4362 = vrot.lane.b32.xlu1 %v4361_v0, %s4552_s18  ;;  %v1953_v63 = vpop.f32.mrb[11].mxu1 }
 0x4a1   : > { %v1986_v29 = vpack.c.bf16 %v1868_v46, %v1867_v53  ;;  %v5401_v43 = vadd.f32 %v5333_v27, %v1953_v63 }
 0x4a2   : > { %v1985_v30 = vpack.c.bf16 %v1866_v26, %v1865_v25  ;;  %v4076_v42 = vpop.f32.mrb[12].mxu0 }
 0x4a3   : > { %v1851_v31 = vadd.f32 %v4076_v42, %v5324_v55  ;;  %v1842_v32 = vpop.f32.mrb[13].mxu0  ;;  %v4438_v42 = vld [vmem:[%s6543_s13 + $0x18] sm:$0xff]  }
 0x4a4   : > { %v1843_v52 = vadd.f32 %v5324_v55, %v1842_v32  ;;  %v4077_v33 = vpop.f32.mrb[14].mxu0  ;;  %4106 = vmatprep.mubr.msk.bf16.mxu0 %vm2004_vm14, %v1985_v30  ;;  %v4439_v32 = vld [vmem:[%s6543_s13 + $0x20] sm:$0xff]  }
 0x4a5   : > { %v1871_v34 = vmax.f32 %v1851_v31, 0.0  ;;  %v1854_v56 = vadd.f32 %v4077_v33, %v5324_v55  ;;  %v1845_v37 = vpop.f32.mrb[15].mxu0  ;;  %4107 = vmatmul.mubr.msk.bf16.gmra.mrb[24].mxu0 %vm2004_vm14, %v1986_v29  ;;  %v4094_v19 = vpop.f32.mrb[12].mxu1  ;;  %v4436_v29 = vld [vmem:[%s6543_s13 + $0x8] sm:$0xff]  }
 0x4a6   : > { %v1869_v45 = vmax.f32 %v1843_v52, 0.0  ;;  %v1846_v54 = vadd.f32 %v5324_v55, %v1845_v37  ;;  %v5398_v55 = vadd.f32 %v4091_v51, %v5333_v27  ;;  %v1966_v20 = vpop.f32.mrb[13].mxu1  ;;  %v5411_v24 = vadd.f32 %v4094_v19, %v5333_v27  ;;  %4148 = vmatprep.subr.bf16.mxu0 %v4436_v29  ;;  %v5447_v52 = vld [vmem:[%s6540_s10] ss:$0 sm:$0xff] }
 0x4a7   : > { %v1872_v44 = vmax.f32 %v1854_v56, 0.0  ;;  %v5408_v35 = vadd.f32 %v5333_v27, %v1966_v20  ;;  %v4095_v21 = vpop.f32.mrb[14].mxu1  ;;  %4149 = vmatpush3.bf16.msra.mxu0 %v4436_v29 }
 0x4a8   : > { %v1870_v40 = vmax.f32 %v1846_v54, 0.0  ;;  %v1969_v22 = vpop.f32.mrb[15].mxu1  ;;  %v5414_v53 = vadd.f32 %v4095_v21, %v5333_v27 }
 0x4a9   : > { %v1988_v50 = vpack.c.bf16 %v1872_v44, %v1871_v34  ;;  %v5417_v46 = vadd.f32 %v5333_v27, %v1969_v22  ;;  %v4437_v27 = vld [vmem:[%s6543_s13 + $0x10] sm:$0xff]  }
 0x4aa   : > { %v1987_v62 = vpack.c.bf16 %v1870_v40, %v1869_v45  ;;  %4150 = vmatprep.subr.bf16.mxu0 %v4437_v27  ;;  %v4440_v45 = vld [vmem:[%s6543_s13 + $0x28] sm:$0xff]  }
 0x4ab   : > { %4151 = vmatpush3.bf16.msra.mxu0 %v4437_v27 }
 0x4ac   : > { %4110 = vmatprep.mubr.msk.bf16.mxu0 %vm2004_vm14, %v1987_v62  ;;  %4152 = vmatprep.subr.bf16.mxu0 %v4438_v42 }
 0x4ad   : > { %4111 = vmatmul.mubr.msk.bf16.gmra.mrb[28].mxu0 %vm2004_vm14, %v1988_v50  ;;  %vm6670_vm14 = vcmp.eq.s32.totalorder %v4750_v17, %v4707_v6 }
 0x4af   : > { %4153 = vmatpush3.bf16.msra.mxu0 %v4438_v42 }
 0x4b0   : > { %4154 = vmatprep.subr.bf16.mxu0 %v4439_v32 }
 0x4b3   : > { %4155 = vmatpush3.bf16.msra.mxu0 %v4439_v32 }
 0x4b4   : > { %4156 = vmatprep.subr.bf16.mxu0 %v4440_v45 }
 0x4b7   : > { %4157 = vmatpush3.bf16.msra.mxu0 %v4440_v45 }
 0x4f0   : > { %v5429_v30 = vpop.f32.mrb[16].mxu1 }
 0x4f1   : > { %v5437_v0 = vpop.f32.mrb[17].mxu1 }
 0x4f2   : > { %v5439_v31 = vpop.f32.mrb[18].mxu1 }
 0x4f3   : > { %v5449_v34 = vpop.f32.mrb[19].mxu1 }
 0x4f8   : > { %v5456_v50 = vpop.f32.mrb[20].mxu1 }
 0x4f9   : > { %v5459_v41 = vpop.f32.mrb[21].mxu1 }
 0x4fa   : > { %v5468_v19 = vpop.f32.mrb[22].mxu1 }
 0x4fb   : > { %v5475_v28 = vpop.f32.mrb[23].mxu1 }
 0x506   : > { %v4348_v9 = vpop.permute.xlu1 %4347 }
 0x507   : > { %v4350_v5 = vunpack.i.h.bf16 %v4348_v9 }
 0x568   : > { %v4100_v33 = vpop.f32.mrb[16].mxu0 }
 0x569   : > { %v2072_v56 = vadd.f32 %v4100_v33, %v5447_v52  ;;  %v2063_v37 = vpop.f32.mrb[17].mxu0  ;;  %v5485_v33 = vpop.f32.mrb[24].mxu1 }
 0x56a   : > { %v4101_v54 = vpop.f32.mrb[18].mxu0  ;;  %v2064_v51 = vadd.f32 %v5447_v52, %v2063_v37  ;;  %v5488_v37 = vpop.f32.mrb[25].mxu1 }
 0x56b   : > { %v2075_v44 = vadd.f32 %v4101_v54, %v5447_v52  ;;  %v2066_v40 = vpop.f32.mrb[19].mxu0  ;;  %v5462_v48 = vadd.f32 %v2072_v56, %v5339_v59 }
 0x56c   : > { %v2067_v62 = vadd.f32 %v5447_v52, %v2066_v40  ;;  %v5478_v29 = vadd.f32 %v2064_v51, %v5345_v60 }
 0x56d   : > { %6641 = vst [vmem:[#allocation23_spill] sm:$0xff] %v5462_v48  ;;  %v5466_v63 = vadd.f32 %v2075_v44, %v5348_v18  ;;  %v5498_v44 = vpop.f32.mrb[26].mxu1 }
 0x56e   : > { %v5471_v20 = vadd.f32 %v2067_v62, %v5351_v57  ;;  %6644 = vst [vmem:[#allocation26_spill] sm:$0xff] %v5478_v29  ;;  %v5500_v40 = vpop.f32.mrb[27].mxu1 }
 0x56f   : > { %6642 = vst [vmem:[#allocation24_spill] sm:$0xff] %v5466_v63  ;;  %v4366_v21 = vpack.i.bf16 %v5466_v63, %v5462_v48 }
 0x570   : > { %6643 = vst [vmem:[#allocation25_spill] sm:$0xff] %v5471_v20  ;;  %v4104_v22 = vpop.f32.mrb[20].mxu0  ;;  %v4371_v32 = vpack.i.bf16 %v5471_v20, %v5478_v29 }
 0x571   : > { %v2088_v59 = vadd.f32 %v4104_v22, %v5447_v52  ;;  %4367 = vrot.lane.b32.xlu1 %v4366_v21, %s4553_s20  ;;  %v2079_v18 = vpop.f32.mrb[21].mxu0 }
 0x572   : > { %v4105_v27 = vpop.f32.mrb[22].mxu0  ;;  %v2080_v45 = vadd.f32 %v5447_v52, %v2079_v18 }
 0x573   : > { %v2091_v42 = vadd.f32 %v4105_v27, %v5447_v52  ;;  %v2082_v57 = vpop.f32.mrb[23].mxu0  ;;  %v5491_v60 = vadd.f32 %v2088_v59, %v5362_v49 }
 0x574   : > { %v2083_v56 = vadd.f32 %v5447_v52, %v2082_v57  ;;  %v5508_v49 = vadd.f32 %v2080_v45, %v5368_v36 }
 0x575   : > { %6645 = vst [vmem:[#allocation27_spill] sm:$0xff] %v5491_v60  ;;  %v5495_v54 = vadd.f32 %v2091_v42, %v5371_v23  ;;  %4372 = vrot.lane.b32.xlu1 %v4371_v32, %s4553_s20  ;;  %v5519_v32 = vpop.f32.mrb[28].mxu1 }
 0x576   : > { %v5503_v62 = vadd.f32 %v2083_v56, %v5375_v58  ;;  %6648 = vst [vmem:[#allocation30_spill] sm:$0xff] %v5508_v49  ;;  %v5525_v45 = vpop.f32.mrb[29].mxu1 }
 0x577   : > { %6646 = vst [vmem:[#allocation28_spill] sm:$0xff] %v5495_v54  ;;  %v4376_v51 = vpack.i.bf16 %v5495_v54, %v5491_v60 }
 0x578   : > { %6647 = vst [vmem:[#allocation29_spill] sm:$0xff] %v5503_v62  ;;  %v4108_v21 = vpop.f32.mrb[24].mxu0  ;;  %v4381_v57 = vpack.i.bf16 %v5503_v62, %v5508_v49 }
 0x579   : > { %v2104_v22 = vadd.f32 %v4108_v21, %v5447_v52  ;;  %v2095_v23 = vpop.f32.mrb[25].mxu0  ;;  %4377 = vrot.lane.b32.xlu1 %v4376_v51, %s4553_s20  ;;  %v5531_v21 = vpop.f32.mrb[30].mxu1 }
 0x57a   : > { %v2096_v59 = vadd.f32 %v5447_v52, %v2095_v23  ;;  %v4109_v18 = vpop.f32.mrb[26].mxu0  ;;  %v5536_v23 = vpop.f32.mrb[31].mxu1 }
 0x57b   : > { %v5514_v27 = vadd.f32 %v2104_v22, %v5392_v47  ;;  %v2107_v58 = vadd.f32 %v4109_v18, %v5447_v52  ;;  %v2098_v42 = vpop.f32.mrb[27].mxu0 }
 0x57c   : > { %v5522_v36 = vadd.f32 %v2096_v59, %v5395_v61  ;;  %v2099_v56 = vadd.f32 %v5447_v52, %v2098_v42 }
 0x57d   : > { %6649 = vst [vmem:[#allocation31_spill] sm:$0xff] %v5514_v27  ;;  %v5528_v51 = vadd.f32 %v2107_v58, %v5398_v55  ;;  %4382 = vrot.lane.b32.xlu1 %v4381_v57, %s4553_s20 }
 0x57e   : > { %6650 = vst [vmem:[#allocation32_spill] sm:$0xff] %v5522_v36  ;;  %v5534_v22 = vadd.f32 %v2099_v56, %v5401_v43 }
 0x57f   : > { %6651 = vst [vmem:[#allocation33_spill] sm:$0xff] %v5528_v51  ;;  %v4391_v59 = vpack.i.bf16 %v5528_v51, %v5514_v27 }
 0x580   : > { %6652 = vst [vmem:[#allocation34_spill] sm:$0xff] %v5534_v22  ;;  %v4112_v18 = vpop.f32.mrb[28].mxu0  ;;  %v4386_v42 = vpack.i.bf16 %v5534_v22, %v5522_v36 }
 0x581   : > { %v2120_v25 = vadd.f32 %v4112_v18, %v5447_v52  ;;  %v2111_v58 = vpop.f32.mrb[29].mxu0  ;;  %4392 = vrot.lane.b32.xlu1 %v4391_v59, %s4553_s20  ;;  %v6656_v59 = vpack.i.bf16 %v5401_v43, %v5395_v61  ;;  %v6659_v61 = vpack.i.bf16 %v5417_v46, %v5408_v35  ;;  %v6660_v43 = vpack.i.bf16 %v5414_v53, %v5411_v24 }
 0x582   : > { %v2112_v57 = vadd.f32 %v5447_v52, %v2111_v58  ;;  %v4113_v26 = vpop.f32.mrb[30].mxu0  ;;  %4387 = vrot.lane.b32.xlu0 %v4386_v42, %s4553_s20 }
 0x583   : > { %v5547_v56 = vadd.f32 %v2120_v25, %v5411_v24  ;;  %v2123_v38 = vadd.f32 %v4113_v26, %v5447_v52  ;;  %v2114_v39 = vpop.f32.mrb[31].mxu0  ;;  %v6658_v26 = vpack.i.bf16 %v5398_v55, %v5392_v47 }
 0x584   : > { %v5551_v51 = vadd.f32 %v2112_v57, %v5408_v35  ;;  %v2115_v22 = vadd.f32 %v5447_v52, %v2114_v39  ;;  %v6661_v39 = vlaneseq }
 0x585   : > { %6653 = vst [vmem:[#allocation35_spill] sm:$0xff] %v5547_v56  ;;  %v5555_v18 = vadd.f32 %v2123_v38, %v5414_v53  ;;  %4397 = vrot.lane.b32.xlu1 %v6656_v59, %s4552_s18 }
 0x586   : > { %6654 = vst [vmem:[#allocation36_spill] sm:$0xff] %v5551_v51  ;;  %v5562_v42 = vadd.f32 %v2115_v22, %v5417_v46  ;;  %v5583_v47 = vand.u32 127, %v6661_v39 }
 0x587   : > { %6655 = vst [vmem:[#allocation37_spill] sm:$0xff] %v5555_v18  ;;  %v4406_v38 = vpack.i.bf16 %v5555_v18, %v5547_v56 }
 0x588   : > { %6657 = vst [vmem:[#allocation38_spill] sm:$0xff] %v5562_v42  ;;  %v4411_v25 = vpack.i.bf16 %v5562_v42, %v5551_v51  ;;  %6662 = vst [vmem:[#allocation39_spill] sm:$0xff] %v5583_v47  ;;  %v5589_v55 = vsel %vm621_vm0, %v5583_v47, 4294967295  ;;  %v5596_v35 = vsel %vm623_vm2, %v5583_v47, 4294967295  ;;  %v5605_v53 = vsel %vm624_vm3, %v5583_v47, 4294967295 }
 0x589   : > { %4402 = vrot.lane.b32.xlu1 %v6658_v26, %s4552_s18  ;;  %v2757_v52 = vshra.s32 %v5589_v55, 16  ;;  %v2785_v24 = vshra.s32 %v5596_v35, 16  ;;  %v5611_v22 = vsel %vm622_vm1, %v5583_v47, 4294967295  ;;  %v2799_v57 = vshra.s32 %v5605_v53, 16 }
 0x58a   : > { %4412 = vrot.lane.b32.xlu0 %v4411_v25, %s4553_s20  ;;  %v2771_v59 = vshra.s32 %v5611_v22, 16  ;;  %v5622_v25 = vsel %vm625_vm4, %v5583_v47, 4294967295  ;;  %v5628_v26 = vsel %vm626_vm5, %v5583_v47, 4294967295  ;;  %v5661_v18 = vsel %vm6663_vm13, %v5583_v47, 4294967295 }
 0x58b   : > { %v5598_v46 = vcvt.s32.f32 %v2757_v52  ;;  %v5614_v58 = vcvt.s32.f32 %v2785_v24  ;;  %v2827_v39 = vshra.s32 %v5628_v26, 16  ;;  %v5641_v52 = vsel %vm627_vm6, %v5583_v47, 4294967295 }
 0x58c   : > { %v5647_v24 = vsel %vm628_vm7, %v5583_v47, 4294967295  ;;  %v5667_v56 = vsel %vm6664_vm11, %v5583_v47, 4294967295  ;;  %v5681_v60 = vsel %vm6665_vm15, %v5583_v47, 4294967295  ;;  %v5701_v11 = vsel %vm6667_vm8, %v5583_v47, 4294967295 }
 0x58d   : > { %4407 = vrot.lane.b32.xlu1 %v4406_v38, %s4553_s20  ;;  %v5631_v38 = vcvt.s32.f32 %v2799_v57  ;;  %v5654_v42 = vcvt.s32.f32 %v2827_v39  ;;  %v2855_v51 = vshra.s32 %v5647_v24, 16  ;;  %v2869_v39 = vshra.s32 %v5661_v18, 16 }
 0x58e   : > { %4417 = vrot.lane.b32.xlu0 %v6659_v61, %s4552_s18  ;;  %v5633_v61 = vcvt.s32.f32 %v2771_v59  ;;  %v2841_v59 = vshra.s32 %v5641_v52, 16  ;;  %v2883_v27 = vshra.s32 %v5667_v56, 16  ;;  %v5721_v10 = vsel %vm6669_vm10, %v5583_v47, 4294967295 }
 0x58f   : > { %v5674_v36 = vcvt.s32.f32 %v2855_v51  ;;  %v5690_v62 = vcvt.s32.f32 %v2869_v39  ;;  %v2897_v51 = vshra.s32 %v5681_v60, 16  ;;  %v5707_v39 = vsel %vm6668_vm9, %v5583_v47, 4294967295 }
 0x590   : > { %v5694_v49 = vcvt.s32.f32 %v2883_v27  ;;  %v2925_v27 = vshra.s32 %v5701_v11, 16  ;;  %v2939_v14 = vshra.s32 %v5707_v39, 16  ;;  %vm6596_vm13 = vcmask 261120  }
 0x591   : > { %4422 = vrot.lane.b32.xlu1 %v6660_v43, %s4552_s18  ;;  %v2813_v43 = vshra.s32 %v5622_v25, 16  ;;  %v5710_v13 = vcvt.s32.f32 %v2897_v51  ;;  %v5727_v51 = vsel %vm6670_vm14, %v5583_v47, 4294967295  ;;  %vm2424_vm11 = vcmask 523264  }
 0x592   : > { %v5730_v15 = vcvt.s32.f32 %v2925_v27  ;;  %v5734_v63 = vcvt.s32.f32 %v2939_v14  ;;  %v2967_v16 = vshra.s32 %v5727_v51, 16  ;;  %v4353_v27 = vpop.permute.xlu1 %4352  ;;  %vm2504_vm15 = vcmask 785408  }
 0x593   : > { %v5651_v57 = vcvt.s32.f32 %v2813_v43  ;;  %v5670_v43 = vcvt.s32.f32 %v2841_v59  ;;  %v5687_v59 = vsel %vm6666_vm12, %v5583_v47, 4294967295 }
 0x594   : > { %v2911_v12 = vshra.s32 %v5687_v59, 16  ;;  %6671 = vst [vmem:[#allocation40_spill] sm:$0xff] %v5734_v63  ;;  %v5741_v17 = vcvt.s32.f32 %v2967_v16 }
 0x596   : > { %v5714_v54 = vcvt.s32.f32 %v2911_v12  ;;  %v2953_v12 = vshra.s32 %v5721_v10, 16  ;;  %6673 = vst [vmem:[#allocation42_spill] sm:$0xff] %v5741_v17  ;;  %v4358_v8 = vpop.permute.xlu1 %4357 }
 0x598   : > { %v5738_v48 = vcvt.s32.f32 %v2953_v12  ;;  %v4349_v12 = vunpack.i.l.bf16 %v4348_v9 }
 0x59a   : > { %6672 = vst [vmem:[#allocation41_spill] sm:$0xff] %v5738_v48  ;;  %v4363_v29 = vpop.permute.xlu1 %4362 }
 0x5ad   : > { %2760 = vmax.xlane.f32.xlu0 %v5598_v46 }
 0x5b1   : > { %2788 = vmax.xlane.f32.xlu0 %v5614_v58 }
 0x5b5   : > { %2802 = vmax.xlane.f32.xlu0 %v5631_v38  ;;  %2774 = vmax.xlane.f32.xlu1 %v5633_v61 }
 0x5b9   : > { %2816 = vmax.xlane.f32.xlu0 %v5651_v57  ;;  %2830 = vmax.xlane.f32.xlu1 %v5654_v42 }
 0x5bd   : > { %2844 = vmax.xlane.f32.xlu0 %v5670_v43  ;;  %2858 = vmax.xlane.f32.xlu1 %v5674_v36 }
 0x5c1   : > { %2872 = vmax.xlane.f32.xlu0 %v5690_v62  ;;  %2886 = vmax.xlane.f32.xlu1 %v5694_v49 }
 0x5c5   : > { %2900 = vmax.xlane.f32.xlu0 %v5710_v13  ;;  %2914 = vmax.xlane.f32.xlu1 %v5714_v54 }
 0x5c9   : > { %2928 = vmax.xlane.f32.xlu0 %v5730_v15  ;;  %2942 = vmax.xlane.f32.xlu1 %v5734_v63  ;;  %v4354_v63 = vunpack.i.l.bf16 %v4353_v27 }
 0x5cd   : > { %2956 = vmax.xlane.f32.xlu0 %v5738_v48  ;;  %2970 = vmax.xlane.f32.xlu1 %v5741_v17  ;;  %v4355_v48 = vunpack.i.h.bf16 %v4353_v27 }
 0x5e3   : > { %v4368_v14 = vpop.permute.xlu1 %4367 }
 0x5e4   : > { %v4370_v20 = vunpack.i.h.bf16 %v4368_v14  ;;  %v4369_v7 = vunpack.i.l.bf16 %v4368_v14 }
 0x5e6   : > { %v2410_v4 = vsel %vm6596_vm13, %v5429_v30, %v4369_v7  ;;  %v2411_v16 = vsel %vm6596_vm13, %v5439_v31, %v4370_v20 }
 0x5e7   : > { %v2427_v3 = vsel %vm2424_vm11, %v2410_v4, %v4349_v12  ;;  %v2428_v2 = vsel %vm2424_vm11, %v2411_v16, %v4350_v5  ;;  %v4373_v6 = vpop.permute.xlu1 %4372  ;;  %v4365_v12 = vunpack.i.h.bf16 %v4363_v29 }
 0x5e8   : > { %v2442_v1 = vpack.c.bf16 %v2428_v2, %v2427_v3  ;;  %v4375_v47 = vunpack.i.h.bf16 %v4373_v6  ;;  %v4374_v17 = vunpack.i.l.bf16 %v4373_v6  ;;  %v4360_v2 = vunpack.i.h.bf16 %v4358_v8 }
 0x5e9   : > { %v4359_v3 = vunpack.i.l.bf16 %v4358_v8  ;;  %v4364_v8 = vunpack.i.l.bf16 %v4363_v29 }
 0x5ea   : > { %v2408_v14 = vsel %vm6596_vm13, %v5437_v0, %v4374_v17  ;;  %v2409_v9 = vsel %vm6596_vm13, %v5449_v34, %v4375_v47 }
 0x5eb   : > { %v2425_v7 = vsel %vm2424_vm11, %v2408_v14, %v4354_v63  ;;  %v2426_v30 = vsel %vm2424_vm11, %v2409_v9, %v4355_v48  ;;  %v4378_v31 = vpop.permute.xlu1 %4377 }
 0x5ec   : > { %v2441_v4 = vpack.c.bf16 %v2426_v30, %v2425_v7  ;;  %v4380_v5 = vunpack.i.h.bf16 %v4378_v31  ;;  %v4379_v20 = vunpack.i.l.bf16 %v4378_v31 }
 0x5ee   : > { %v2414_v6 = vsel %vm6596_vm13, %v5456_v50, %v4379_v20  ;;  %v2415_v17 = vsel %vm6596_vm13, %v5468_v19, %v4380_v5  ;;  %4158 = vmatprep.mubr.msk.bf16.mxu0 %vm2504_vm15, %v2441_v4 }
 0x5ef   : > { %v2431_v0 = vsel %vm2424_vm11, %v2414_v6, %v4359_v3  ;;  %v2432_v34 = vsel %vm2424_vm11, %v2415_v17, %v4360_v2  ;;  %v4383_v48 = vpop.permute.xlu1 %4382  ;;  %4159 = vmatmul.mubr.msk.bf16.vlgmr.msra.gmra.mrb[32].mxu0 %vm2504_vm15, %v2442_v1 }
 0x5f0   : > { %v2444_v63 = vpack.c.bf16 %v2432_v34, %v2431_v0  ;;  %v4385_v47 = vunpack.i.h.bf16 %v4383_v48  ;;  %v4384_v27 = vunpack.i.l.bf16 %v4383_v48 }
 0x5f2   : > { %v2412_v50 = vsel %vm6596_vm13, %v5459_v41, %v4384_v27  ;;  %v2413_v19 = vsel %vm6596_vm13, %v5475_v28, %v4385_v47 }
 0x5f3   : > { %v2429_v16 = vsel %vm2424_vm11, %v2412_v50, %v4364_v8  ;;  %v2430_v14 = vsel %vm2424_vm11, %v2413_v19, %v4365_v12  ;;  %v4393_v9 = vpop.permute.xlu1 %4392 }
 0x5f4   : > { %v2443_v7 = vpack.c.bf16 %v2430_v14, %v2429_v16  ;;  %v4388_v30 = vpop.permute.xlu0 %4387  ;;  %v4395_v41 = vunpack.i.h.bf16 %v4393_v9  ;;  %v4394_v20 = vunpack.i.l.bf16 %v4393_v9 }
 0x5f5   : > { %v4390_v31 = vunpack.i.h.bf16 %v4388_v30  ;;  %v4389_v1 = vunpack.i.l.bf16 %v4388_v30 }
 0x5f6   : > { %4162 = vmatprep.mubr.msk.bf16.mxu0 %vm2504_vm15, %v2443_v7  ;;  %v2419_v27 = vsel %vm6596_vm13, %v5498_v44, %v4395_v41 }
 0x5f7   : > { %v4398_v4 = vpop.permute.xlu1 %4397  ;;  %4163 = vmatmul.mubr.msk.bf16.gmra.mrb[36].mxu0 %vm2504_vm15, %v2444_v63  ;;  %v2416_v28 = vsel %vm6596_vm13, %v5488_v37, %v4389_v1  ;;  %v2417_v2 = vsel %vm6596_vm13, %v5500_v40, %v4390_v31  ;;  %v2418_v63 = vsel %vm6596_vm13, %v5485_v33, %v4394_v20 }
 0x5f8   : > { %v4400_v29 = vunpack.i.h.bf16 %v4398_v4  ;;  %v4399_v5 = vunpack.i.l.bf16 %v4398_v4 }
 0x5fa   : > { %v2434_v3 = vsel %vm2424_vm11, %v2417_v2, %v4400_v29  ;;  %v2433_v6 = vsel %vm2424_vm11, %v2416_v28, %v4399_v5 }
 0x5fb   : > { %v2445_v17 = vpack.c.bf16 %v2434_v3, %v2433_v6  ;;  %v4403_v0 = vpop.permute.xlu1 %4402  ;;  %v2756_v3 = vand.u32 65535, %v5589_v55 }
 0x5fc   : > { %v4405_v34 = vunpack.i.h.bf16 %v4403_v0  ;;  %v4404_v48 = vunpack.i.l.bf16 %v4403_v0  ;;  %v4413_v47 = vpop.permute.xlu0 %4412 }
 0x5fd   : > { %4166 = vmatprep.mubr.msk.bf16.mxu0 %vm2504_vm15, %v2445_v17  ;;  %v4415_v12 = vunpack.i.h.bf16 %v4413_v47  ;;  %v4414_v8 = vunpack.i.l.bf16 %v4413_v47  ;;  %v2758_v6 = vcvt.s32.f32 %v2756_v3  ;;  %v2784_v17 = vand.u32 65535, %v5596_v35 }
 0x5fe   : > { %v2435_v37 = vsel %vm2424_vm11, %v2418_v63, %v4404_v48  ;;  %v2436_v40 = vsel %vm2424_vm11, %v2419_v27, %v4405_v34  ;;  %v2770_v34 = vand.u32 65535, %v5611_v22  ;;  %v2798_v47 = vand.u32 65535, %v5605_v53 }
 0x5ff   : > { %v2446_v50 = vpack.c.bf16 %v2436_v40, %v2435_v37  ;;  %v4408_v19 = vpop.permute.xlu1 %4407  ;;  %v2420_v33 = vsel %vm6596_vm13, %v5525_v45, %v4414_v8  ;;  %v2421_v44 = vsel %vm6596_vm13, %v5536_v23, %v4415_v12  ;;  %v2812_v35 = vand.u32 65535, %v5622_v25 }
 0x600   : > { %v4418_v16 = vpop.permute.xlu0 %4417  ;;  %v4410_v14 = vunpack.i.h.bf16 %v4408_v19  ;;  %v4409_v9 = vunpack.i.l.bf16 %v4408_v19  ;;  %v2772_v63 = vcvt.s32.f32 %v2770_v34  ;;  %v2800_v37 = vcvt.s32.f32 %v2798_v47 }
 0x601   : > { %v4420_v7 = vunpack.i.h.bf16 %v4418_v16  ;;  %v4419_v30 = vunpack.i.l.bf16 %v4418_v16  ;;  %4167 = vmatmul.mubr.msk.bf16.gmra.mrb[40].mxu0 %vm2504_vm15, %v2446_v50  ;;  %v2826_v22 = vand.u32 65535, %v5628_v26  ;;  %v2840_v40 = vand.u32 65535, %v5641_v52 }
 0x602   : > { %v2423_v20 = vsel %vm6596_vm13, %v5531_v21, %v4410_v14  ;;  %v2422_v28 = vsel %vm6596_vm13, %v5519_v32, %v4409_v9  ;;  %v2786_v21 = vcvt.s32.f32 %v2784_v17  ;;  %v2854_v19 = vand.u32 65535, %v5647_v24 }
 0x603   : > { %v2437_v31 = vsel %vm2424_vm11, %v2420_v33, %v4419_v30  ;;  %v2438_v1 = vsel %vm2424_vm11, %v2421_v44, %v4420_v7  ;;  %v4423_v4 = vpop.permute.xlu1 %4422  ;;  %v2828_v50 = vcvt.s32.f32 %v2826_v22  ;;  %v2882_v24 = vand.u32 65535, %v5667_v56 }
 0x604   : > { %v2447_v29 = vpack.c.bf16 %v2438_v1, %v2437_v31  ;;  %v4425_v5 = vunpack.i.h.bf16 %v4423_v4  ;;  %v4424_v41 = vunpack.i.l.bf16 %v4423_v4  ;;  %v2856_v9 = vcvt.s32.f32 %v2854_v19 }
 0x605   : > { %v2884_v44 = vcvt.s32.f32 %v2882_v24  ;;  %v2910_v56 = vand.u32 65535, %v5687_v59  ;;  %v2938_v59 = vand.u32 65535, %v5707_v39  ;;  %v2966_v39 = vand.u32 65535, %v5727_v51  ;;  %v6676_v51 = vld [vmem:[#allocation42_spill] sm:$0xff] }
 0x606   : > { %v2439_v2 = vsel %vm2424_vm11, %v2422_v28, %v4424_v41  ;;  %v2440_v45 = vsel %vm2424_vm11, %v2423_v20, %v4425_v5  ;;  %4170 = vmatprep.mubr.msk.bf16.mxu0 %vm2504_vm15, %v2447_v29 }
 0x607   : > { %v2448_v23 = vpack.c.bf16 %v2440_v45, %v2439_v2  ;;  %v2912_v29 = vcvt.s32.f32 %v2910_v56  ;;  %v2940_v28 = vcvt.s32.f32 %v2938_v59  ;;  %v2968_v3 = vcvt.s32.f32 %v2966_v39 }
 0x609   : > { %4171 = vmatmul.mubr.msk.bf16.gmra.mrb[44].mxu0 %vm2504_vm15, %v2448_v23 }
 0x63a   : > { %v5803_v0 = vpop.xlane.xlu0 %2760 }
 0x63b   : > { %vm2762_vm12 = vcmp.eq.f32.partialorder %v5598_v46, %v5803_v0 }
 0x63c   : > { %v2763_v32 = vsel %vm2762_vm12, %v2758_v6, -inf  ;;  %v6675_v6 = vld [vmem:[#allocation41_spill] sm:$0xff] }
 0x63d   : > { %2764 = vmax.xlane.f32.xlu0 %v2763_v32  ;;  %v5884_v32 = vld [vmem:[%s6544_s14] ss:$0 sm:$0xff] }
 0x63e   : > { %v5808_v48 = vpop.xlane.xlu0 %2788 }
 0x63f   : > { %vm2790_vm8 = vcmp.eq.f32.partialorder %v5614_v58, %v5808_v48  ;;  %v2814_v58 = vcvt.s32.f32 %v2812_v35 }
 0x640   : > { %v2791_v55 = vsel %vm2790_vm8, %v2786_v21, -inf }
 0x641   : > { %2792 = vmax.xlane.f32.xlu0 %v2791_v55 }
 0x642   : > { %v5814_v27 = vpop.xlane.xlu0 %2802  ;;  %v5816_v46 = vpop.xlane.xlu1 %2774 }
 0x643   : > { %vm2776_vm9 = vcmp.eq.f32.partialorder %v5633_v61, %v5816_v46  ;;  %vm2804_vm10 = vcmp.eq.f32.partialorder %v5631_v38, %v5814_v27  ;;  %v2842_v38 = vcvt.s32.f32 %v2840_v40  ;;  %v2868_v61 = vand.u32 65535, %v5661_v18 }
 0x644   : > { %v2777_v53 = vsel %vm2776_vm9, %v2772_v63, -inf  ;;  %v2805_v12 = vsel %vm2804_vm10, %v2800_v37, -inf  ;;  %v2896_v18 = vand.u32 65535, %v5681_v60  ;;  %v2924_v60 = vand.u32 65535, %v5701_v11 }
 0x645   : > { %2778 = vmax.xlane.f32.xlu1 %v2777_v53  ;;  %v2952_v11 = vand.u32 65535, %v5721_v10  ;;  %v2767_v40 = vcvt.f32.s32 %v5803_v0  ;;  %v2809_v19 = vcvt.f32.s32 %v5814_v27 }
 0x646   : > { %v5824_v25 = vpop.xlane.xlu0 %2816  ;;  %v5826_v8 = vpop.xlane.xlu1 %2830 }
 0x647   : > { %vm2818_vm14 = vcmp.eq.f32.partialorder %v5651_v57, %v5824_v25  ;;  %vm2832_vm11 = vcmp.eq.f32.partialorder %v5654_v42, %v5826_v8  ;;  %v2870_v57 = vcvt.s32.f32 %v2868_v61  ;;  %v2954_v2 = vcvt.s32.f32 %v2952_v11 }
 0x648   : > { %v2819_v26 = vsel %vm2818_vm14, %v2814_v58, -inf  ;;  %v2833_v16 = vsel %vm2832_vm11, %v2828_v50, -inf  ;;  %v5895_v0 = vshll.u32 %v2809_v19, 16 }
 0x649   : > { %2820 = vmax.xlane.f32.xlu0 %v2819_v26  ;;  %2806 = vmax.xlane.f32.xlu1 %v2805_v12  ;;  %v2795_v12 = vcvt.f32.s32 %v5808_v48  ;;  %v2823_v48 = vcvt.f32.s32 %v5824_v25 }
 0x64a   : > { %v5834_v52 = vpop.xlane.xlu0 %2844  ;;  %v5836_v14 = vpop.xlane.xlu1 %2858 }
 0x64b   : > { %vm2846_vm15 = vcmp.eq.f32.partialorder %v5670_v43, %v5834_v52  ;;  %vm2860_vm12 = vcmp.eq.f32.partialorder %v5674_v36, %v5836_v14  ;;  %v2898_v43 = vcvt.s32.f32 %v2896_v18  ;;  %v2796_v24 = vshll.u32 %v2795_v12, 16 }
 0x64c   : > { %v2847_v42 = vsel %vm2846_vm15, %v2842_v38, -inf  ;;  %v2861_v30 = vsel %vm2860_vm12, %v2856_v9, -inf  ;;  %v2781_v38 = vcvt.f32.s32 %v5816_v46  ;;  %v2768_v9 = vshll.u32 %v2767_v40, 16 }
 0x64d   : > { %2848 = vmax.xlane.f32.xlu0 %v2847_v42  ;;  %2834 = vmax.xlane.f32.xlu1 %v2833_v16  ;;  %v2837_v46 = vcvt.f32.s32 %v5826_v8  ;;  %v2824_v39 = vshll.u32 %v2823_v48, 16 }
 0x64e   : > { %v5844_v7 = vpop.xlane.xlu0 %2872  ;;  %v5846_v33 = vpop.xlane.xlu1 %2886 }
 0x64f   : > { %vm2874_vm8 = vcmp.eq.f32.partialorder %v5690_v62, %v5844_v7  ;;  %vm2888_vm9 = vcmp.eq.f32.partialorder %v5694_v49, %v5846_v33  ;;  %v2926_v49 = vcvt.s32.f32 %v2924_v60  ;;  %v2782_v60 = vshll.u32 %v2781_v38, 16 }
 0x650   : > { %v2875_v36 = vsel %vm2874_vm8, %v2870_v57, -inf  ;;  %v2889_v1 = vsel %vm2888_vm9, %v2884_v44, -inf  ;;  %v2851_v44 = vcvt.f32.s32 %v5834_v52  ;;  %v2879_v25 = vcvt.f32.s32 %v5844_v7 }
 0x651   : > { %2876 = vmax.xlane.f32.xlu0 %v2875_v36  ;;  %2862 = vmax.xlane.f32.xlu1 %v2861_v30 }
 0x652   : > { %v5854_v31 = vpop.xlane.xlu0 %2900  ;;  %v5856_v4 = vpop.xlane.xlu1 %2914 }
 0x653   : > { %vm2902_vm10 = vcmp.eq.f32.partialorder %v5710_v13, %v5854_v31  ;;  %vm2916_vm14 = vcmp.eq.f32.partialorder %v5714_v54, %v5856_v4  ;;  %v6674_v13 = vld [vmem:[#allocation40_spill] sm:$0xff]  ;;  %v2907_v7 = vcvt.f32.s32 %v5854_v31 }
 0x654   : > { %v2903_v62 = vsel %vm2902_vm10, %v2898_v43, -inf  ;;  %v2917_v41 = vsel %vm2916_vm14, %v2912_v29, -inf }
 0x655   : > { %2904 = vmax.xlane.f32.xlu0 %v2903_v62  ;;  %2890 = vmax.xlane.f32.xlu1 %v2889_v1  ;;  %v2865_v1 = vcvt.f32.s32 %v5836_v14  ;;  %v5910_v14 = vshll.u32 %v2837_v46, 16 }
 0x656   : > { %v5864_v5 = vpop.xlane.xlu0 %2928  ;;  %v5866_v20 = vpop.xlane.xlu1 %2942 }
 0x657   : > { %vm2930_vm11 = vcmp.eq.f32.partialorder %v5730_v15, %v5864_v5  ;;  %vm2944_vm15 = vcmp.eq.f32.partialorder %v6674_v13, %v5866_v20  ;;  %v5908_v13 = vshll.u32 %v2851_v44, 16 }
 0x658   : > { %v2931_v54 = vsel %vm2930_vm11, %v2926_v49, -inf  ;;  %v2945_v45 = vsel %vm2944_vm15, %v2940_v28, -inf  ;;  %v2893_v49 = vcvt.f32.s32 %v5846_v33 }
 0x659   : > { %2932 = vmax.xlane.f32.xlu0 %v2931_v54  ;;  %2918 = vmax.xlane.f32.xlu1 %v2917_v41 }
 0x65a   : > { %v5873_v10 = vpop.xlane.xlu0 %2956  ;;  %v5875_v23 = vpop.xlane.xlu1 %2970 }
 0x65b   : > { %vm2958_vm12 = vcmp.eq.f32.partialorder %v6675_v6, %v5873_v10  ;;  %vm2972_vm8 = vcmp.eq.f32.partialorder %v6676_v51, %v5875_v23  ;;  %v5915_v6 = vshll.u32 %v2879_v25, 16  ;;  %v5917_v51 = vshll.u32 %v2893_v49, 16 }
 0x65c   : > { %v2959_v15 = vsel %vm2958_vm12, %v2954_v2, -inf  ;;  %v2973_v17 = vsel %vm2972_vm8, %v2968_v3, -inf  ;;  %v5912_v2 = vshll.u32 %v2865_v1, 16 }
 0x65d   : > { %2960 = vmax.xlane.f32.xlu0 %v2959_v15  ;;  %2946 = vmax.xlane.f32.xlu1 %v2945_v45 }
 0x661   : > { %2974 = vmax.xlane.f32.xlu1 %v2973_v17 }
 0x6c2   : > { %v4160_v21 = vpop.f32.mrb[32].mxu0 }
 0x6c3   : > { %v2572_v34 = vadd.f32 %v4160_v21, %v5884_v32  ;;  %v2563_v47 = vpop.f32.mrb[33].mxu0 }
 0x6c4   : > { %v2564_v55 = vadd.f32 %v5884_v32, %v2563_v47  ;;  %v4161_v63 = vpop.f32.mrb[34].mxu0 }
 0x6c5   : > { %v3738_v35 = vmul.f32 -1.442695, %v2572_v34  ;;  %v2575_v37 = vadd.f32 %v4161_v63, %v5884_v32  ;;  %v2566_v22 = vpop.f32.mrb[35].mxu0  ;;  %v2921_v34 = vcvt.f32.s32 %v5856_v4 }
 0x6c6   : > { %v3736_v53 = vmul.f32 -1.442695, %v2564_v55  ;;  %v2567_v58 = vadd.f32 %v5884_v32, %v2566_v22  ;;  %v6677_v55 = vld [vmem:[#allocation39_spill] sm:$0xff] }
 0x6c7   : > { %4441 = vpow2.f32 %v3738_v35  ;;  %v3739_v50 = vmul.f32 -1.442695, %v2575_v37 }
 0x6c8   : > { %4443 = vpow2.f32 %v3736_v53  ;;  %v3737_v26 = vmul.f32 -1.442695, %v2567_v58  ;;  %v5927_v58 = vshll.u32 %v2907_v7, 16 }
 0x6c9   : > { %4445 = vpow2.f32 %v3739_v50 }
 0x6ca   : > { %4447 = vpow2.f32 %v3737_v26  ;;  %v2765_v61 = vpop.xlane.xlu0 %2764  ;;  %v4164_v16 = vpop.f32.mrb[36].mxu0 }
 0x6cb   : > { %v2588_v42 = vadd.f32 %v4164_v16, %v5884_v32  ;;  %v2579_v57 = vpop.f32.mrb[37].mxu0  ;;  %v2766_v18 = vcvt.f32.s32 %v2765_v61  ;;  %v6679_v61 = vld [vmem:[#allocation11_spill] sm:$0xff] }
 0x6cc   : > { %v2580_v27 = vadd.f32 %v5884_v32, %v2579_v57  ;;  %v4165_v30 = vpop.f32.mrb[38].mxu0 }
 0x6cd   : > { %v3742_v56 = vmul.f32 -1.442695, %v2588_v42  ;;  %v2591_v36 = vadd.f32 %v4165_v30, %v5884_v32  ;;  %v2582_v43 = vpop.f32.mrb[39].mxu0  ;;  %v5906_v52 = vadd.s32 %v2768_v9, %v2766_v18 }
 0x6ce   : > { %v3740_v29 = vmul.f32 -1.442695, %v2580_v27  ;;  %v2583_v59 = vadd.f32 %v5884_v32, %v2582_v43  ;;  %v2793_v62 = vpop.xlane.xlu0 %2792 }
 0x6cf   : > { %4449 = vpow2.f32 %v3742_v56  ;;  %v3743_v11 = vmul.f32 -1.442695, %v2591_v36  ;;  %v2794_v41 = vcvt.f32.s32 %v2793_v62  ;;  %vm2980_vm9 = vcmp.eq.s32.totalorder %v6677_v55, %v5906_v52 }
 0x6d0   : > { %4451 = vpow2.f32 %v3740_v29  ;;  %v3741_v8 = vmul.f32 -1.442695, %v2583_v59  ;;  %vm5938_vm14 = vmand %vm621_vm0, %vm2980_vm9 }
 0x6d1   : > { %v4442_v28 = vpop.eup %4441  ;;  %4453 = vpow2.f32 %v3743_v11  ;;  %v5922_v63 = vadd.s32 %v2796_v24, %v2794_v41 }
 0x6d2   : > { %v4444_v54 = vpop.eup %4443  ;;  %v2676_v33 = vadd.f32 1.0, %v4442_v28  ;;  %4455 = vpow2.f32 %v3741_v8  ;;  %v2779_v45 = vpop.xlane.xlu1 %2778  ;;  %v2963_v8 = vcvt.f32.s32 %v5873_v10  ;;  %v6747_v10 = vld [vmem:[#allocation22_spill] sm:$0xff] }
 0x6d3   : > { %v4446_v3 = vpop.eup %4445  ;;  %v2674_v15 = vadd.f32 1.0, %v4444_v54  ;;  %v2780_v17 = vcvt.f32.s32 %v2779_v45  ;;  %vm2982_vm15 = vcmp.eq.s32.totalorder %v6677_v55, %v5922_v63 }
 0x6d4   : > { %v4448_v21 = vpop.eup %4447  ;;  %v2677_v47 = vadd.f32 1.0, %v4446_v3  ;;  %v4168_v31 = vpop.f32.mrb[40].mxu0  ;;  %4457 = vrcp.f32 %v2676_v33  ;;  %vm5965_vm12 = vmand %vm623_vm2, %vm2982_vm15 }
 0x6d5   : > { %v2675_v35 = vadd.f32 1.0, %v4448_v21  ;;  %v5924_v37 = vadd.s32 %v2782_v60, %v2780_v17  ;;  %v2604_v22 = vadd.f32 %v4168_v31, %v5884_v32  ;;  %v2595_v53 = vpop.f32.mrb[41].mxu0  ;;  %4459 = vrcp.f32 %v2674_v15 }
 0x6d6   : > { %v2596_v40 = vadd.f32 %v5884_v32, %v2595_v53  ;;  %v2821_v4 = vpop.xlane.xlu0 %2820  ;;  %v2807_v12 = vpop.xlane.xlu1 %2806  ;;  %v4554_v60 = vmov 1.0|1.0   ;;  %v5982_v15 = vshll.u32 %v2921_v34, 16 }
 0x6d7   : > { %4461 = vrcp.f32 %v2675_v35  ;;  %vm2981_vm10 = vcmp.eq.s32.totalorder %v6677_v55, %v5924_v37  ;;  %v3746_v50 = vmul.f32 -1.442695, %v2604_v22  ;;  %v2822_v19 = vcvt.f32.s32 %v2821_v4  ;;  %v4169_v26 = vpop.f32.mrb[42].mxu0 }
 0x6d8   : > { %4463 = vrcp.f32 %v2677_v47  ;;  %v3744_v9 = vmul.f32 -1.442695, %v2596_v40  ;;  %v2808_v24 = vcvt.f32.s32 %v2807_v12  ;;  %v2607_v42 = vadd.f32 %v4169_v26, %v5884_v32  ;;  %v2598_v57 = vpop.f32.mrb[43].mxu0  ;;  %vm2997_vm11 = vmand %vm622_vm1, %vm2981_vm10 }
 0x6d9   : > { %v4450_v18 = vpop.eup %4449  ;;  %4465 = vpow2.f32 %v3746_v50  ;;  %v5948_v27 = vadd.s32 %v2824_v39, %v2822_v19  ;;  %v2599_v30 = vadd.f32 %v5884_v32, %v2598_v57  ;;  %vm3768_vm0 = vmpackc.low %vm2997_vm11, %vm5938_vm14  ;;  %v2935_v57 = vcvt.f32.s32 %v5864_v5 }
 0x6da   : > { %v4452_v44 = vpop.eup %4451  ;;  %v2680_v46 = vadd.f32 1.0, %v4450_v18  ;;  %4467 = vpow2.f32 %v3744_v9  ;;  %v5954_v56 = vadd.s32 %v5895_v0, %v2808_v24  ;;  %v3747_v36 = vmul.f32 -1.442695, %v2607_v42  ;;  %v2849_v43 = vpop.xlane.xlu0 %2848  ;;  %4190 = vmatprep.mubr.msk.bf16.mxu1 %vm3768_vm0, %v4554_v60  ;;  %v6710_v9 = vld [vmem:[#allocation16_spill] sm:$0xff] }
 0x6db   : > { %v2835_v1 = vpop.xlane.xlu1 %2834  ;;  %v4454_v29 = vpop.eup %4453  ;;  %v2678_v59 = vadd.f32 1.0, %v4452_v44  ;;  %vm2984_vm1 = vcmp.eq.s32.totalorder %v6677_v55, %v5948_v27  ;;  %v3745_v62 = vmul.f32 -1.442695, %v2599_v30  ;;  %v2850_v25 = vcvt.f32.s32 %v2849_v43  ;;  %v6695_v30 = vld [vmem:[#allocation25_spill] sm:$0xff]  ;;  %v6696_v43 = vld [vmem:[#allocation26_spill] sm:$0xff] }
 0x6dc   : > { %v4456_v49 = vpop.eup %4455  ;;  %4469 = vrcp.f32 %v2680_v46  ;;  %v2681_v11 = vadd.f32 1.0, %v4454_v29  ;;  %vm2983_vm8 = vcmp.eq.s32.totalorder %v6677_v55, %v5954_v56  ;;  %v2836_v41 = vcvt.f32.s32 %v2835_v1  ;;  %v4172_v28 = vpop.f32.mrb[44].mxu0  ;;  %vm6002_vm14 = vmand %vm625_vm4, %vm2984_vm1 }
 0x6dd   : > { %4471 = vrcp.f32 %v2678_v59  ;;  %v2679_v39 = vadd.f32 1.0, %v4456_v49  ;;  %vm5974_vm9 = vmand %vm624_vm3, %vm2983_vm8  ;;  %v5979_v33 = vadd.s32 %v5908_v13, %v2850_v25  ;;  %v2620_v45 = vadd.f32 %v4172_v28, %v5884_v32  ;;  %v2611_v3 = vpop.f32.mrb[45].mxu0  ;;  %v6749_v25 = vld [vmem:[#allocation21_spill] sm:$0xff] }
 0x6de   : > { %4473 = vrcp.f32 %v2681_v11  ;;  %v5989_v17 = vadd.s32 %v5910_v14, %v2836_v41  ;;  %v2612_v21 = vadd.f32 %v5884_v32, %v2611_v3  ;;  %v2877_v47 = vpop.xlane.xlu0 %2876  ;;  %v4458_v13 = vpop.eup %4457  ;;  %v2949_v46 = vcvt.f32.s32 %v5866_v20  ;;  %v6703_v3 = vld [vmem:[#allocation23_spill] sm:$0xff]  ;;  %v6721_v11 = vld [vmem:[#allocation18_spill] sm:$0xff] }
 0x6df   : > { %v2863_v31 = vpop.xlane.xlu1 %2862  ;;  %4475 = vrcp.f32 %v2679_v39  ;;  %vm2986_vm3 = vcmp.eq.s32.totalorder %v6677_v55, %v5979_v33  ;;  %v3750_v34 = vmul.f32 -1.442695, %v2620_v45  ;;  %v2878_v35 = vcvt.f32.s32 %v2877_v47  ;;  %v4173_v22 = vpop.f32.mrb[46].mxu0  ;;  %v6704_v47 = vld [vmem:[#allocation24_spill] sm:$0xff] }
 0x6e0   : > { %v4460_v53 = vpop.eup %4459  ;;  %4477 = vpow2.f32 %v3747_v36  ;;  %vm2985_vm10 = vcmp.eq.s32.totalorder %v6677_v55, %v5989_v17  ;;  %v3748_v40 = vmul.f32 -1.442695, %v2612_v21  ;;  %v2864_v14 = vcvt.f32.s32 %v2863_v31  ;;  %v2614_v4 = vpop.f32.mrb[47].mxu0  ;;  %vm6037_vm15 = vmand %vm627_vm6, %vm2986_vm3 }
 0x6e1   : > { %v4462_v19 = vpop.eup %4461  ;;  %4479 = vpow2.f32 %v3745_v62  ;;  %v6007_v26 = vadd.s32 %v5915_v6, %v2878_v35  ;;  %v2623_v38 = vadd.f32 %v4173_v22, %v5884_v32  ;;  %v2615_v16 = vadd.f32 %v5884_v32, %v2614_v4  ;;  %vm6014_vm11 = vmand %vm626_vm5, %vm2985_vm10 }
 0x6e2   : > { %v4464_v42 = vpop.eup %4463  ;;  %4481 = vpow2.f32 %v3750_v34  ;;  %v6020_v48 = vadd.s32 %v5912_v2, %v2864_v14  ;;  %v2905_v6 = vpop.xlane.xlu0 %2904  ;;  %v2723_v44 = vmul.f32 %v4462_v19, %v6695_v30  ;;  %v2722_v5 = vmul.f32 %v4460_v53, %v6696_v43  ;;  %v3175_v14 = vld [vmem:[#allocation5 + $0x10] sm:$0xff] }
 0x6e3   : > { %v2891_v18 = vpop.xlane.xlu1 %2890  ;;  %v4466_v32 = vpop.eup %4465  ;;  %4483 = vpow2.f32 %v3748_v40  ;;  %v3751_v36 = vmul.f32 -1.442695, %v2623_v38  ;;  %v3749_v2 = vmul.f32 -1.442695, %v2615_v16  ;;  %v2906_v29 = vcvt.f32.s32 %v2905_v6  ;;  %v6709_v38 = vld [vmem:[#allocation28_spill] sm:$0xff] }
 0x6e4   : > { %v4468_v1 = vpop.eup %4467  ;;  %vm2987_vm5 = vcmp.eq.s32.totalorder %v6677_v55, %v6020_v48  ;;  %v2892_v59 = vcvt.f32.s32 %v2891_v18  ;;  %v2684_v20 = vadd.f32 1.0, %v4466_v32  ;;  %vm2988_vm0 = vcmp.eq.s32.totalorder %v6677_v55, %v6007_v26  ;;  %v6714_v18 = vld [vmem:[#allocation30_spill] sm:$0xff] }
 0x6e5   : > { %4485 = vpow2.f32 %v3751_v36  ;;  %v3052_v49 = vpack.c.bf16 %v2723_v44, %v2722_v5  ;;  %vm6046_vm1 = vmand %vm628_vm7, %vm2987_vm5  ;;  %v6051_v28 = vadd.s32 %v5927_v58, %v2906_v29  ;;  %v2724_v21 = vmul.f32 %v4458_v13, %v6703_v3  ;;  %v6705_v13 = vld [vmem:[#allocation15_spill] sm:$0xff]  ;;  %v6715_v44 = vld [vmem:[#allocation29_spill] sm:$0xff] }
 0x6e6   : > { %v4470_v41 = vpop.eup %4469  ;;  %v6054_v39 = vadd.s32 %v5917_v51, %v2892_v59  ;;  %v2933_v54 = vpop.xlane.xlu0 %2932  ;;  %v2725_v31 = vmul.f32 %v4464_v42, %v6704_v47  ;;  %v2936_v35 = vshll.u32 %v2935_v57, 16  ;;  %v2682_v22 = vadd.f32 1.0, %v4468_v1  ;;  %v6716_v36 = vld [vmem:[#allocation27_spill] sm:$0xff]  ;;  %v3173_v42 = vld [vmem:[#allocation5] sm:$0xff] }
 0x6e7   : > { %v2919_v45 = vpop.xlane.xlu1 %2918  ;;  %v4472_v34 = vpop.eup %4471  ;;  %v2934_v53 = vcvt.f32.s32 %v2933_v54  ;;  %4174 = vmatprep.subr.bf16.mxu1 %v3052_v49  ;;  %4487 = vpow2.f32 %v3749_v2  ;;  %vm2990_vm7 = vcmp.eq.s32.totalorder %v6677_v55, %v6051_v28  ;;  %vm6706_vm3 = vcmp.eq.s32.totalorder %v6705_v13, %v6679_v61  ;;  %v6717_v2 = vld [vmem:[#allocation17_spill] sm:$0xff] }
 0x6e8   : > { %v2920_v58 = vcvt.f32.s32 %v2919_v45  ;;  %v4474_v40 = vpop.eup %4473  ;;  %vm2989_vm8 = vcmp.eq.s32.totalorder %v6677_v55, %v6054_v39  ;;  %4175 = vmatpush3.bf16.msra.mxu1 %v3052_v49  ;;  %v3053_v51 = vpack.c.bf16 %v2725_v31, %v2724_v21  ;;  %vm6072_vm10 = vmand %vm6706_vm3, %vm2988_vm0  ;;  %vm6711_vm5 = vcmp.eq.s32.totalorder %v6710_v9, %v6679_v61 }
 0x6e9   : > { %v4476_v4 = vpop.eup %4475  ;;  %v6076_v12 = vadd.s32 %v2936_v35, %v2934_v53  ;;  %v2729_v16 = vmul.f32 %v4474_v40, %v6709_v38  ;;  %vm6085_vm13 = vmand %vm6711_vm5, %vm2989_vm8  ;;  %4489 = vrcp.f32 %v2684_v20  ;;  %v2726_v30 = vmul.f32 %v4472_v34, %v6714_v18  ;;  %v6725_v34 = vld [vmem:[#allocation19_spill] sm:$0xff]  ;;  %v6735_v18 = vld [vmem:[#allocation32_spill] sm:$0xff] }
 0x6ea   : > { %v6079_v19 = vadd.s32 %v5982_v15, %v2920_v58  ;;  %v4478_v57 = vpop.eup %4477  ;;  %4176 = vmatprep.subr.bf16.mxu1 %v3053_v51  ;;  %v2727_v32 = vmul.f32 %v4476_v4, %v6715_v44  ;;  %v2728_v15 = vmul.f32 %v4470_v41, %v6716_v36  ;;  %v2950_v5 = vshll.u32 %v2949_v46, 16  ;;  %v6736_v44 = vld [vmem:[#allocation34_spill] sm:$0xff]  ;;  %v3176_v41 = vld [vmem:[#allocation5 + $0x18] sm:$0xff] }
 0x6eb   : > { %v2947_v6 = vpop.xlane.xlu1 %2946  ;;  %v4480_v43 = vpop.eup %4479  ;;  %4491 = vrcp.f32 %v2682_v22  ;;  %v2685_v1 = vadd.f32 1.0, %v4478_v57  ;;  %vm6718_vm3 = vcmp.eq.s32.totalorder %v6717_v2, %v6679_v61  ;;  %v6719_v29 = vmov 0  ;;  %v6729_v22 = vld [vmem:[#allocation20_spill] sm:$0xff]  ;;  %v6734_v57 = vld [vmem:[#allocation33_spill] sm:$0xff]  ;;  %v6737_v2 = vld [vmem:[#allocation35_spill] sm:$0xff] }
 0x6ec   : > { %vm2991_vm8 = vcmp.eq.s32.totalorder %v6677_v55, %v6079_v19  ;;  %vm6104_vm5 = vmand %vm6718_vm3, %vm2990_vm7  ;;  %v4482_v59 = vpop.eup %4481  ;;  %v2683_v62 = vadd.f32 1.0, %v4480_v43  ;;  %v2948_v20 = vcvt.f32.s32 %v2947_v6  ;;  %4177 = vmatpush3.bf16.msra.mxu1 %v3053_v51  ;;  %v3054_v46 = vpack.c.bf16 %v2727_v32, %v2726_v30 }
 0x6ed   : > { %v6720_v29 = vsel %vm6104_vm5, 4294967295, %v6719_v29  ;;  %v3055_v49 = vpack.c.bf16 %v2729_v16, %v2728_v15  ;;  %vm6722_vm0 = vcmp.eq.s32.totalorder %v6721_v11, %v6679_v61  ;;  %v4484_v54 = vpop.eup %4483  ;;  %4493 = vrcp.f32 %v2685_v1  ;;  %v6733_v16 = vld [vmem:[#allocation31_spill] sm:$0xff]  ;;  %v6739_v11 = vld [vmem:[#allocation36_spill] sm:$0xff] }
 0x6ee   : > { %vm6111_vm6 = vmand %vm6722_vm0, %vm2991_vm8  ;;  %v2688_v45 = vadd.f32 1.0, %v4482_v59  ;;  %vm2992_vm7 = vcmp.eq.s32.totalorder %v6677_v55, %v6076_v12  ;;  %4495 = vrcp.f32 %v2683_v62  ;;  %v6121_v3 = vadd.s32 %v2950_v5, %v2948_v20  ;;  %4178 = vmatprep.subr.bf16.mxu1 %v3054_v46  ;;  %v6738_v62 = vld [vmem:[#allocation37_spill] sm:$0xff] }
 0x6ef   : > { %v4486_v21 = vpop.eup %4485  ;;  %v2686_v47 = vadd.f32 1.0, %v4484_v54  ;;  %vm6726_vm8 = vcmp.eq.s32.totalorder %v6725_v34, %v6679_v61  ;;  %vm6730_vm3 = vcmp.eq.s32.totalorder %v6729_v22, %v6679_v61  ;;  %v2977_v34 = vcvt.f32.s32 %v5875_v23  ;;  %v2961_v22 = vpop.xlane.xlu0 %2960 }
 0x6f0   : > { %4497 = vrcp.f32 %v2688_v45  ;;  %v2689_v31 = vadd.f32 1.0, %v4486_v21  ;;  %vm2993_vm0 = vcmp.eq.s32.totalorder %v6677_v55, %v6121_v3  ;;  %4179 = vmatpush3.bf16.msra.mxu1 %v3054_v46  ;;  %vm6128_vm4 = vmand %vm6726_vm8, %vm2992_vm7  ;;  %v6740_v45 = vld [vmem:[#allocation38_spill] sm:$0xff]  ;;  %v2962_v23 = vcvt.f32.s32 %v2961_v22 }
 0x6f1   : > { %4180 = vmatprep.subr.bf16.mxu1 %v3055_v49  ;;  %vm6135_vm2 = vmand %vm6730_vm3, %vm2993_vm0  ;;  %v4488_v58 = vpop.eup %4487  ;;  %v2978_v50 = vshll.u32 %v2977_v34, 16  ;;  %v2964_v24 = vshll.u32 %v2963_v8, 16  ;;  %v3261_v34 = vld [vmem:[#allocation4 + $0x20] sm:$0xff] (!%p3784_p0) }
 0x6f2   : > { %4499 = vrcp.f32 %v2689_v31  ;;  %vm3780_vm5 = vmpackc.low %vm6135_vm2, %vm6128_vm4  ;;  %v2687_v40 = vadd.f32 1.0, %v4488_v58  ;;  %v2975_v31 = vpop.xlane.xlu1 %2974  ;;  %vm3159_vm2 = vcmp.ge.s32.totalorder %v5922_v63, 0  ;;  %vm3157_vm4 = vcmp.ge.s32.totalorder %v5906_v52, 0  ;;  %v3177_v52 = vld [vmem:[#allocation5 + $0x20] sm:$0xff] }
 0x6f3   : > { %4501 = vrcp.f32 %v2686_v47  ;;  %v4490_v51 = vpop.eup %4489  ;;  %vm6741_vm7 = vmpackc.low %vm5974_vm9, %vm5965_vm12  ;;  %v2976_v7 = vcvt.f32.s32 %v2975_v31  ;;  %v6179_v0 = vadd.s32 %v2964_v24, %v2962_v23  ;;  %vm6745_vm9 = vnez %v6720_v29  ;;  %v3260_v31 = vld [vmem:[#allocation4 + $0x18] sm:$0xff] (!%p3784_p0) }
 0x6f4   : > { %4181 = vmatpush3.bf16.msra.mxu1 %v3055_v49  ;;  %4503 = vrcp.f32 %v2687_v40  ;;  %v2732_v9 = vmul.f32 %v4490_v51, %v6733_v16  ;;  %vm6742_vm3 = vmpackc.low %vm6014_vm11, %vm6002_vm14 }
 0x6f5   : > { %v4492_v13 = vpop.eup %4491  ;;  %vm6743_vm0 = vmpackc.low %vm6046_vm1, %vm6037_vm15  ;;  %v6177_v58 = vadd.s32 %v2978_v50, %v2976_v7  ;;  %vm6748_vm15 = vcmp.eq.s32.totalorder %v6747_v10, %v6679_v61  ;;  %v3262_v10 = vld [vmem:[#allocation4 + $0x28] sm:$0xff] (!%p3784_p0) }
 0x6f6   : > { %v2730_v30 = vmul.f32 %v4492_v13, %v6735_v18  ;;  %vm6744_vm12 = vmpackc.low %vm6085_vm13, %vm6072_vm10  ;;  %vm2994_vm13 = vcmp.eq.s32.totalorder %v6677_v55, %v6179_v0  ;;  %v3179_v13 = vld [vmem:[#allocation5 + $0x30] sm:$0xff] }
 0x6f7   : > { %v4494_v4 = vpop.eup %4493  ;;  %vm6746_vm14 = vmpackc.low %vm6111_vm6, %vm6745_vm9  ;;  %vm2995_vm11 = vcmp.eq.s32.totalorder %v6677_v55, %v6177_v58  ;;  %vm6750_vm6 = vcmp.eq.s32.totalorder %v6749_v25, %v6679_v61  ;;  %v3174_v55 = vld [vmem:[#allocation5 + $0x8] sm:$0xff] }
 0x6f8   : > { %v4496_v38 = vpop.eup %4495  ;;  %v2733_v6 = vmul.f32 %v4494_v4, %v6734_v57  ;;  %vm3011_vm1 = vmand %vm6748_vm15, %vm2995_vm11  ;;  %vm3161_vm11 = vcmp.ge.s32.totalorder %v5948_v27, 0  ;;  %vm3164_vm15 = vcmp.ge.s32.totalorder %v6020_v48, 0  ;;  %v3181_v27 = vld [vmem:[#allocation5 + $0x40] sm:$0xff]  ;;  %v3182_v48 = vld [vmem:[#allocation5 + $0x48] sm:$0xff] }
 0x6f9   : > { %v2731_v32 = vmul.f32 %v4496_v38, %v6736_v44  ;;  %vm3010_vm10 = vmand %vm6750_vm6, %vm2994_vm13  ;;  %v3180_v38 = vld [vmem:[#allocation5 + $0x38] sm:$0xff]  ;;  %vm3162_vm6 = vcmp.ge.s32.totalorder %v5989_v17, 0 }
 0x6fa   : > { %v4498_v36 = vpop.eup %4497  ;;  %v3057_v15 = vpack.c.bf16 %v2733_v6, %v2732_v9  ;;  %vm3782_vm8 = vmpackc.low %vm3011_vm1, %vm3010_vm10 }
 0x6fb   : > { %v3056_v43 = vpack.c.bf16 %v2731_v32, %v2730_v30  ;;  %v2736_v59 = vmul.f32 %v4498_v36, %v6737_v2  ;;  %v3183_v30 = vld [vmem:[#allocation5 + $0x50] sm:$0xff]  ;;  %v3184_v32 = vld [vmem:[#allocation5 + $0x58] sm:$0xff] }
 0x6fc   : > { %v4500_v5 = vpop.eup %4499  ;;  %v3187_v2 = vld [vmem:[#allocation5 + $0x70] sm:$0xff] }
 0x6fd   : > { %v4502_v1 = vpop.eup %4501  ;;  %4182 = vmatprep.subr.bf16.mxu1 %v3056_v43  ;;  %v2737_v20 = vmul.f32 %v4500_v5, %v6738_v62  ;;  %v3188_v62 = vld [vmem:[#allocation5 + $0x78] sm:$0xff] }
 0x6fe   : > { %4183 = vmatpush3.bf16.msra.mxu1 %v3056_v43  ;;  %v4504_v46 = vpop.eup %4503  ;;  %v2734_v54 = vmul.f32 %v4502_v1, %v6739_v11 }
 0x6ff   : > { %4184 = vmatprep.subr.bf16.mxu1 %v3057_v15  ;;  %v3059_v49 = vpack.c.bf16 %v2737_v20, %v2736_v59  ;;  %v2735_v21 = vmul.f32 %v4504_v46, %v6740_v45 }
 0x701   : > { %v3058_v47 = vpack.c.bf16 %v2735_v21, %v2734_v54  ;;  %v3258_v21 = vld [vmem:[#allocation4 + $0x8] sm:$0xff] (!%p3784_p0) }
 0x702   : > { %4185 = vmatpush3.bf16.msra.mxu1 %v3057_v15 }
 0x703   : > { %4186 = vmatprep.subr.bf16.mxu1 %v3058_v47 }
 0x706   : > { %4187 = vmatpush3.bf16.msra.mxu1 %v3058_v47  ;;  %v3259_v47 = vld [vmem:[#allocation4 + $0x10] sm:$0xff] (!%p3784_p0) }
 0x707   : > { %4188 = vmatprep.subr.bf16.mxu1 %v3059_v49 }
 0x70a   : > { %4189 = vmatpush3.bf16.msra.mxu1 %v3059_v49 }
 0x70d   : > { %4191 = vmatmul.mubr.msk.bf16.vlgmr.msra.gmra.mrb[32].mxu1 %vm6741_vm7, %v4554_v60  ;;  %vm3160_vm7 = vcmp.ge.s32.totalorder %v5954_v56, 0  ;;  %v3178_v56 = vld [vmem:[#allocation5 + $0x28] sm:$0xff] }
 0x70e   : > { %4194 = vmatprep.mubr.msk.bf16.mxu1 %vm6742_vm3, %v4554_v60 }
 0x715   : > { %4195 = vmatmul.mubr.msk.bf16.gmra.mrb[36].mxu1 %vm6743_vm0, %v4554_v60  ;;  %vm3158_vm0 = vcmp.ge.s32.totalorder %v5924_v37, 0 }
 0x716   : > { %4198 = vmatprep.mubr.msk.bf16.mxu1 %vm6744_vm12, %v4554_v60 }
 0x71d   : > { %4199 = vmatmul.mubr.msk.bf16.gmra.mrb[40].mxu1 %vm6746_vm14, %v4554_v60  ;;  %vm3163_vm14 = vcmp.ge.s32.totalorder %v5979_v33, 0 }
 0x71e   : > { %4202 = vmatprep.mubr.msk.bf16.mxu1 %vm3780_vm5, %v4554_v60  ;;  %vm6751_vm5 = vcmask 261120  }
 0x71f   : > { %vm6752_vm3 = vmmov %vm6751_vm5 }
 0x720   : > { %vm6753_vm12 = vmmov %vm6752_vm3 }
 0x721   : > { %vm6754_vm9 = vmmov %vm6752_vm3 }
 0x722   : > { %vm6755_vm13 = vmmov %vm6752_vm3 }
 0x723   : > { %vm6756_vm1 = vmmov %vm6752_vm3 }
 0x724   : > { %vm6757_vm10 = vmmov %vm6756_vm1 }
 0x725   : > { %4203 = vmatmul.mubr.msk.bf16.gmra.mrb[44].mxu1 %vm3782_vm8, %v4554_v60  ;;  %vm6758_vm8 = vmmov %vm6756_vm1 }
 0x7e0   : > { %v4192_v29 = vpop.f32.mrb[32].mxu1 }
 0x7e1   : > { %v3223_v35 = vsel %vm3159_vm2, %v4192_v29, %v3175_v14  ;;  %v3094_v53 = vpop.f32.mrb[33].mxu1  ;;  %vm3167_vm2 = vcmp.ge.s32.totalorder %v6051_v28, 0 }
 0x7e2   : > { %3239 = vst.msk [vmem:[#allocation5 + $0x10] sm:$0xff] %vm6751_vm5, %v3223_v35  ;;  %v3221_v40 = vsel %vm3157_vm4, %v3094_v53, %v3173_v42  ;;  %v4193_v51 = vpop.f32.mrb[34].mxu1  ;;  %vm3165_vm4 = vcmp.ge.s32.totalorder %v6007_v26, 0  ;;  %vm6759_vm5 = vmmov %vm6756_vm1  ;;  %v3185_v26 = vld [vmem:[#allocation5 + $0x60] sm:$0xff] }
 0x7e3   : > { %3237 = vst.msk [vmem:[#allocation5] sm:$0xff] %vm6752_vm3, %v3221_v40  ;;  %v3224_v61 = vsel %vm3160_vm7, %v4193_v51, %v3176_v41  ;;  %v3097_v60 = vpop.f32.mrb[35].mxu1  ;;  %vm3168_vm7 = vcmp.ge.s32.totalorder %v6079_v19, 0  ;;  %vm6760_vm3 = vmmov %vm6756_vm1  ;;  %v3186_v19 = vld [vmem:[#allocation5 + $0x68] sm:$0xff]  ;;  %v3263_v41 = vld [vmem:[#allocation4 + $0x30] sm:$0xff] (!%p3784_p0) }
 0x7e4   : > { %3240 = vst.msk [vmem:[#allocation5 + $0x18] sm:$0xff] %vm6753_vm12, %v3224_v61  ;;  %v3222_v63 = vsel %vm3158_vm0, %v3097_v60, %v3174_v55  ;;  %vm3166_vm0 = vcmp.ge.s32.totalorder %v6054_v39, 0  ;;  %vm6761_vm12 = vmmov %vm6756_vm1  ;;  %v3264_v61 = vld [vmem:[#allocation4 + $0x38] sm:$0xff] (!%p3784_p0) }
 0x7e5   : > { %3238 = vst.msk [vmem:[#allocation5 + $0x8] sm:$0xff] %vm6754_vm9, %v3222_v63  ;;  %vm6762_vm9 = vmmov %vm6756_vm1 }
 0x7e8   : > { %v4196_v4 = vpop.f32.mrb[36].mxu1 }
 0x7e9   : > { %v3227_v16 = vsel %vm3163_vm14, %v4196_v4, %v3179_v13  ;;  %v3110_v9 = vpop.f32.mrb[37].mxu1  ;;  %vm3171_vm14 = vcmp.ge.s32.totalorder %v6179_v0, 0  ;;  %v3275_v7 = vld [vmem:[#allocation5 + $0x10] sm:$0xff] (!%p3784_p0)  ;;  %v3265_v4 = vld [vmem:[#allocation4 + $0x40] sm:$0xff] (!%p3784_p0) }
 0x7ea   : > { %3243 = vst.msk [vmem:[#allocation5 + $0x30] sm:$0xff] %vm6755_vm13, %v3227_v16  ;;  %v3225_v57 = vsel %vm3161_vm11, %v3110_v9, %v3177_v52  ;;  %v4197_v37 = vpop.f32.mrb[38].mxu1  ;;  %vm3169_vm11 = vcmp.ge.s32.totalorder %v6076_v12, 0  ;;  %vm3172_vm13 = vcmp.ge.s32.totalorder %v6177_v58, 0  ;;  %v3257_v12 = vld [vmem:[#allocation4] sm:$0xff] (!%p3784_p0)  ;;  %v6241_v58 = vadd.f32 (!%p3784_p0), %v3275_v7, %v3259_v47 }
 0x7eb   : > { %3241 = vst.msk [vmem:[#allocation5 + $0x20] sm:$0xff] %vm6756_vm1, %v3225_v57  ;;  %v3228_v6 = vsel %vm3164_vm15, %v4197_v37, %v3180_v38  ;;  %v3113_v18 = vpop.f32.mrb[39].mxu1  ;;  %vm6763_vm15 = vmmov %vm6756_vm1  ;;  %v3273_v22 = vld [vmem:[#allocation5] sm:$0xff] (!%p3784_p0)  ;;  %v3276_v50 = vld [vmem:[#allocation5 + $0x18] sm:$0xff] (!%p3784_p0) }
 0x7ec   : > { %3244 = vst.msk [vmem:[#allocation5 + $0x38] sm:$0xff] %vm6757_vm10, %v3228_v6  ;;  %v3226_v33 = vsel %vm3162_vm6, %v3113_v18, %v3178_v56  ;;  %vm3170_vm6 = vcmp.ge.s32.totalorder %v6121_v3, 0  ;;  %vm6764_vm10 = vmmov %vm6756_vm1  ;;  %v3274_v8 = vld [vmem:[#allocation5 + $0x8] sm:$0xff] (!%p3784_p0)  ;;  %v6237_v24 = vadd.f32 (!%p3784_p0), %v3273_v22, %v3257_v12  ;;  %v6243_v0 = vadd.f32 (!%p3784_p0), %v3276_v50, %v3260_v31 }
 0x7ed   : > { %3242 = vst.msk [vmem:[#allocation5 + $0x28] sm:$0xff] %vm6758_vm8, %v3226_v33  ;;  %vm6765_vm8 = vmmov %vm6756_vm1  ;;  %v6239_v3 = vadd.f32 (!%p3784_p0), %v3274_v8, %v3258_v21  ;;  %v3266_v57 = vld [vmem:[#allocation4 + $0x48] sm:$0xff] (!%p3784_p0)  ;;  %v3272_v21 = vld [vmem:[#allocation4 + $0x78] sm:$0xff] (!%p3784_p0) }
 0x7f0   : > { %v4200_v44 = vpop.f32.mrb[40].mxu1 }
 0x7f1   : > { %v3231_v36 = vsel %vm3167_vm2, %v4200_v44, %v3183_v30  ;;  %v3126_v15 = vpop.f32.mrb[41].mxu1  ;;  %vm6766_vm2 = vcmask (!%p3784_p0), 261120   ;;  %v3279_v35 = vld [vmem:[#allocation5 + $0x30] sm:$0xff] (!%p3784_p0) }
 0x7f2   : > { %3247 = vst.msk [vmem:[#allocation5 + $0x50] sm:$0xff] %vm6759_vm5, %v3231_v36  ;;  %v3229_v43 = vsel %vm3165_vm4, %v3126_v15, %v3181_v27  ;;  %v4201_v17 = vpop.f32.mrb[42].mxu1  ;;  %v3277_v23 = vld [vmem:[#allocation5 + $0x20] sm:$0xff] (!%p3784_p0)  ;;  %v3305_v14 = vsel (!%p3784_p0), %vm6766_vm2, %v6237_v24, 0.0  ;;  %vm6767_vm4 = vmmov (!%p3784_p0), %vm6766_vm2  ;;  %v6257_v13 = vadd.f32 (!%p3784_p0), %v3279_v35, %v3263_v41  ;;  %v3267_v30 = vld [vmem:[#allocation4 + $0x50] sm:$0xff] (!%p3784_p0) }
 0x7f3   : > { %3245 = vst.msk [vmem:[#allocation5 + $0x40] sm:$0xff] %vm6760_vm3, %v3229_v43  ;;  %v3232_v5 = vsel %vm3168_vm7, %v4201_v17, %v3184_v32  ;;  %v3129_v1 = vpop.f32.mrb[43].mxu1  ;;  %v6247_v42 = vadd.f32 (!%p3784_p0), %v3277_v23, %v3261_v34  ;;  %v3306_v29 = vsel (!%p3784_p0), %vm6767_vm4, %v6239_v3, 0.0  ;;  %vm6768_vm5 = vmmov (!%p3784_p0), %vm6766_vm2  ;;  %v3280_v60 = vld [vmem:[#allocation5 + $0x38] sm:$0xff] (!%p3784_p0) }
 0x7f4   : > { %3248 = vst.msk [vmem:[#allocation5 + $0x58] sm:$0xff] %vm6761_vm12, %v3232_v5  ;;  %v3230_v28 = vsel %vm3166_vm0, %v3129_v1, %v3182_v48  ;;  %v3278_v25 = vld [vmem:[#allocation5 + $0x28] sm:$0xff] (!%p3784_p0)  ;;  %v3307_v53 = vadd.f32 (!%p3784_p0), %v3306_v29, %v3305_v14  ;;  %v3308_v40 = vsel (!%p3784_p0), %vm6768_vm5, %v6241_v58, 0.0  ;;  %vm6769_vm7 = vmmov (!%p3784_p0), %vm6766_vm2  ;;  %v6261_v9 = vadd.f32 (!%p3784_p0), %v3280_v60, %v3264_v61  ;;  %v3268_v15 = vld [vmem:[#allocation4 + $0x58] sm:$0xff] (!%p3784_p0) }
 0x7f5   : > { %3246 = vst.msk [vmem:[#allocation5 + $0x48] sm:$0xff] %vm6762_vm9, %v3230_v28  ;;  %v6251_v55 = vadd.f32 (!%p3784_p0), %v3278_v25, %v3262_v10  ;;  %v3310_v51 = vsel (!%p3784_p0), %vm6769_vm7, %v6243_v0, 0.0  ;;  %vm6770_vm3 = vmmov (!%p3784_p0), %vm6766_vm2  ;;  %v3269_v1 = vld [vmem:[#allocation4 + $0x60] sm:$0xff] (!%p3784_p0) }
 0x7f6   : > { %v3309_v63 = vadd.f32 (!%p3784_p0), %v3308_v40, %v3307_v53  ;;  %v3312_v52 = vsel (!%p3784_p0), %vm6770_vm3, %v6247_v42, 0.0  ;;  %vm6771_vm0 = vmmov (!%p3784_p0), %vm6766_vm2 }
 0x7f7   : > { %3256 = sbr.rel (%p3784_p0) target bundleno = 2170 (0x87a), region = 108  ;;  %v3314_v56 = vsel (!%p3784_p0), %vm6771_vm0, %v6251_v55, 0.0  ;;  %vm6772_vm12 = vmmov (!%p3784_p0), %vm6771_vm0 }
 0x7f8   : > { %v4204_v59 = vpop.f32.mrb[44].mxu1  ;;  %v3311_v16 = vadd.f32 (!%p3784_p0), %v3310_v51, %v3309_v63  ;;  %v3316_v33 = vsel (!%p3784_p0), %vm6772_vm12, %v6257_v13, 0.0  ;;  %vm6773_vm9 = vmmov (!%p3784_p0), %vm6771_vm0 }
 0x7f9   : > { %v3235_v20 = vsel %vm3171_vm14, %v4204_v59, %v3187_v2  ;;  %v3142_v46 = vpop.f32.mrb[45].mxu1  ;;  %v3283_v27 = vld [vmem:[#allocation5 + $0x50] sm:$0xff] (!%p3784_p0)  ;;  %v3318_v36 = vsel (!%p3784_p0), %vm6773_vm9, %v6261_v9, 0.0  ;;  %vm6774_vm14 = vmmov (!%p3784_p0), %vm6771_vm0 }
 0x7fa   : > { %3251 = vst.msk [vmem:[#allocation5 + $0x70] sm:$0xff] %vm6763_vm15, %v3235_v20  ;;  %v3233_v39 = vsel %vm3169_vm11, %v3142_v46, %v3185_v26  ;;  %v4205_v49 = vpop.f32.mrb[46].mxu1  ;;  %v3281_v38 = vld [vmem:[#allocation5 + $0x40] sm:$0xff] (!%p3784_p0)  ;;  %v3313_v6 = vadd.f32 (!%p3784_p0), %v3312_v52, %v3311_v16  ;;  %v6273_v17 = vadd.f32 (!%p3784_p0), %v3283_v27, %v3267_v30  ;;  %vm6775_vm11 = vmmov (!%p3784_p0), %vm6771_vm0 }
 0x7fb   : > { %3249 = vst.msk [vmem:[#allocation5 + $0x60] sm:$0xff] %vm6756_vm1, %v3233_v39  ;;  %v3236_v11 = vsel %vm3172_vm13, %v4205_v49, %v3188_v62  ;;  %v3145_v54 = vpop.f32.mrb[47].mxu1  ;;  %v6265_v18 = vadd.f32 (!%p3784_p0), %v3281_v38, %v3265_v4  ;;  %v3284_v48 = vld [vmem:[#allocation5 + $0x58] sm:$0xff] (!%p3784_p0)  ;;  %v3270_v62 = vld [vmem:[#allocation4 + $0x68] sm:$0xff] (!%p3784_p0)  ;;  %vm6776_vm13 = vmmov (!%p3784_p0), %vm6771_vm0 }
 0x7fc   : > { %3252 = vst.msk [vmem:[#allocation5 + $0x78] sm:$0xff] %vm6764_vm10, %v3236_v11  ;;  %v3234_v45 = vsel %vm3170_vm6, %v3145_v54, %v3186_v19  ;;  %v3282_v37 = vld [vmem:[#allocation5 + $0x48] sm:$0xff] (!%p3784_p0)  ;;  %v3315_v44 = vadd.f32 (!%p3784_p0), %v3314_v56, %v3313_v6  ;;  %v6277_v26 = vadd.f32 (!%p3784_p0), %v3284_v48, %v3268_v15  ;;  %v3324_v39 = vsel (!%p3784_p0), %vm6776_vm13, %v6273_v17, 0.0  ;;  %v3271_v49 = vld [vmem:[#allocation4 + $0x70] sm:$0xff] (!%p3784_p0)  ;;  %vm6777_vm15 = vmmov (!%p3784_p0), %vm6771_vm0 }
 0x7fd   : > { %3250 = vst.msk [vmem:[#allocation5 + $0x68] sm:$0xff] %vm6765_vm8, %v3234_v45  ;;  %v6269_v32 = vadd.f32 (!%p3784_p0), %v3282_v37, %v3266_v57  ;;  %v3320_v5 = vsel (!%p3784_p0), %vm6774_vm14, %v6265_v18, 0.0  ;;  %vm6778_vm1 = vmmov (!%p3784_p0), %vm6771_vm0 }
 0x7fe   : > { %v3317_v43 = vadd.f32 %v3316_v33, %v3315_v44  ;;  %v3326_v12 = vsel %vm6777_vm15, %v6277_v26, 0.0  ;;  %vm6779_vm6 = vmmov %vm6771_vm0 }
 0x7ff   : > { %v3322_v59 = vsel %vm6775_vm11, %v6269_v32, 0.0  ;;  %vm6780_vm10 = vmmov %vm6771_vm0 }
 0x800   : > { %v3319_v2 = vadd.f32 %v3318_v36, %v3317_v43  ;;  %vm6781_vm8 = vmmov %vm6771_vm0 }
 0x801   : > { %v3287_v11 = vld [vmem:[#allocation5 + $0x70] sm:$0xff]  ;;  %vm6782_vm2 = vmmov %vm6771_vm0 }
 0x802   : > { %v3285_v28 = vld [vmem:[#allocation5 + $0x60] sm:$0xff]  ;;  %v3321_v46 = vadd.f32 %v3320_v5, %v3319_v2  ;;  %v3303_v34 = vadd.f32 %v3287_v11, %v3271_v49  ;;  %vm6783_vm4 = vmmov %vm6771_vm0 }
 0x803   : > { %v6281_v19 = vadd.f32 %v3285_v28, %v3269_v1  ;;  %v3288_v47 = vld [vmem:[#allocation5 + $0x78] sm:$0xff]  ;;  %vm6784_vm5 = vmmov %vm6771_vm0 }
 0x804   : > { %v3286_v20 = vld [vmem:[#allocation5 + $0x68] sm:$0xff]  ;;  %v3323_v54 = vadd.f32 %v3322_v59, %v3321_v46  ;;  %v6291_v7 = vadd.f32 %v3288_v47, %v3272_v21  ;;  %v3332_v10 = vsel %vm6780_vm10, %v3303_v34, 0.0  ;;  %vm6785_vm7 = vmmov %vm6771_vm0 }
 0x805   : > { %v6285_v45 = vadd.f32 %v3286_v20, %v3270_v62  ;;  %v3328_v22 = vsel %vm6778_vm1, %v6281_v19, 0.0  ;;  %vm6786_vm3 = vmmov %vm6771_vm0 }
 0x806   : > { %v3325_v31 = vadd.f32 %v3324_v39, %v3323_v54  ;;  %v3334_v14 = vsel %vm6781_vm8, %v6291_v7, 0.0  ;;  %vm6787_vm12 = vmmov %vm6771_vm0 }
 0x807   : > { %v3330_v50 = vsel %vm6779_vm6, %v6285_v45, 0.0  ;;  %vm6788_vm9 = vmmov %vm6771_vm0 }
 0x808   : > { %v3327_v8 = vadd.f32 %v3326_v12, %v3325_v31  ;;  %vm6789_vm14 = vmmov %vm6771_vm0 }
 0x809   : > { %vm6790_vm11 = vmmov %vm6771_vm0 }
 0x80a   : > { %v3329_v23 = vadd.f32 %v3328_v22, %v3327_v8  ;;  %vm6791_vm13 = vmmov %vm6771_vm0 }
 0x80b   : > { %vm6792_vm15 = vmmov %vm6771_vm0 }
 0x80c   : > { %v3331_v25 = vadd.f32 %v3330_v50, %v3329_v23  ;;  %vm6793_vm1 = vmmov %vm6771_vm0 }
 0x80d   : > { %vm6794_vm6 = vmmov %vm6771_vm0 }
 0x80e   : > { %v3333_v29 = vadd.f32 %v3332_v10, %v3331_v25  ;;  %vm6795_vm10 = vmmov %vm6771_vm0 }
 0x80f   : > { %vm6796_vm8 = vmmov %vm6771_vm0 }
 0x810   : > { %v3335_v41 = vadd.f32 %v3334_v14, %v3333_v29 }
 0x812   : > { %v3336_v35 = vrot.slane %v3335_v41, 4 }
 0x814   : > { %v3337_v53 = vadd.f32 %v3336_v35, %v3335_v41 }
 0x816   : > { %v3338_v40 = vrot.slane %v3337_v53, 2 }
 0x818   : > { %v3339_v51 = vadd.f32 %v3338_v40, %v3337_v53 }
 0x81a   : > { %v3340_v61 = vrot.slane %v3339_v51, 1 }
 0x81c   : > { %v3341_v60 = vadd.f32 %v3340_v61, %v3339_v51 }
 0x81e   : > { %v3343_v63 = vmul.f32 0.0078125, %v3341_v60 }
 0x820   : > { %v6299_v52 = vsub.f32 %v6237_v24, %v3343_v63  ;;  %v6302_v4 = vsub.f32 %v6239_v3, %v3343_v63  ;;  %v6305_v38 = vsub.f32 %v6241_v58, %v3343_v63  ;;  %v6308_v16 = vsub.f32 %v6243_v0, %v3343_v63 }
 0x821   : > { %v6311_v56 = vsub.f32 %v6247_v42, %v3343_v63  ;;  %v6320_v3 = vsub.f32 %v6251_v55, %v3343_v63  ;;  %v6325_v0 = vsub.f32 %v6257_v13, %v3343_v63  ;;  %v6333_v44 = vsub.f32 %v6261_v9, %v3343_v63 }
 0x822   : > { %v3360_v57 = vmul.f32 %v6299_v52, %v6299_v52  ;;  %v3361_v37 = vmul.f32 %v6302_v4, %v6302_v4  ;;  %v3362_v24 = vmul.f32 %v6305_v38, %v6305_v38  ;;  %v3363_v58 = vmul.f32 %v6308_v16, %v6308_v16 }
 0x823   : > { %v3364_v42 = vmul.f32 %v6311_v56, %v6311_v56  ;;  %v3365_v55 = vmul.f32 %v6320_v3, %v6320_v3  ;;  %v6339_v15 = vsub.f32 %v6265_v18, %v3343_v63  ;;  %v3366_v48 = vmul.f32 %v6325_v0, %v6325_v0 }
 0x824   : > { %v3376_v6 = vsel %vm6782_vm2, %v3360_v57, 0.0  ;;  %v3377_v33 = vsel %vm6783_vm4, %v3361_v37, 0.0  ;;  %v3379_v30 = vsel %vm6784_vm5, %v3362_v24, 0.0  ;;  %v3381_v36 = vsel %vm6785_vm7, %v3363_v58, 0.0  ;;  %vm6797_vm2 = vmmov %vm6771_vm0 }
 0x825   : > { %v3378_v27 = vadd.f32 %v3377_v33, %v3376_v6  ;;  %v3383_v43 = vsel %vm6786_vm3, %v3364_v42, 0.0  ;;  %v6345_v1 = vsub.f32 %v6269_v32, %v3343_v63  ;;  %v3367_v9 = vmul.f32 %v6333_v44, %v6333_v44  ;;  %vm6798_vm4 = vmmov %vm6771_vm0 }
 0x826   : > { %v3385_v28 = vsel %vm6771_vm0, %v3365_v55, 0.0  ;;  %v6351_v59 = vsub.f32 %v6273_v17, %v3343_v63  ;;  %v3368_v18 = vmul.f32 %v6339_v15, %v6339_v15  ;;  %v3387_v62 = vsel %vm6787_vm12, %v3366_v48, 0.0  ;;  %vm6799_vm5 = vmmov %vm6771_vm0 }
 0x827   : > { %v3380_v13 = vadd.f32 %v3379_v30, %v3378_v27  ;;  %v6357_v46 = vsub.f32 %v6277_v26, %v3343_v63  ;;  %v3369_v32 = vmul.f32 %v6345_v1, %v6345_v1  ;;  %v3389_v39 = vsel %vm6788_vm9, %v3367_v9, 0.0  ;;  %v6396_v27 = vld [vmem:[%s6545_s15] ss:$0 sm:$0xff]  ;;  %vm6800_vm7 = vmmov %vm6771_vm0 }
 0x828   : > { %v6363_v11 = vsub.f32 %v6281_v19, %v3343_v63  ;;  %v3370_v17 = vmul.f32 %v6351_v59, %v6351_v59  ;;  %v3391_v54 = vsel %vm6789_vm14, %v3368_v18, 0.0  ;;  %v6369_v21 = vsub.f32 %v6285_v45, %v3343_v63  ;;  %vm6801_vm3 = vmmov %vm6771_vm0 }
 0x829   : > { %v3382_v5 = vadd.f32 %v3381_v36, %v3380_v13  ;;  %v3371_v26 = vmul.f32 %v6357_v46, %v6357_v46  ;;  %v3393_v47 = vsel %vm6790_vm11, %v3369_v32, 0.0  ;;  %v6374_v22 = vsub.f32 %v3303_v34, %v3343_v63  ;;  %vm6802_vm12 = vmmov %vm6771_vm0 }
 0x82a   : > { %v3372_v19 = vmul.f32 %v6363_v11, %v6363_v11  ;;  %v3395_v8 = vsel %vm6791_vm13, %v3370_v17, 0.0  ;;  %v6380_v23 = vsub.f32 %v6291_v7, %v3343_v63  ;;  %v3373_v45 = vmul.f32 %v6369_v21, %v6369_v21  ;;  %vm6803_vm9 = vmmov %vm6771_vm0 }
 0x82b   : > { %v3384_v2 = vadd.f32 %v3383_v43, %v3382_v5  ;;  %v3397_v10 = vsel %vm6792_vm15, %v3371_v26, 0.0  ;;  %v3374_v14 = vmul.f32 %v6374_v22, %v6374_v22  ;;  %v6405_v43 = vld [vmem:[%s6546_s16] ss:$0 sm:$0xff]  ;;  %vm6804_vm14 = vmmov %vm6771_vm0 }
 0x82c   : > { %v3399_v34 = vsel %vm6793_vm1, %v3372_v19, 0.0  ;;  %v3375_v41 = vmul.f32 %v6380_v23, %v6380_v23  ;;  %v3401_v35 = vsel %vm6794_vm6, %v3373_v45, 0.0  ;;  %vm6805_vm11 = vmmov %vm6771_vm0 }
 0x82d   : > { %v3386_v20 = vadd.f32 %v3385_v28, %v3384_v2  ;;  %v3403_v7 = vsel %vm6795_vm10, %v3374_v14, 0.0  ;;  %vm6806_vm13 = vmmov %vm6771_vm0 }
 0x82e   : > { %v3405_v51 = vsel %vm6796_vm8, %v3375_v41, 0.0  ;;  %vm6807_vm15 = vmmov %vm6771_vm0 }
 0x82f   : > { %v3388_v49 = vadd.f32 %v3387_v62, %v3386_v20  ;;  %vm6808_vm1 = vmmov %vm6771_vm0 }
 0x830   : > { %vm6809_vm6 = vmmov %vm6771_vm0 }
 0x831   : > { %v3390_v12 = vadd.f32 %v3389_v39, %v3388_v49  ;;  %vm6810_vm10 = vmmov %vm6771_vm0 }
 0x832   : > { %vm6811_vm8 = vmmov %vm6771_vm0 }
 0x833   : > { %v3392_v31 = vadd.f32 %v3391_v54, %v3390_v12 }
 0x835   : > { %v3394_v50 = vadd.f32 %v3393_v47, %v3392_v31 }
 0x837   : > { %v3396_v25 = vadd.f32 %v3395_v8, %v3394_v50 }
 0x839   : > { %v3398_v29 = vadd.f32 %v3397_v10, %v3396_v25 }
 0x83b   : > { %v3400_v53 = vadd.f32 %v3399_v34, %v3398_v29 }
 0x83d   : > { %v3402_v40 = vadd.f32 %v3401_v35, %v3400_v53 }
 0x83f   : > { %v3404_v61 = vadd.f32 %v3403_v7, %v3402_v40 }
 0x841   : > { %v3406_v60 = vadd.f32 %v3405_v51, %v3404_v61 }
 0x843   : > { %v3407_v63 = vrot.slane %v3406_v60, 4 }
 0x845   : > { %v3408_v57 = vadd.f32 %v3407_v63, %v3406_v60 }
 0x847   : > { %v3409_v37 = vrot.slane %v3408_v57, 2 }
 0x849   : > { %v3410_v24 = vadd.f32 %v3409_v37, %v3408_v57 }
 0x84b   : > { %v3411_v58 = vrot.slane %v3410_v24, 1 }
 0x84d   : > { %v3412_v42 = vadd.f32 %v3411_v58, %v3410_v24 }
 0x84f   : > { %v3413_v6 = vmul.f32 0.0078125, %v3412_v42 }
 0x851   : > { %v3414_v33 = vadd.f32 1e-05, %v3413_v6 }
 0x853   : > { %4505 = vrsqrt.f32 %v3414_v33 }
 0x85d   : > { %v4506_v30 = vpop.eup %4505 }
 0x85e   : > { %v3416_v55 = vmul.f32 %v4506_v30, %v6299_v52  ;;  %v3417_v36 = vmul.f32 %v4506_v30, %v6302_v4  ;;  %v3418_v13 = vmul.f32 %v4506_v30, %v6305_v38  ;;  %v3419_v48 = vmul.f32 %v4506_v30, %v6308_v16 }
 0x85f   : > { %v3420_v5 = vmul.f32 %v4506_v30, %v6311_v56  ;;  %v3421_v9 = vmul.f32 %v4506_v30, %v6320_v3  ;;  %v3422_v28 = vmul.f32 %v4506_v30, %v6325_v0  ;;  %v3423_v2 = vmul.f32 %v4506_v30, %v6333_v44 }
 0x860   : > { %v3439_v52 = vmul.f32 %v6396_v27, %v3416_v55  ;;  %v3440_v4 = vmul.f32 %v6396_v27, %v3417_v36  ;;  %v3441_v38 = vmul.f32 %v6396_v27, %v3418_v13  ;;  %v3442_v16 = vmul.f32 %v6396_v27, %v3419_v48 }
 0x861   : > { %v3443_v18 = vmul.f32 %v6396_v27, %v3420_v5  ;;  %v3444_v62 = vmul.f32 %v6396_v27, %v3421_v9  ;;  %v3445_v56 = vmul.f32 %v6396_v27, %v3422_v28  ;;  %v3446_v3 = vmul.f32 %v6396_v27, %v3423_v2 }
 0x862   : > { %v3462_v0 = vadd.f32 %v6405_v43, %v3439_v52  ;;  %v3463_v44 = vadd.f32 %v6405_v43, %v3440_v4  ;;  %v3464_v20 = vadd.f32 %v6405_v43, %v3441_v38  ;;  %v3465_v32 = vadd.f32 %v6405_v43, %v3442_v16 }
 0x863   : > { %v3466_v39 = vadd.f32 %v6405_v43, %v3443_v18  ;;  %v3467_v49 = vadd.f32 %v6405_v43, %v3444_v62  ;;  %v3468_v17 = vadd.f32 %v6405_v43, %v3445_v56  ;;  %v3469_v54 = vadd.f32 %v6405_v43, %v3446_v3 }
 0x864   : > { %v3478_v12 = vmul.f32 2.0, %v3462_v0  ;;  %v3479_v26 = vmul.f32 2.0, %v3463_v44  ;;  %v3480_v47 = vmul.f32 2.0, %v3464_v20  ;;  %v3481_v31 = vmul.f32 2.0, %v3465_v32 }
 0x865   : > { %v3482_v19 = vmul.f32 2.0, %v3466_v39  ;;  %v3483_v8 = vmul.f32 2.0, %v3467_v49  ;;  %v3484_v50 = vmul.f32 2.0, %v3468_v17  ;;  %v3485_v45 = vmul.f32 2.0, %v3469_v54 }
 0x866   : > { %v3494_v10 = vmax.f32 %v3478_v12, 0.0  ;;  %v3495_v25 = vmax.f32 %v3479_v26, 0.0  ;;  %v3496_v14 = vmax.f32 %v3480_v47, 0.0  ;;  %v3497_v34 = vmax.f32 %v3481_v31, 0.0 }
 0x867   : > { %v3498_v29 = vmax.f32 %v3482_v19, 0.0  ;;  %v3499_v41 = vmax.f32 %v3483_v8, 0.0  ;;  %v3500_v35 = vmax.f32 %v3484_v50, 0.0  ;;  %v3501_v53 = vmax.f32 %v3485_v45, 0.0 }
 0x868   : > { %3510 = vst.msk [vmem:[%s6547_s17] sm:$0xff] %vm6797_vm2, %v3494_v10  ;;  %v3424_v7 = vmul.f32 %v4506_v30, %v6339_v15  ;;  %v3425_v40 = vmul.f32 %v4506_v30, %v6345_v1  ;;  %v3426_v51 = vmul.f32 %v4506_v30, %v6351_v59  ;;  %v3427_v61 = vmul.f32 %v4506_v30, %v6357_v46 }
 0x869   : > { %3511 = vst.msk [vmem:[%s6547_s17 + $0x8] sm:$0xff] %vm6798_vm4, %v3495_v25  ;;  %v3428_v15 = vmul.f32 %v4506_v30, %v6363_v11  ;;  %v3429_v1 = vmul.f32 %v4506_v30, %v6369_v21  ;;  %v3430_v59 = vmul.f32 %v4506_v30, %v6374_v22  ;;  %v3431_v46 = vmul.f32 %v4506_v30, %v6380_v23 }
 0x86a   : > { %3512 = vst.msk [vmem:[%s6547_s17 + $0x10] sm:$0xff] %vm6799_vm5, %v3496_v14  ;;  %v3447_v60 = vmul.f32 %v6396_v27, %v3424_v7  ;;  %v3448_v63 = vmul.f32 %v6396_v27, %v3425_v40  ;;  %v3449_v57 = vmul.f32 %v6396_v27, %v3426_v51  ;;  %v3450_v37 = vmul.f32 %v6396_v27, %v3427_v61 }
 0x86b   : > { %3513 = vst.msk [vmem:[%s6547_s17 + $0x18] sm:$0xff] %vm6800_vm7, %v3497_v34  ;;  %v3451_v24 = vmul.f32 %v6396_v27, %v3428_v15  ;;  %v3452_v58 = vmul.f32 %v6396_v27, %v3429_v1  ;;  %v3453_v11 = vmul.f32 %v6396_v27, %v3430_v59  ;;  %v3454_v21 = vmul.f32 %v6396_v27, %v3431_v46 }
 0x86c   : > { %3514 = vst.msk [vmem:[%s6547_s17 + $0x20] sm:$0xff] %vm6801_vm3, %v3498_v29  ;;  %v3470_v22 = vadd.f32 %v6405_v43, %v3447_v60  ;;  %v3471_v23 = vadd.f32 %v6405_v43, %v3448_v63  ;;  %v3472_v42 = vadd.f32 %v6405_v43, %v3449_v57  ;;  %v3473_v6 = vadd.f32 %v6405_v43, %v3450_v37 }
 0x86d   : > { %3515 = vst.msk [vmem:[%s6547_s17 + $0x28] sm:$0xff] %vm6771_vm0, %v3499_v41  ;;  %v3474_v33 = vadd.f32 %v6405_v43, %v3451_v24  ;;  %v3475_v30 = vadd.f32 %v6405_v43, %v3452_v58  ;;  %v3476_v55 = vadd.f32 %v6405_v43, %v3453_v11  ;;  %v3477_v36 = vadd.f32 %v6405_v43, %v3454_v21 }
 0x86e   : > { %3516 = vst.msk [vmem:[%s6547_s17 + $0x30] sm:$0xff] %vm6802_vm12, %v3500_v35  ;;  %v3486_v13 = vmul.f32 2.0, %v3470_v22  ;;  %v3487_v48 = vmul.f32 2.0, %v3471_v23  ;;  %v3488_v5 = vmul.f32 2.0, %v3472_v42  ;;  %v3489_v27 = vmul.f32 2.0, %v3473_v6 }
 0x86f   : > { %3517 = vst.msk [vmem:[%s6547_s17 + $0x38] sm:$0xff] %vm6803_vm9, %v3501_v53  ;;  %v3490_v9 = vmul.f32 2.0, %v3474_v33  ;;  %v3491_v28 = vmul.f32 2.0, %v3475_v30  ;;  %v3492_v2 = vmul.f32 2.0, %v3476_v55  ;;  %v3493_v52 = vmul.f32 2.0, %v3477_v36 }
 0x870   : > { %v3502_v4 = vmax.f32 %v3486_v13, 0.0  ;;  %v3503_v38 = vmax.f32 %v3487_v48, 0.0  ;;  %v3504_v16 = vmax.f32 %v3488_v5, 0.0  ;;  %v3505_v18 = vmax.f32 %v3489_v27, 0.0 }
 0x871   : > { %v3506_v62 = vmax.f32 %v3490_v9, 0.0  ;;  %v3507_v56 = vmax.f32 %v3491_v28, 0.0  ;;  %v3508_v3 = vmax.f32 %v3492_v2, 0.0  ;;  %v3509_v0 = vmax.f32 %v3493_v52, 0.0 }
 0x872   : > { %3518 = vst.msk [vmem:[%s6547_s17 + $0x40] sm:$0xff] %vm6804_vm14, %v3502_v4 }
 0x873   : > { %3519 = vst.msk [vmem:[%s6547_s17 + $0x48] sm:$0xff] %vm6805_vm11, %v3503_v38 }
 0x874   : > { %3520 = vst.msk [vmem:[%s6547_s17 + $0x50] sm:$0xff] %vm6806_vm13, %v3504_v16 }
 0x875   : > { %3521 = vst.msk [vmem:[%s6547_s17 + $0x58] sm:$0xff] %vm6807_vm15, %v3505_v18 }
 0x876   : > { %3522 = vst.msk [vmem:[%s6547_s17 + $0x60] sm:$0xff] %vm6808_vm1, %v3506_v62 }
 0x877   : > { %3523 = vst.msk [vmem:[%s6547_s17 + $0x68] sm:$0xff] %vm6809_vm6, %v3507_v56 }
 0x878   : > { %3524 = vst.msk [vmem:[%s6547_s17 + $0x70] sm:$0xff] %vm6810_vm10, %v3508_v3 }
 0x879   : > { %3525 = vst.msk [vmem:[%s6547_s17 + $0x78] sm:$0xff] %vm6811_vm8, %v3509_v0 }
 0x87a PF: > { %s27_s28 = sadd.s32 1, %s4545_s28   ;;  %s6812_s24 = smov %s4537_s26 }
 0x87b   : > { %p24_p1 = scmp.ge.s32.totalorder %s27_s28, 6   ;;  %s6813_s25 = smov %s4541_s27 }
 0x87c   : > { %s6814_s26 = smov %s6817_s29  ;;  %s6815_s27 = smov %s6821_s0 }
 0x87d   :  { %26 = sbr.rel (!%p24_p1) target bundleno = 4 (0x4), region = 140 }

</bundles_post_ra>
